<compile_context>
chip_gen: v7x
topology: tpu7x:2x2x1
jax: 0.10.0
libtpu: 0.0.40
codegen_flags: <defaults>
</compile_context>

<pallas_src>
import jax
import jax.numpy as jnp
from jax.experimental import pallas as pl
from jax.experimental.pallas import tpu as pltpu

_LN_EPS = 1e-5  # torch.nn.LayerNorm default


def _ddsc_kernel(x_ref, mask_ref, dw_w_ref, dw_b_ref, pw_w_ref, pw_b_ref,
                 ln1_g_ref, ln1_b_ref, ln2_g_ref, ln2_b_ref, out_ref):
    num_layers, _, kernel_size = dw_w_ref.shape
    t_pad = x_ref.shape[-1]

    x = x_ref[0].astype(jnp.float32)        # (C, Tp)
    mask = mask_ref[0].astype(jnp.float32)  # (1, Tp)

    def layer_norm(h, gamma, beta):
        # LayerNorm over the channel axis (sublanes).
        mu = jnp.mean(h, axis=0, keepdims=True)
        var = jnp.mean(jnp.square(h - mu), axis=0, keepdims=True)
        return (h - mu) * jax.lax.rsqrt(var + _LN_EPS) * gamma + beta

    for l in range(num_layers):             # static unroll: dilation is per-layer
        dilation = kernel_size ** l
        pad = (kernel_size * dilation - dilation) // 2

        xm = x * mask                        # spec: re-mask before every conv
        w = dw_w_ref[l]                      # (C, K)

        # Depthwise dilated conv: out[c,t] = b[c] + sum_k w[c,k]*xm[c, t + k*d - pad]
        # Implemented with circular lane rolls; the wrapper guarantees a zero halo
        # of >= pad columns on both ends, so wrapped lanes never reach valid columns.
        acc = None
        for k in range(kernel_size):
            shift = (pad - k * dilation) % t_pad
            shifted = xm if shift == 0 else pltpu.roll(xm, shift, axis=1)
            term = w[:, k:k + 1] * shifted
            acc = term if acc is None else acc + term
        h = acc + dw_b_ref[l]                # (C, Tp)

        h = layer_norm(h, ln1_g_ref[l], ln1_b_ref[l])
        h = jax.nn.gelu(h, approximate=True)
        # 1x1 pointwise conv == channel-mixing matmul on the MXU.
        h = jnp.dot(pw_w_ref[l], h, preferred_element_type=jnp.float32) + pw_b_ref[l]
        h = layer_norm(h, ln2_g_ref[l], ln2_b_ref[l])
        h = jax.nn.gelu(h, approximate=True)
        # dropout_rate == 0 at inference -> identity
        x = x + h

    out_ref[0] = (x * mask).astype(out_ref.dtype)


def vits_dilated_depth_separable_conv(inputs, padding_mask, params,
                                      global_conditioning=None):
    """Forward pass of VitsDilatedDepthSeparableConv.

    inputs:       (B, C, T) float32
    padding_mask: (B, 1, T) float32 (1.0 valid, 0.0 padded)
    params: dict with
      dw_w (L, C, K), dw_b (L, C, 1)      - depthwise dilated conv
      pw_w (L, C, C), pw_b (L, C, 1)      - 1x1 pointwise conv
      ln1_g/ln1_b/ln2_g/ln2_b (L, C, 1)   - LayerNorms over channels
    """
    B, C, T = inputs.shape
    num_layers, _, kernel_size = params["dw_w"].shape

    if global_conditioning is not None:
        inputs = inputs + global_conditioning

    # Zero halo >= max conv padding on both sides + round T up to a multiple of
    # 128 so the last dim is lane-dense (unmasked vst) and rolls are safe.
    d_max = kernel_size ** (num_layers - 1)
    halo = (kernel_size * d_max - d_max) // 2
    t_pad = ((T + 2 * halo + 127) // 128) * 128
    pad_l = halo
    pad_r = t_pad - T - pad_l

    x_p = jnp.pad(inputs, ((0, 0), (0, 0), (pad_l, pad_r)))
    m_p = jnp.pad(padding_mask.astype(inputs.dtype),
                  ((0, 0), (0, 0), (pad_l, pad_r)))

    param_arrays = (params["dw_w"], params["dw_b"], params["pw_w"],
                    params["pw_b"], params["ln1_g"], params["ln1_b"],
                    params["ln2_g"], params["ln2_b"])
    param_specs = [pl.BlockSpec(p.shape, lambda b: (0, 0, 0))
                   for p in param_arrays]

    out_p = pl.pallas_call(
        _ddsc_kernel,
        out_shape=jax.ShapeDtypeStruct((B, C, t_pad), inputs.dtype),
        grid=(B,),
        in_specs=[
            pl.BlockSpec((1, C, t_pad), lambda b: (b, 0, 0)),
            pl.BlockSpec((1, 1, t_pad), lambda b: (b, 0, 0)),
            *param_specs,
        ],
        out_specs=pl.BlockSpec((1, C, t_pad), lambda b: (b, 0, 0)),
        compiler_params=pltpu.CompilerParams(
            dimension_semantics=("parallel",),
            vmem_limit_bytes=48 * 1024 * 1024,
        ),
    )(x_p, m_p, *param_arrays)

    return out_p[:, :, pad_l:pad_l + T]


def _reference_forward(inputs, padding_mask, params):
    """Pure-JAX/XLA reference matching the PyTorch module (dropout=0)."""
    x = inputs
    num_layers, C, kernel_size = params["dw_w"].shape

    def layer_norm_c(h, gamma, beta):
        mu = jnp.mean(h, axis=1, keepdims=True)
        var = jnp.mean(jnp.square(h - mu), axis=1, keepdims=True)
        return (h - mu) * jax.lax.rsqrt(var + _LN_EPS) * gamma[None] + beta[None]

    for l in range(num_layers):
        dilation = kernel_size ** l
        pad = (kernel_size * dilation - dilation) // 2
        xm = x * padding_mask
        h = jax.lax.conv_general_dilated(
            xm, params["dw_w"][l][:, None, :],
            window_strides=(1,), padding=[(pad, pad)],
            rhs_dilation=(dilation,),
            dimension_numbers=("NCH", "OIH", "NCH"),
            feature_group_count=C,
            precision=jax.lax.Precision.HIGHEST,
        ) + params["dw_b"][l][None]
        h = layer_norm_c(h, params["ln1_g"][l], params["ln1_b"][l])
        h = jax.nn.gelu(h, approximate=True)
        h = jnp.einsum("oc,bct->bot", params["pw_w"][l], h,
                       precision=jax.lax.Precision.HIGHEST) + params["pw_b"][l][None]
        h = layer_norm_c(h, params["ln2_g"][l], params["ln2_b"][l])
        h = jax.nn.gelu(h, approximate=True)
        x = x + h
    return x * padding_mask


if __name__ == "__main__":
    key = jax.random.PRNGKey(0)
    B, C, T = 2, 32, 200                 # hidden_size=32, seq len not 128-aligned
    kernel_size, num_layers = 3, 3       # duration_predictor_kernel_size, depth_separable_num_layers

    keys = jax.random.split(key, 9)
    x = jax.random.normal(keys[0], (B, C, T), jnp.float32)
    lengths = jnp.array([T, 150])
    padding_mask = (jnp.arange(T)[None, None, :]
                    < lengths[:, None, None]).astype(jnp.float32)  # (B, 1, T)

    def rnd(k, shape, scale):
        return scale * jax.random.normal(k, shape, jnp.float32)

    params = {
        "dw_w": rnd(keys[1], (num_layers, C, kernel_size), 0.3),
        "dw_b": rnd(keys[2], (num_layers, C, 1), 0.1),
        "pw_w": rnd(keys[3], (num_layers, C, C), 0.2),
        "pw_b": rnd(keys[4], (num_layers, C, 1), 0.1),
        "ln1_g": 1.0 + rnd(keys[5], (num_layers, C, 1), 0.1),
        "ln1_b": rnd(keys[6], (num_layers, C, 1), 0.1),
        "ln2_g": 1.0 + rnd(keys[7], (num_layers, C, 1), 0.1),
        "ln2_b": rnd(keys[8], (num_layers, C, 1), 0.1),
    }

    fwd = jax.jit(vits_dilated_depth_separable_conv)
    out = jax.block_until_ready(fwd(x, padding_mask, params))

    ref = _reference_forward(x, padding_mask, params)

    assert out.shape == (B, C, T)
    assert bool(jnp.all(jnp.isfinite(out)))
    max_err = float(jnp.max(jnp.abs(out - ref)))
    assert jnp.allclose(out, ref, atol=2e-2, rtol=2e-2), max_err
    # padded frames must be exactly zero
    assert bool(jnp.all(out[1, :, 150:] == 0.0))

    print("KERNEL_OK")
</pallas_src>

<mosaic_0001>
module attributes {stable_mosaic.version = 11 : i64} {
  func.func @_ddsc_kernel(%arg0: i32, %arg1: memref<1x32x256xf32, #tpu.memory_space<vmem>>, %arg2: memref<1x1x256xf32, #tpu.memory_space<vmem>>, %arg3: memref<3x32x3xf32, #tpu.memory_space<vmem>>, %arg4: memref<3x32x1xf32, #tpu.memory_space<vmem>>, %arg5: memref<3x32x32xf32, #tpu.memory_space<vmem>>, %arg6: memref<3x32x1xf32, #tpu.memory_space<vmem>>, %arg7: memref<3x32x1xf32, #tpu.memory_space<vmem>>, %arg8: memref<3x32x1xf32, #tpu.memory_space<vmem>>, %arg9: memref<3x32x1xf32, #tpu.memory_space<vmem>>, %arg10: memref<3x32x1xf32, #tpu.memory_space<vmem>>, %arg11: memref<1x32x256xf32, #tpu.memory_space<vmem>>) attributes {dimension_semantics = [#tpu.dimension_semantics<parallel>], iteration_bounds = array<i64: 2>, scalar_prefetch = 0 : i64, scratch_operands = 0 : i64, tpu.core_type = #tpu.core_type<tc>, window_params = [{transform_indices = @transform_0, window_bounds = array<i64: 1, 32, 256>}, {transform_indices = @transform_1, window_bounds = array<i64: 1, 1, 256>}, {pipeline_mode = #tpu.pipeline_mode<synchronous>, transform_indices = @transform_2, window_bounds = array<i64: 3, 32, 3>}, {pipeline_mode = #tpu.pipeline_mode<synchronous>, transform_indices = @transform_3, window_bounds = array<i64: 3, 32, 1>}, {pipeline_mode = #tpu.pipeline_mode<synchronous>, transform_indices = @transform_4, window_bounds = array<i64: 3, 32, 32>}, {pipeline_mode = #tpu.pipeline_mode<synchronous>, transform_indices = @transform_5, window_bounds = array<i64: 3, 32, 1>}, {pipeline_mode = #tpu.pipeline_mode<synchronous>, transform_indices = @transform_6, window_bounds = array<i64: 3, 32, 1>}, {pipeline_mode = #tpu.pipeline_mode<synchronous>, transform_indices = @transform_7, window_bounds = array<i64: 3, 32, 1>}, {pipeline_mode = #tpu.pipeline_mode<synchronous>, transform_indices = @transform_8, window_bounds = array<i64: 3, 32, 1>}, {pipeline_mode = #tpu.pipeline_mode<synchronous>, transform_indices = @transform_9, window_bounds = array<i64: 3, 32, 1>}, {transform_indices = @transform_10, window_bounds = array<i64: 1, 32, 256>}]} {
    %c0 = arith.constant 0 : index
    %c0_0 = arith.constant 0 : index
    %c0_1 = arith.constant 0 : index
    %0 = vector.load %arg1[%c0, %c0_0, %c0_1] : memref<1x32x256xf32, #tpu.memory_space<vmem>>, vector<1x32x256xf32>
    %1 = vector.shape_cast %0 : vector<1x32x256xf32> to vector<32x256xf32>
    %c0_2 = arith.constant 0 : index
    %c0_3 = arith.constant 0 : index
    %c0_4 = arith.constant 0 : index
    %2 = vector.load %arg2[%c0_2, %c0_3, %c0_4] : memref<1x1x256xf32, #tpu.memory_space<vmem>>, vector<1x1x256xf32>
    %3 = vector.shape_cast %2 : vector<1x1x256xf32> to vector<1x256xf32>
    %4 = vector.broadcast %3 : vector<1x256xf32> to vector<32x256xf32>
    %5 = arith.mulf %1, %4 : vector<32x256xf32>
    %c0_5 = arith.constant 0 : index
    %c0_6 = arith.constant 0 : index
    %c0_7 = arith.constant 0 : index
    %6 = vector.load %arg3[%c0_5, %c0_6, %c0_7] : memref<3x32x3xf32, #tpu.memory_space<vmem>>, vector<1x32x3xf32>
    %7 = vector.shape_cast %6 : vector<1x32x3xf32> to vector<32x3xf32>
    %c1_i32 = arith.constant 1 : i32
    %8 = tpu.dynamic_rotate %5 by %c1_i32 dim 1 : vector<32x256xf32>, i32 -> vector<32x256xf32>
    %9 = vector.extract_strided_slice %7 {offsets = [0, 0], sizes = [32, 1], strides = [1, 1]} : vector<32x3xf32> to vector<32x1xf32>
    %10 = vector.broadcast %9 : vector<32x1xf32> to vector<32x256xf32>
    %11 = arith.mulf %10, %8 : vector<32x256xf32>
    %12 = vector.extract_strided_slice %7 {offsets = [0, 1], sizes = [32, 1], strides = [1, 1]} : vector<32x3xf32> to vector<32x1xf32>
    %13 = vector.broadcast %12 : vector<32x1xf32> to vector<32x256xf32>
    %14 = arith.mulf %13, %5 : vector<32x256xf32>
    %15 = arith.addf %11, %14 : vector<32x256xf32>
    %c255_i32 = arith.constant 255 : i32
    %16 = tpu.dynamic_rotate %5 by %c255_i32 dim 1 : vector<32x256xf32>, i32 -> vector<32x256xf32>
    %17 = vector.extract_strided_slice %7 {offsets = [0, 2], sizes = [32, 1], strides = [1, 1]} : vector<32x3xf32> to vector<32x1xf32>
    %18 = vector.broadcast %17 : vector<32x1xf32> to vector<32x256xf32>
    %19 = arith.mulf %18, %16 : vector<32x256xf32>
    %20 = arith.addf %15, %19 : vector<32x256xf32>
    %c0_8 = arith.constant 0 : index
    %c0_9 = arith.constant 0 : index
    %c0_10 = arith.constant 0 : index
    %21 = vector.load %arg4[%c0_8, %c0_9, %c0_10] : memref<3x32x1xf32, #tpu.memory_space<vmem>>, vector<1x32x1xf32>
    %22 = vector.shape_cast %21 : vector<1x32x1xf32> to vector<32x1xf32>
    %23 = vector.broadcast %22 : vector<32x1xf32> to vector<32x256xf32>
    %24 = arith.addf %20, %23 : vector<32x256xf32>
    %c0_11 = arith.constant 0 : index
    %c0_12 = arith.constant 0 : index
    %c0_13 = arith.constant 0 : index
    %25 = vector.load %arg7[%c0_11, %c0_12, %c0_13] : memref<3x32x1xf32, #tpu.memory_space<vmem>>, vector<1x32x1xf32>
    %26 = vector.shape_cast %25 : vector<1x32x1xf32> to vector<32x1xf32>
    %c0_14 = arith.constant 0 : index
    %c0_15 = arith.constant 0 : index
    %c0_16 = arith.constant 0 : index
    %27 = vector.load %arg8[%c0_14, %c0_15, %c0_16] : memref<3x32x1xf32, #tpu.memory_space<vmem>>, vector<1x32x1xf32>
    %28 = vector.shape_cast %27 : vector<1x32x1xf32> to vector<32x1xf32>
    %cst = arith.constant dense<0.000000e+00> : vector<256xf32>
    %29 = vector.multi_reduction <add>, %24, %cst [0] : vector<32x256xf32> to vector<256xf32>
    %30 = vector.shape_cast %29 : vector<256xf32> to vector<1x256xf32>
    %cst_17 = arith.constant 3.200000e+01 : f32
    %31 = vector.broadcast %cst_17 : f32 to vector<1x256xf32>
    %32 = arith.divf %30, %31 : vector<1x256xf32>
    %33 = vector.broadcast %32 : vector<1x256xf32> to vector<32x256xf32>
    %34 = arith.subf %24, %33 : vector<32x256xf32>
    %35 = arith.mulf %34, %34 : vector<32x256xf32>
    %cst_18 = arith.constant dense<0.000000e+00> : vector<256xf32>
    %36 = vector.multi_reduction <add>, %35, %cst_18 [0] : vector<32x256xf32> to vector<256xf32>
    %37 = vector.shape_cast %36 : vector<256xf32> to vector<1x256xf32>
    %cst_19 = arith.constant 3.200000e+01 : f32
    %38 = vector.broadcast %cst_19 : f32 to vector<1x256xf32>
    %39 = arith.divf %37, %38 : vector<1x256xf32>
    %40 = vector.broadcast %32 : vector<1x256xf32> to vector<32x256xf32>
    %41 = arith.subf %24, %40 : vector<32x256xf32>
    %cst_20 = arith.constant 9.99999974E-6 : f32
    %42 = vector.broadcast %cst_20 : f32 to vector<1x256xf32>
    %43 = arith.addf %39, %42 : vector<1x256xf32>
    %44 = math.rsqrt %43 : vector<1x256xf32>
    %45 = vector.broadcast %44 : vector<1x256xf32> to vector<32x256xf32>
    %46 = arith.mulf %41, %45 : vector<32x256xf32>
    %47 = vector.broadcast %26 : vector<32x1xf32> to vector<32x256xf32>
    %48 = arith.mulf %46, %47 : vector<32x256xf32>
    %49 = vector.broadcast %28 : vector<32x1xf32> to vector<32x256xf32>
    %50 = arith.addf %48, %49 : vector<32x256xf32>
    %51 = arith.mulf %50, %50 : vector<32x256xf32>
    %52 = arith.mulf %50, %51 : vector<32x256xf32>
    %cst_21 = arith.constant 4.471500e-02 : f32
    %53 = vector.broadcast %cst_21 : f32 to vector<32x256xf32>
    %54 = arith.mulf %53, %52 : vector<32x256xf32>
    %55 = arith.addf %50, %54 : vector<32x256xf32>
    %cst_22 = arith.constant 0.797884583 : f32
    %56 = vector.broadcast %cst_22 : f32 to vector<32x256xf32>
    %57 = arith.mulf %56, %55 : vector<32x256xf32>
    %58 = math.tanh %57 : vector<32x256xf32>
    %cst_23 = arith.constant 1.000000e+00 : f32
    %59 = vector.broadcast %cst_23 : f32 to vector<32x256xf32>
    %60 = arith.addf %59, %58 : vector<32x256xf32>
    %cst_24 = arith.constant 5.000000e-01 : f32
    %61 = vector.broadcast %cst_24 : f32 to vector<32x256xf32>
    %62 = arith.mulf %61, %60 : vector<32x256xf32>
    %63 = arith.mulf %50, %62 : vector<32x256xf32>
    %c0_25 = arith.constant 0 : index
    %c0_26 = arith.constant 0 : index
    %c0_27 = arith.constant 0 : index
    %64 = vector.load %arg5[%c0_25, %c0_26, %c0_27] : memref<3x32x32xf32, #tpu.memory_space<vmem>>, vector<1x32x32xf32>
    %65 = vector.shape_cast %64 : vector<1x32x32xf32> to vector<32x32xf32>
    %cst_28 = arith.constant dense<0.000000e+00> : vector<32x256xf32>
    %66 = tpu.matmul %65, %63, %cst_28 {dimension_numbers = #tpu.dot_dimension_numbers<[1], [0], [0], [1], [0, 0, 1, 1], [], []>} : vector<32x32xf32>, vector<32x256xf32>, vector<32x256xf32> -> vector<32x256xf32>
    %c0_29 = arith.constant 0 : index
    %c0_30 = arith.constant 0 : index
    %c0_31 = arith.constant 0 : index
    %67 = vector.load %arg6[%c0_29, %c0_30, %c0_31] : memref<3x32x1xf32, #tpu.memory_space<vmem>>, vector<1x32x1xf32>
    %68 = vector.shape_cast %67 : vector<1x32x1xf32> to vector<32x1xf32>
    %69 = vector.broadcast %68 : vector<32x1xf32> to vector<32x256xf32>
    %70 = arith.addf %66, %69 : vector<32x256xf32>
    %c0_32 = arith.constant 0 : index
    %c0_33 = arith.constant 0 : index
    %c0_34 = arith.constant 0 : index
    %71 = vector.load %arg9[%c0_32, %c0_33, %c0_34] : memref<3x32x1xf32, #tpu.memory_space<vmem>>, vector<1x32x1xf32>
    %72 = vector.shape_cast %71 : vector<1x32x1xf32> to vector<32x1xf32>
    %c0_35 = arith.constant 0 : index
    %c0_36 = arith.constant 0 : index
    %c0_37 = arith.constant 0 : index
    %73 = vector.load %arg10[%c0_35, %c0_36, %c0_37] : memref<3x32x1xf32, #tpu.memory_space<vmem>>, vector<1x32x1xf32>
    %74 = vector.shape_cast %73 : vector<1x32x1xf32> to vector<32x1xf32>
    %cst_38 = arith.constant dense<0.000000e+00> : vector<256xf32>
    %75 = vector.multi_reduction <add>, %70, %cst_38 [0] : vector<32x256xf32> to vector<256xf32>
    %76 = vector.shape_cast %75 : vector<256xf32> to vector<1x256xf32>
    %cst_39 = arith.constant 3.200000e+01 : f32
    %77 = vector.broadcast %cst_39 : f32 to vector<1x256xf32>
    %78 = arith.divf %76, %77 : vector<1x256xf32>
    %79 = vector.broadcast %78 : vector<1x256xf32> to vector<32x256xf32>
    %80 = arith.subf %70, %79 : vector<32x256xf32>
    %81 = arith.mulf %80, %80 : vector<32x256xf32>
    %cst_40 = arith.constant dense<0.000000e+00> : vector<256xf32>
    %82 = vector.multi_reduction <add>, %81, %cst_40 [0] : vector<32x256xf32> to vector<256xf32>
    %83 = vector.shape_cast %82 : vector<256xf32> to vector<1x256xf32>
    %cst_41 = arith.constant 3.200000e+01 : f32
    %84 = vector.broadcast %cst_41 : f32 to vector<1x256xf32>
    %85 = arith.divf %83, %84 : vector<1x256xf32>
    %86 = vector.broadcast %78 : vector<1x256xf32> to vector<32x256xf32>
    %87 = arith.subf %70, %86 : vector<32x256xf32>
    %cst_42 = arith.constant 9.99999974E-6 : f32
    %88 = vector.broadcast %cst_42 : f32 to vector<1x256xf32>
    %89 = arith.addf %85, %88 : vector<1x256xf32>
    %90 = math.rsqrt %89 : vector<1x256xf32>
    %91 = vector.broadcast %90 : vector<1x256xf32> to vector<32x256xf32>
    %92 = arith.mulf %87, %91 : vector<32x256xf32>
    %93 = vector.broadcast %72 : vector<32x1xf32> to vector<32x256xf32>
    %94 = arith.mulf %92, %93 : vector<32x256xf32>
    %95 = vector.broadcast %74 : vector<32x1xf32> to vector<32x256xf32>
    %96 = arith.addf %94, %95 : vector<32x256xf32>
    %97 = arith.mulf %96, %96 : vector<32x256xf32>
    %98 = arith.mulf %96, %97 : vector<32x256xf32>
    %cst_43 = arith.constant 4.471500e-02 : f32
    %99 = vector.broadcast %cst_43 : f32 to vector<32x256xf32>
    %100 = arith.mulf %99, %98 : vector<32x256xf32>
    %101 = arith.addf %96, %100 : vector<32x256xf32>
    %cst_44 = arith.constant 0.797884583 : f32
    %102 = vector.broadcast %cst_44 : f32 to vector<32x256xf32>
    %103 = arith.mulf %102, %101 : vector<32x256xf32>
    %104 = math.tanh %103 : vector<32x256xf32>
    %cst_45 = arith.constant 1.000000e+00 : f32
    %105 = vector.broadcast %cst_45 : f32 to vector<32x256xf32>
    %106 = arith.addf %105, %104 : vector<32x256xf32>
    %cst_46 = arith.constant 5.000000e-01 : f32
    %107 = vector.broadcast %cst_46 : f32 to vector<32x256xf32>
    %108 = arith.mulf %107, %106 : vector<32x256xf32>
    %109 = arith.mulf %96, %108 : vector<32x256xf32>
    %110 = arith.addf %1, %109 : vector<32x256xf32>
    %111 = vector.broadcast %3 : vector<1x256xf32> to vector<32x256xf32>
    %112 = arith.mulf %110, %111 : vector<32x256xf32>
    %c1 = arith.constant 1 : index
    %c0_47 = arith.constant 0 : index
    %c0_48 = arith.constant 0 : index
    %113 = vector.load %arg3[%c1, %c0_47, %c0_48] : memref<3x32x3xf32, #tpu.memory_space<vmem>>, vector<1x32x3xf32>
    %114 = vector.shape_cast %113 : vector<1x32x3xf32> to vector<32x3xf32>
    %c3_i32 = arith.constant 3 : i32
    %115 = tpu.dynamic_rotate %112 by %c3_i32 dim 1 : vector<32x256xf32>, i32 -> vector<32x256xf32>
    %116 = vector.extract_strided_slice %114 {offsets = [0, 0], sizes = [32, 1], strides = [1, 1]} : vector<32x3xf32> to vector<32x1xf32>
    %117 = vector.broadcast %116 : vector<32x1xf32> to vector<32x256xf32>
    %118 = arith.mulf %117, %115 : vector<32x256xf32>
    %119 = vector.extract_strided_slice %114 {offsets = [0, 1], sizes = [32, 1], strides = [1, 1]} : vector<32x3xf32> to vector<32x1xf32>
    %120 = vector.broadcast %119 : vector<32x1xf32> to vector<32x256xf32>
    %121 = arith.mulf %120, %112 : vector<32x256xf32>
    %122 = arith.addf %118, %121 : vector<32x256xf32>
    %c253_i32 = arith.constant 253 : i32
    %123 = tpu.dynamic_rotate %112 by %c253_i32 dim 1 : vector<32x256xf32>, i32 -> vector<32x256xf32>
    %124 = vector.extract_strided_slice %114 {offsets = [0, 2], sizes = [32, 1], strides = [1, 1]} : vector<32x3xf32> to vector<32x1xf32>
    %125 = vector.broadcast %124 : vector<32x1xf32> to vector<32x256xf32>
    %126 = arith.mulf %125, %123 : vector<32x256xf32>
    %127 = arith.addf %122, %126 : vector<32x256xf32>
    %c1_49 = arith.constant 1 : index
    %c0_50 = arith.constant 0 : index
    %c0_51 = arith.constant 0 : index
    %128 = vector.load %arg4[%c1_49, %c0_50, %c0_51] : memref<3x32x1xf32, #tpu.memory_space<vmem>>, vector<1x32x1xf32>
    %129 = vector.shape_cast %128 : vector<1x32x1xf32> to vector<32x1xf32>
    %130 = vector.broadcast %129 : vector<32x1xf32> to vector<32x256xf32>
    %131 = arith.addf %127, %130 : vector<32x256xf32>
    %c1_52 = arith.constant 1 : index
    %c0_53 = arith.constant 0 : index
    %c0_54 = arith.constant 0 : index
    %132 = vector.load %arg7[%c1_52, %c0_53, %c0_54] : memref<3x32x1xf32, #tpu.memory_space<vmem>>, vector<1x32x1xf32>
    %133 = vector.shape_cast %132 : vector<1x32x1xf32> to vector<32x1xf32>
    %c1_55 = arith.constant 1 : index
    %c0_56 = arith.constant 0 : index
    %c0_57 = arith.constant 0 : index
    %134 = vector.load %arg8[%c1_55, %c0_56, %c0_57] : memref<3x32x1xf32, #tpu.memory_space<vmem>>, vector<1x32x1xf32>
    %135 = vector.shape_cast %134 : vector<1x32x1xf32> to vector<32x1xf32>
    %cst_58 = arith.constant dense<0.000000e+00> : vector<256xf32>
    %136 = vector.multi_reduction <add>, %131, %cst_58 [0] : vector<32x256xf32> to vector<256xf32>
    %137 = vector.shape_cast %136 : vector<256xf32> to vector<1x256xf32>
    %cst_59 = arith.constant 3.200000e+01 : f32
    %138 = vector.broadcast %cst_59 : f32 to vector<1x256xf32>
    %139 = arith.divf %137, %138 : vector<1x256xf32>
    %140 = vector.broadcast %139 : vector<1x256xf32> to vector<32x256xf32>
    %141 = arith.subf %131, %140 : vector<32x256xf32>
    %142 = arith.mulf %141, %141 : vector<32x256xf32>
    %cst_60 = arith.constant dense<0.000000e+00> : vector<256xf32>
    %143 = vector.multi_reduction <add>, %142, %cst_60 [0] : vector<32x256xf32> to vector<256xf32>
    %144 = vector.shape_cast %143 : vector<256xf32> to vector<1x256xf32>
    %cst_61 = arith.constant 3.200000e+01 : f32
    %145 = vector.broadcast %cst_61 : f32 to vector<1x256xf32>
    %146 = arith.divf %144, %145 : vector<1x256xf32>
    %147 = vector.broadcast %139 : vector<1x256xf32> to vector<32x256xf32>
    %148 = arith.subf %131, %147 : vector<32x256xf32>
    %cst_62 = arith.constant 9.99999974E-6 : f32
    %149 = vector.broadcast %cst_62 : f32 to vector<1x256xf32>
    %150 = arith.addf %146, %149 : vector<1x256xf32>
    %151 = math.rsqrt %150 : vector<1x256xf32>
    %152 = vector.broadcast %151 : vector<1x256xf32> to vector<32x256xf32>
    %153 = arith.mulf %148, %152 : vector<32x256xf32>
    %154 = vector.broadcast %133 : vector<32x1xf32> to vector<32x256xf32>
    %155 = arith.mulf %153, %154 : vector<32x256xf32>
    %156 = vector.broadcast %135 : vector<32x1xf32> to vector<32x256xf32>
    %157 = arith.addf %155, %156 : vector<32x256xf32>
    %158 = arith.mulf %157, %157 : vector<32x256xf32>
    %159 = arith.mulf %157, %158 : vector<32x256xf32>
    %cst_63 = arith.constant 4.471500e-02 : f32
    %160 = vector.broadcast %cst_63 : f32 to vector<32x256xf32>
    %161 = arith.mulf %160, %159 : vector<32x256xf32>
    %162 = arith.addf %157, %161 : vector<32x256xf32>
    %cst_64 = arith.constant 0.797884583 : f32
    %163 = vector.broadcast %cst_64 : f32 to vector<32x256xf32>
    %164 = arith.mulf %163, %162 : vector<32x256xf32>
    %165 = math.tanh %164 : vector<32x256xf32>
    %cst_65 = arith.constant 1.000000e+00 : f32
    %166 = vector.broadcast %cst_65 : f32 to vector<32x256xf32>
    %167 = arith.addf %166, %165 : vector<32x256xf32>
    %cst_66 = arith.constant 5.000000e-01 : f32
    %168 = vector.broadcast %cst_66 : f32 to vector<32x256xf32>
    %169 = arith.mulf %168, %167 : vector<32x256xf32>
    %170 = arith.mulf %157, %169 : vector<32x256xf32>
    %c1_67 = arith.constant 1 : index
    %c0_68 = arith.constant 0 : index
    %c0_69 = arith.constant 0 : index
    %171 = vector.load %arg5[%c1_67, %c0_68, %c0_69] : memref<3x32x32xf32, #tpu.memory_space<vmem>>, vector<1x32x32xf32>
    %172 = vector.shape_cast %171 : vector<1x32x32xf32> to vector<32x32xf32>
    %cst_70 = arith.constant dense<0.000000e+00> : vector<32x256xf32>
    %173 = tpu.matmul %172, %170, %cst_70 {dimension_numbers = #tpu.dot_dimension_numbers<[1], [0], [0], [1], [0, 0, 1, 1], [], []>} : vector<32x32xf32>, vector<32x256xf32>, vector<32x256xf32> -> vector<32x256xf32>
    %c1_71 = arith.constant 1 : index
    %c0_72 = arith.constant 0 : index
    %c0_73 = arith.constant 0 : index
    %174 = vector.load %arg6[%c1_71, %c0_72, %c0_73] : memref<3x32x1xf32, #tpu.memory_space<vmem>>, vector<1x32x1xf32>
    %175 = vector.shape_cast %174 : vector<1x32x1xf32> to vector<32x1xf32>
    %176 = vector.broadcast %175 : vector<32x1xf32> to vector<32x256xf32>
    %177 = arith.addf %173, %176 : vector<32x256xf32>
    %c1_74 = arith.constant 1 : index
    %c0_75 = arith.constant 0 : index
    %c0_76 = arith.constant 0 : index
    %178 = vector.load %arg9[%c1_74, %c0_75, %c0_76] : memref<3x32x1xf32, #tpu.memory_space<vmem>>, vector<1x32x1xf32>
    %179 = vector.shape_cast %178 : vector<1x32x1xf32> to vector<32x1xf32>
    %c1_77 = arith.constant 1 : index
    %c0_78 = arith.constant 0 : index
    %c0_79 = arith.constant 0 : index
    %180 = vector.load %arg10[%c1_77, %c0_78, %c0_79] : memref<3x32x1xf32, #tpu.memory_space<vmem>>, vector<1x32x1xf32>
    %181 = vector.shape_cast %180 : vector<1x32x1xf32> to vector<32x1xf32>
    %cst_80 = arith.constant dense<0.000000e+00> : vector<256xf32>
    %182 = vector.multi_reduction <add>, %177, %cst_80 [0] : vector<32x256xf32> to vector<256xf32>
    %183 = vector.shape_cast %182 : vector<256xf32> to vector<1x256xf32>
    %cst_81 = arith.constant 3.200000e+01 : f32
    %184 = vector.broadcast %cst_81 : f32 to vector<1x256xf32>
    %185 = arith.divf %183, %184 : vector<1x256xf32>
    %186 = vector.broadcast %185 : vector<1x256xf32> to vector<32x256xf32>
    %187 = arith.subf %177, %186 : vector<32x256xf32>
    %188 = arith.mulf %187, %187 : vector<32x256xf32>
    %cst_82 = arith.constant dense<0.000000e+00> : vector<256xf32>
    %189 = vector.multi_reduction <add>, %188, %cst_82 [0] : vector<32x256xf32> to vector<256xf32>
    %190 = vector.shape_cast %189 : vector<256xf32> to vector<1x256xf32>
    %cst_83 = arith.constant 3.200000e+01 : f32
    %191 = vector.broadcast %cst_83 : f32 to vector<1x256xf32>
    %192 = arith.divf %190, %191 : vector<1x256xf32>
    %193 = vector.broadcast %185 : vector<1x256xf32> to vector<32x256xf32>
    %194 = arith.subf %177, %193 : vector<32x256xf32>
    %cst_84 = arith.constant 9.99999974E-6 : f32
    %195 = vector.broadcast %cst_84 : f32 to vector<1x256xf32>
    %196 = arith.addf %192, %195 : vector<1x256xf32>
    %197 = math.rsqrt %196 : vector<1x256xf32>
    %198 = vector.broadcast %197 : vector<1x256xf32> to vector<32x256xf32>
    %199 = arith.mulf %194, %198 : vector<32x256xf32>
    %200 = vector.broadcast %179 : vector<32x1xf32> to vector<32x256xf32>
    %201 = arith.mulf %199, %200 : vector<32x256xf32>
    %202 = vector.broadcast %181 : vector<32x1xf32> to vector<32x256xf32>
    %203 = arith.addf %201, %202 : vector<32x256xf32>
    %204 = arith.mulf %203, %203 : vector<32x256xf32>
    %205 = arith.mulf %203, %204 : vector<32x256xf32>
    %cst_85 = arith.constant 4.471500e-02 : f32
    %206 = vector.broadcast %cst_85 : f32 to vector<32x256xf32>
    %207 = arith.mulf %206, %205 : vector<32x256xf32>
    %208 = arith.addf %203, %207 : vector<32x256xf32>
    %cst_86 = arith.constant 0.797884583 : f32
    %209 = vector.broadcast %cst_86 : f32 to vector<32x256xf32>
    %210 = arith.mulf %209, %208 : vector<32x256xf32>
    %211 = math.tanh %210 : vector<32x256xf32>
    %cst_87 = arith.constant 1.000000e+00 : f32
    %212 = vector.broadcast %cst_87 : f32 to vector<32x256xf32>
    %213 = arith.addf %212, %211 : vector<32x256xf32>
    %cst_88 = arith.constant 5.000000e-01 : f32
    %214 = vector.broadcast %cst_88 : f32 to vector<32x256xf32>
    %215 = arith.mulf %214, %213 : vector<32x256xf32>
    %216 = arith.mulf %203, %215 : vector<32x256xf32>
    %217 = arith.addf %110, %216 : vector<32x256xf32>
    %218 = vector.broadcast %3 : vector<1x256xf32> to vector<32x256xf32>
    %219 = arith.mulf %217, %218 : vector<32x256xf32>
    %c2 = arith.constant 2 : index
    %c0_89 = arith.constant 0 : index
    %c0_90 = arith.constant 0 : index
    %220 = vector.load %arg3[%c2, %c0_89, %c0_90] : memref<3x32x3xf32, #tpu.memory_space<vmem>>, vector<1x32x3xf32>
    %221 = vector.shape_cast %220 : vector<1x32x3xf32> to vector<32x3xf32>
    %c9_i32 = arith.constant 9 : i32
    %222 = tpu.dynamic_rotate %219 by %c9_i32 dim 1 : vector<32x256xf32>, i32 -> vector<32x256xf32>
    %223 = vector.extract_strided_slice %221 {offsets = [0, 0], sizes = [32, 1], strides = [1, 1]} : vector<32x3xf32> to vector<32x1xf32>
    %224 = vector.broadcast %223 : vector<32x1xf32> to vector<32x256xf32>
    %225 = arith.mulf %224, %222 : vector<32x256xf32>
    %226 = vector.extract_strided_slice %221 {offsets = [0, 1], sizes = [32, 1], strides = [1, 1]} : vector<32x3xf32> to vector<32x1xf32>
    %227 = vector.broadcast %226 : vector<32x1xf32> to vector<32x256xf32>
    %228 = arith.mulf %227, %219 : vector<32x256xf32>
    %229 = arith.addf %225, %228 : vector<32x256xf32>
    %c247_i32 = arith.constant 247 : i32
    %230 = tpu.dynamic_rotate %219 by %c247_i32 dim 1 : vector<32x256xf32>, i32 -> vector<32x256xf32>
    %231 = vector.extract_strided_slice %221 {offsets = [0, 2], sizes = [32, 1], strides = [1, 1]} : vector<32x3xf32> to vector<32x1xf32>
    %232 = vector.broadcast %231 : vector<32x1xf32> to vector<32x256xf32>
    %233 = arith.mulf %232, %230 : vector<32x256xf32>
    %234 = arith.addf %229, %233 : vector<32x256xf32>
    %c2_91 = arith.constant 2 : index
    %c0_92 = arith.constant 0 : index
    %c0_93 = arith.constant 0 : index
    %235 = vector.load %arg4[%c2_91, %c0_92, %c0_93] : memref<3x32x1xf32, #tpu.memory_space<vmem>>, vector<1x32x1xf32>
    %236 = vector.shape_cast %235 : vector<1x32x1xf32> to vector<32x1xf32>
    %237 = vector.broadcast %236 : vector<32x1xf32> to vector<32x256xf32>
    %238 = arith.addf %234, %237 : vector<32x256xf32>
    %c2_94 = arith.constant 2 : index
    %c0_95 = arith.constant 0 : index
    %c0_96 = arith.constant 0 : index
    %239 = vector.load %arg7[%c2_94, %c0_95, %c0_96] : memref<3x32x1xf32, #tpu.memory_space<vmem>>, vector<1x32x1xf32>
    %240 = vector.shape_cast %239 : vector<1x32x1xf32> to vector<32x1xf32>
    %c2_97 = arith.constant 2 : index
    %c0_98 = arith.constant 0 : index
    %c0_99 = arith.constant 0 : index
    %241 = vector.load %arg8[%c2_97, %c0_98, %c0_99] : memref<3x32x1xf32, #tpu.memory_space<vmem>>, vector<1x32x1xf32>
    %242 = vector.shape_cast %241 : vector<1x32x1xf32> to vector<32x1xf32>
    %cst_100 = arith.constant dense<0.000000e+00> : vector<256xf32>
    %243 = vector.multi_reduction <add>, %238, %cst_100 [0] : vector<32x256xf32> to vector<256xf32>
    %244 = vector.shape_cast %243 : vector<256xf32> to vector<1x256xf32>
    %cst_101 = arith.constant 3.200000e+01 : f32
    %245 = vector.broadcast %cst_101 : f32 to vector<1x256xf32>
    %246 = arith.divf %244, %245 : vector<1x256xf32>
    %247 = vector.broadcast %246 : vector<1x256xf32> to vector<32x256xf32>
    %248 = arith.subf %238, %247 : vector<32x256xf32>
    %249 = arith.mulf %248, %248 : vector<32x256xf32>
    %cst_102 = arith.constant dense<0.000000e+00> : vector<256xf32>
    %250 = vector.multi_reduction <add>, %249, %cst_102 [0] : vector<32x256xf32> to vector<256xf32>
    %251 = vector.shape_cast %250 : vector<256xf32> to vector<1x256xf32>
    %cst_103 = arith.constant 3.200000e+01 : f32
    %252 = vector.broadcast %cst_103 : f32 to vector<1x256xf32>
    %253 = arith.divf %251, %252 : vector<1x256xf32>
    %254 = vector.broadcast %246 : vector<1x256xf32> to vector<32x256xf32>
    %255 = arith.subf %238, %254 : vector<32x256xf32>
    %cst_104 = arith.constant 9.99999974E-6 : f32
    %256 = vector.broadcast %cst_104 : f32 to vector<1x256xf32>
    %257 = arith.addf %253, %256 : vector<1x256xf32>
    %258 = math.rsqrt %257 : vector<1x256xf32>
    %259 = vector.broadcast %258 : vector<1x256xf32> to vector<32x256xf32>
    %260 = arith.mulf %255, %259 : vector<32x256xf32>
    %261 = vector.broadcast %240 : vector<32x1xf32> to vector<32x256xf32>
    %262 = arith.mulf %260, %261 : vector<32x256xf32>
    %263 = vector.broadcast %242 : vector<32x1xf32> to vector<32x256xf32>
    %264 = arith.addf %262, %263 : vector<32x256xf32>
    %265 = arith.mulf %264, %264 : vector<32x256xf32>
    %266 = arith.mulf %264, %265 : vector<32x256xf32>
    %cst_105 = arith.constant 4.471500e-02 : f32
    %267 = vector.broadcast %cst_105 : f32 to vector<32x256xf32>
    %268 = arith.mulf %267, %266 : vector<32x256xf32>
    %269 = arith.addf %264, %268 : vector<32x256xf32>
    %cst_106 = arith.constant 0.797884583 : f32
    %270 = vector.broadcast %cst_106 : f32 to vector<32x256xf32>
    %271 = arith.mulf %270, %269 : vector<32x256xf32>
    %272 = math.tanh %271 : vector<32x256xf32>
    %cst_107 = arith.constant 1.000000e+00 : f32
    %273 = vector.broadcast %cst_107 : f32 to vector<32x256xf32>
    %274 = arith.addf %273, %272 : vector<32x256xf32>
    %cst_108 = arith.constant 5.000000e-01 : f32
    %275 = vector.broadcast %cst_108 : f32 to vector<32x256xf32>
    %276 = arith.mulf %275, %274 : vector<32x256xf32>
    %277 = arith.mulf %264, %276 : vector<32x256xf32>
    %c2_109 = arith.constant 2 : index
    %c0_110 = arith.constant 0 : index
    %c0_111 = arith.constant 0 : index
    %278 = vector.load %arg5[%c2_109, %c0_110, %c0_111] : memref<3x32x32xf32, #tpu.memory_space<vmem>>, vector<1x32x32xf32>
    %279 = vector.shape_cast %278 : vector<1x32x32xf32> to vector<32x32xf32>
    %cst_112 = arith.constant dense<0.000000e+00> : vector<32x256xf32>
    %280 = tpu.matmul %279, %277, %cst_112 {dimension_numbers = #tpu.dot_dimension_numbers<[1], [0], [0], [1], [0, 0, 1, 1], [], []>} : vector<32x32xf32>, vector<32x256xf32>, vector<32x256xf32> -> vector<32x256xf32>
    %c2_113 = arith.constant 2 : index
    %c0_114 = arith.constant 0 : index
    %c0_115 = arith.constant 0 : index
    %281 = vector.load %arg6[%c2_113, %c0_114, %c0_115] : memref<3x32x1xf32, #tpu.memory_space<vmem>>, vector<1x32x1xf32>
    %282 = vector.shape_cast %281 : vector<1x32x1xf32> to vector<32x1xf32>
    %283 = vector.broadcast %282 : vector<32x1xf32> to vector<32x256xf32>
    %284 = arith.addf %280, %283 : vector<32x256xf32>
    %c2_116 = arith.constant 2 : index
    %c0_117 = arith.constant 0 : index
    %c0_118 = arith.constant 0 : index
    %285 = vector.load %arg9[%c2_116, %c0_117, %c0_118] : memref<3x32x1xf32, #tpu.memory_space<vmem>>, vector<1x32x1xf32>
    %286 = vector.shape_cast %285 : vector<1x32x1xf32> to vector<32x1xf32>
    %c2_119 = arith.constant 2 : index
    %c0_120 = arith.constant 0 : index
    %c0_121 = arith.constant 0 : index
    %287 = vector.load %arg10[%c2_119, %c0_120, %c0_121] : memref<3x32x1xf32, #tpu.memory_space<vmem>>, vector<1x32x1xf32>
    %288 = vector.shape_cast %287 : vector<1x32x1xf32> to vector<32x1xf32>
    %cst_122 = arith.constant dense<0.000000e+00> : vector<256xf32>
    %289 = vector.multi_reduction <add>, %284, %cst_122 [0] : vector<32x256xf32> to vector<256xf32>
    %290 = vector.shape_cast %289 : vector<256xf32> to vector<1x256xf32>
    %cst_123 = arith.constant 3.200000e+01 : f32
    %291 = vector.broadcast %cst_123 : f32 to vector<1x256xf32>
    %292 = arith.divf %290, %291 : vector<1x256xf32>
    %293 = vector.broadcast %292 : vector<1x256xf32> to vector<32x256xf32>
    %294 = arith.subf %284, %293 : vector<32x256xf32>
    %295 = arith.mulf %294, %294 : vector<32x256xf32>
    %cst_124 = arith.constant dense<0.000000e+00> : vector<256xf32>
    %296 = vector.multi_reduction <add>, %295, %cst_124 [0] : vector<32x256xf32> to vector<256xf32>
    %297 = vector.shape_cast %296 : vector<256xf32> to vector<1x256xf32>
    %cst_125 = arith.constant 3.200000e+01 : f32
    %298 = vector.broadcast %cst_125 : f32 to vector<1x256xf32>
    %299 = arith.divf %297, %298 : vector<1x256xf32>
    %300 = vector.broadcast %292 : vector<1x256xf32> to vector<32x256xf32>
    %301 = arith.subf %284, %300 : vector<32x256xf32>
    %cst_126 = arith.constant 9.99999974E-6 : f32
    %302 = vector.broadcast %cst_126 : f32 to vector<1x256xf32>
    %303 = arith.addf %299, %302 : vector<1x256xf32>
    %304 = math.rsqrt %303 : vector<1x256xf32>
    %305 = vector.broadcast %304 : vector<1x256xf32> to vector<32x256xf32>
    %306 = arith.mulf %301, %305 : vector<32x256xf32>
    %307 = vector.broadcast %286 : vector<32x1xf32> to vector<32x256xf32>
    %308 = arith.mulf %306, %307 : vector<32x256xf32>
    %309 = vector.broadcast %288 : vector<32x1xf32> to vector<32x256xf32>
    %310 = arith.addf %308, %309 : vector<32x256xf32>
    %311 = arith.mulf %310, %310 : vector<32x256xf32>
    %312 = arith.mulf %310, %311 : vector<32x256xf32>
    %cst_127 = arith.constant 4.471500e-02 : f32
    %313 = vector.broadcast %cst_127 : f32 to vector<32x256xf32>
    %314 = arith.mulf %313, %312 : vector<32x256xf32>
    %315 = arith.addf %310, %314 : vector<32x256xf32>
    %cst_128 = arith.constant 0.797884583 : f32
    %316 = vector.broadcast %cst_128 : f32 to vector<32x256xf32>
    %317 = arith.mulf %316, %315 : vector<32x256xf32>
    %318 = math.tanh %317 : vector<32x256xf32>
    %cst_129 = arith.constant 1.000000e+00 : f32
    %319 = vector.broadcast %cst_129 : f32 to vector<32x256xf32>
    %320 = arith.addf %319, %318 : vector<32x256xf32>
    %cst_130 = arith.constant 5.000000e-01 : f32
    %321 = vector.broadcast %cst_130 : f32 to vector<32x256xf32>
    %322 = arith.mulf %321, %320 : vector<32x256xf32>
    %323 = arith.mulf %310, %322 : vector<32x256xf32>
    %324 = arith.addf %217, %323 : vector<32x256xf32>
    %325 = vector.broadcast %3 : vector<1x256xf32> to vector<32x256xf32>
    %326 = arith.mulf %324, %325 : vector<32x256xf32>
    %c0_131 = arith.constant 0 : index
    %c0_132 = arith.constant 0 : index
    %c0_133 = arith.constant 0 : index
    %327 = vector.load %arg11[%c0_131, %c0_132, %c0_133] : memref<1x32x256xf32, #tpu.memory_space<vmem>>, vector<1x32x256xf32>
    %328 = vector.shape_cast %327 : vector<1x32x256xf32> to vector<32x256xf32>
    %329 = vector.shape_cast %326 : vector<32x256xf32> to vector<1x32x256xf32>
    tpu.vector_store %arg11[%c0_131, %c0_132, %c0_133], %329 {strides = array<i32>} : memref<1x32x256xf32, #tpu.memory_space<vmem>>, vector<1x32x256xf32>,
    return
  }
  func.func @transform_0(%arg0: i32) -> (i32, i32, i32) {
    %c0_i32 = arith.constant 0 : i32
    %c0_i32_0 = arith.constant 0 : i32
    %c0_i32_1 = arith.constant 0 : i32
    return %arg0, %c0_i32, %c0_i32_0 : i32, i32, i32
  }
  func.func @transform_1(%arg0: i32) -> (i32, i32, i32) {
    %c0_i32 = arith.constant 0 : i32
    %c0_i32_0 = arith.constant 0 : i32
    %c0_i32_1 = arith.constant 0 : i32
    return %arg0, %c0_i32, %c0_i32_0 : i32, i32, i32
  }
  func.func @transform_2(%arg0: i32) -> (i32, i32, i32) {
    %c0_i32 = arith.constant 0 : i32
    %c0_i32_0 = arith.constant 0 : i32
    %c0_i32_1 = arith.constant 0 : i32
    %c0_i32_2 = arith.constant 0 : i32
    return %c0_i32, %c0_i32_0, %c0_i32_1 : i32, i32, i32
  }
  func.func @transform_3(%arg0: i32) -> (i32, i32, i32) {
    %c0_i32 = arith.constant 0 : i32
    %c0_i32_0 = arith.constant 0 : i32
    %c0_i32_1 = arith.constant 0 : i32
    %c0_i32_2 = arith.constant 0 : i32
    return %c0_i32, %c0_i32_0, %c0_i32_1 : i32, i32, i32
  }
  func.func @transform_4(%arg0: i32) -> (i32, i32, i32) {
    %c0_i32 = arith.constant 0 : i32
    %c0_i32_0 = arith.constant 0 : i32
    %c0_i32_1 = arith.constant 0 : i32
    %c0_i32_2 = arith.constant 0 : i32
    return %c0_i32, %c0_i32_0, %c0_i32_1 : i32, i32, i32
  }
  func.func @transform_5(%arg0: i32) -> (i32, i32, i32) {
    %c0_i32 = arith.constant 0 : i32
    %c0_i32_0 = arith.constant 0 : i32
    %c0_i32_1 = arith.constant 0 : i32
    %c0_i32_2 = arith.constant 0 : i32
    return %c0_i32, %c0_i32_0, %c0_i32_1 : i32, i32, i32
  }
  func.func @transform_6(%arg0: i32) -> (i32, i32, i32) {
    %c0_i32 = arith.constant 0 : i32
    %c0_i32_0 = arith.constant 0 : i32
    %c0_i32_1 = arith.constant 0 : i32
    %c0_i32_2 = arith.constant 0 : i32
    return %c0_i32, %c0_i32_0, %c0_i32_1 : i32, i32, i32
  }
  func.func @transform_7(%arg0: i32) -> (i32, i32, i32) {
    %c0_i32 = arith.constant 0 : i32
    %c0_i32_0 = arith.constant 0 : i32
    %c0_i32_1 = arith.constant 0 : i32
    %c0_i32_2 = arith.constant 0 : i32
    return %c0_i32, %c0_i32_0, %c0_i32_1 : i32, i32, i32
  }
  func.func @transform_8(%arg0: i32) -> (i32, i32, i32) {
    %c0_i32 = arith.constant 0 : i32
    %c0_i32_0 = arith.constant 0 : i32
    %c0_i32_1 = arith.constant 0 : i32
    %c0_i32_2 = arith.constant 0 : i32
    return %c0_i32, %c0_i32_0, %c0_i32_1 : i32, i32, i32
  }
  func.func @transform_9(%arg0: i32) -> (i32, i32, i32) {
    %c0_i32 = arith.constant 0 : i32
    %c0_i32_0 = arith.constant 0 : i32
    %c0_i32_1 = arith.constant 0 : i32
    %c0_i32_2 = arith.constant 0 : i32
    return %c0_i32, %c0_i32_0, %c0_i32_1 : i32, i32, i32
  }
  func.func @transform_10(%arg0: i32) -> (i32, i32, i32) {
    %c0_i32 = arith.constant 0 : i32
    %c0_i32_0 = arith.constant 0 : i32
    %c0_i32_1 = arith.constant 0 : i32
    return %arg0, %c0_i32, %c0_i32_0 : i32, i32, i32
  }
}

</mosaic_0001>

<bundles_post_ra>
// kernel: vits_dilated_depth_separable_conv.1
= control target key start
LH: loop header
LB: loop body
LE: loop exit
PB: predicated region body
PF: predicated region fallthrough
CT: control target
= control target key end

     0   :  { %s3058_s13 = smov 0   ;;  %s4250_s0 = inlined_call_operand.vmem [shape: f32[2,32,256], index: 0, kind: input, shape index: {}]   ;;  %s4251_s1 = inlined_call_operand.vmem [shape: f32[2,1,256], index: 1, kind: input, shape index: {}]   ;;  %s4252_s2 = inlined_call_operand.vmem [shape: f32[3,32,3], index: 2, kind: input, shape index: {}]   ;;  %s4253_s3 = inlined_call_operand.vmem [shape: f32[3,32,1], index: 3, kind: input, shape index: {}]   ;;  %s4254_s4 = inlined_call_operand.vmem [shape: f32[3,32,32], index: 4, kind: input, shape index: {}]   ;;  %s4255_s5 = inlined_call_operand.vmem [shape: f32[3,32,1], index: 5, kind: input, shape index: {}]   ;;  %s4256_s6 = inlined_call_operand.vmem [shape: f32[3,32,1], index: 6, kind: input, shape index: {}]   ;;  %s4257_s7 = inlined_call_operand.vmem [shape: f32[3,32,1], index: 7, kind: input, shape index: {}]   ;;  %s4258_s8 = inlined_call_operand.vmem [shape: f32[3,32,1], index: 8, kind: input, shape index: {}]   ;;  %s4259_s9 = inlined_call_operand.vmem [shape: f32[3,32,1], index: 9, kind: input, shape index: {}]   ;;  %s4260_s10 = inlined_call_operand.vmem [shape: f32[2,32,256], index: 10, kind: output, shape index: {}]  }
   0x1 LB: > { %s2693_s14 = sadd.s32 4294967295, %s2991_s13   ;;  %p2697_p0 = scmp.ge.s32.totalorder %s2991_s13, 1  ;;  %s2991_s13 = sphi %s3058_s13, %s20_s13  }
   0x2   : > { %p321_p1 = scmp.lt.s32.totalorder %s2991_s13, 3 }
   0x4   : > { %p322_p2 = pnand %p2697_p0, %p321_p1 }
   0x5   : > { %v405_v0 = vld [vmem:[%s4252_s2] sm:$0xff] (!%p322_p2)  ;;  %v2993_v1 = vmov (!%p322_p2), 2   ;;  %v2994_v2 = vmov (!%p322_p2), 1   ;;  %p363_p3 = scmp.lt.s32.totalorder (!%p322_p2), %s2693_s14, 1  ;;  %v406_v3 = vld [vmem:[%s4252_s2 + $0x8] sm:$0xff] (!%p322_p2)  ;;  %v408_v4 = vld [vmem:[%s4252_s2 + $0x18] sm:$0xff] (!%p322_p2)  ;;  %v387_v5 = vlaneseq (!%p322_p2) }
   0x6   : > { %325 = sbr.rel (%p322_p2) target bundleno = 1763 (0x6e3), region = 60  ;;  %2830 = vset.pattern.permute.xlu0 (!%p322_p2), %v2993_v1  ;;  %2829 = vset.pattern.permute.xlu1 (!%p322_p2), %v2994_v2  ;;  %v407_v6 = vld [vmem:[%s4252_s2 + $0x10] sm:$0xff] (!%p322_p2)  ;;  %v2995_v8 = vmov (!%p322_p2), 0   ;;  %s2996_s11 = smov (!%p322_p2), 1   ;;  %v553_v21 = vld [vmem:[%s4253_s3] sm:$0xff] (!%p322_p2)  ;;  %v554_v25 = vld [vmem:[%s4253_s3 + $0x8] sm:$0xff] (!%p322_p2) }
   0x7   : > { %522 = vperm.xlu0 (!%p322_p2), %2830, %v405_v0   ;;  %465 = vperm.xlu1 (!%p322_p2), %2829, %v405_v0   ;;  %v388_v7 = vshrl.u32 (!%p322_p2), %v387_v5, 7  ;;  %s2997_s18 = smov (!%p322_p2), 127   ;;  %v556_v30 = vld [vmem:[%s4253_s3 + $0x18] sm:$0xff] (!%p322_p2)  ;;  %v555_v32 = vld [vmem:[%s4253_s3 + $0x10] sm:$0xff] (!%p322_p2)  ;;  %v586_v34 = vld [vmem:[%s4256_s6 + $0x8] sm:$0xff] (!%p322_p2)  ;;  %vm818_vm2 = vcmask (!%p322_p2), 261120  }
   0x8   : > { %v590_v35 = vld [vmem:[%s4257_s7 + $0x8] sm:$0xff] (!%p322_p2)  ;;  %v588_v36 = vld [vmem:[%s4256_s6 + $0x18] sm:$0xff] (!%p322_p2)  ;;  %v585_v37 = vld [vmem:[%s4256_s6] sm:$0xff] (!%p322_p2)  ;;  %s3000_s24 = smov (!%p322_p2), 125   ;;  %s3002_s22 = smov (!%p322_p2), 119  }
   0x9   : > { %v389_v9 = vsub.s32 (!%p322_p2), 0, %v388_v7  ;;  %v393_v12 = vsub.s32 (!%p322_p2), 1, %v388_v7  ;;  %v592_v38 = vld [vmem:[%s4257_s7 + $0x18] sm:$0xff] (!%p322_p2)  ;;  %v589_v39 = vld [vmem:[%s4257_s7] sm:$0xff] (!%p322_p2)  ;;  %v795_v40 = vld [vmem:[%s4255_s5 + $0x8] sm:$0xff] (!%p322_p2) }
   0xa   : > { %v587_v41 = vld [vmem:[%s4256_s6 + $0x10] sm:$0xff] (!%p322_p2)  ;;  %v797_v42 = vld [vmem:[%s4255_s5 + $0x18] sm:$0xff] (!%p322_p2)  ;;  %v921_v44 = vld [vmem:[%s4258_s8 + $0x8] sm:$0xff] (!%p322_p2) }
   0xb   : > { %2833 = vset.pattern.permute.xlu0 (!%p322_p2), %v2994_v2  ;;  %469 = vperm.xlu1 (!%p322_p2), %2829, %v406_v3   ;;  %v591_v43 = vld [vmem:[%s4257_s7 + $0x10] sm:$0xff] (!%p322_p2)  ;;  %v794_v45 = vld [vmem:[%s4255_s5] sm:$0xff] (!%p322_p2)  ;;  %v923_v48 = vld [vmem:[%s4258_s8 + $0x18] sm:$0xff] (!%p322_p2) }
   0xc   : > { %477 = vperm.xlu0 (!%p322_p2), %2833, %v408_v4   ;;  %v924_v46 = vld [vmem:[%s4259_s9] sm:$0xff] (!%p322_p2)  ;;  %v796_v47 = vld [vmem:[%s4255_s5 + $0x10] sm:$0xff] (!%p322_p2)  ;;  %v927_v50 = vld [vmem:[%s4259_s9 + $0x18] sm:$0xff] (!%p322_p2) }
   0xd   : > { %s4262_s14 = smov (!%p363_p3, %s2693_s14), 1  ;;  %v920_v49 = vld [vmem:[%s4258_s8] sm:$0xff]  ;;  %v922_v51 = vld [vmem:[%s4258_s8 + $0x10] sm:$0xff]  ;;  %v925_v52 = vld [vmem:[%s4259_s9 + $0x8] sm:$0xff] }
   0xe   : > { %s2700_s23 = sshll.u32 %s4262_s14, 1  ;;  %s2781_s27 = sshll.u32 %s4262_s14, 6  ;;  %v2707_v53 = vld [vmem:[%s4252_s2 + $0x20] sm:$0xff]  ;;  %v926_v54 = vld [vmem:[%s4259_s9 + $0x10] sm:$0xff] }
   0xf   : > { %473 = vperm.xlu1 %2829, %v407_v6   ;;  %s371_s26 = scalar_lea.vmem %s4251_s1, %s2700_s23  ;;  %s3096_s30 = scalar_lea.vmem %s4250_s0, %s2781_s27 }
  0x10   : > { %2834 = vset.pattern.permute.xlu0 %v2995_v8  ;;  %v385_v10 = vld [vmem:[%s371_s26] sm:$0x3]  ;;  %v379_v13 = vld [vmem:[%s3096_s30 + $0x10] sm:$0xff]  ;;  %v380_v16 = vld [vmem:[%s3096_s30 + $0x18] sm:$0xff]  ;;  %s2999_s23 = smov 3  }
  0x11   : > { %438 = vperm.xlu0 %2834, %v405_v0   ;;  %v3098_v11 = vrot.slane %v385_v10, %v389_v9  ;;  %v3102_v14 = vrot.slane %v385_v10, %v393_v12  ;;  %v377_v17 = vld [vmem:[%s3096_s30] sm:$0xff]  ;;  %v378_v20 = vld [vmem:[%s3096_s30 + $0x8] sm:$0xff]  ;;  %v383_v27 = vld [vmem:[%s3096_s30 + $0x30] sm:$0xff] }
  0x12   : > { %v382_v23 = vld [vmem:[%s3096_s30 + $0x28] sm:$0xff]  ;;  %v381_v26 = vld [vmem:[%s3096_s30 + $0x20] sm:$0xff]  ;;  %v384_v31 = vld [vmem:[%s3096_s30 + $0x38] sm:$0xff] }
  0x13   : > { %2831 = vset.pattern.permute.xlu1 %v2993_v1  ;;  %v3105_v15 = vmul.f32 %v3098_v11, %v379_v13  ;;  %v3113_v18 = vmul.f32 %v3102_v14, %v380_v16  ;;  %v3116_v19 = vmul.f32 %v3098_v11, %v377_v17  ;;  %v3127_v22 = vmul.f32 %v3102_v14, %v378_v20 }
  0x14   : > { %526 = vperm.xlu1 %2831, %v406_v3   ;;  %v3131_v24 = vmul.f32 %v3102_v14, %v382_v23  ;;  %v3145_v28 = vmul.f32 %v3098_v11, %v381_v26  ;;  %v3149_v29 = vmul.f32 %v3098_v11, %v383_v27  ;;  %v3166_v33 = vmul.f32 %v3102_v14, %v384_v31  ;;  %v2708_v31 = vld [vmem:[%s4252_s2 + $0x28] sm:$0xff] }
  0x15   : > { %443 = vperm.xlu0 %2834, %v406_v3   ;;  %v3257_v23 = vand.u32 127, %v387_v5 }
  0x17   : > { %vm427_vm0 = vcmp.lt.s32.totalorder %v3257_v23, 1  ;;  %vm512_vm1 = vcmp.lt.s32.totalorder %v3257_v23, 127  ;;  %vm1161_vm3 = vcmp.lt.s32.totalorder %v3257_v23, 3  ;;  %vm1246_vm4 = vcmp.lt.s32.totalorder %v3257_v23, 125 }
  0x18   : > { %2832 = vset.pattern.permute.xlu1 %v2995_v8  ;;  %vm1900_vm5 = vcmp.lt.s32.totalorder %v3257_v23, 9  ;;  %vm1985_vm6 = vcmp.lt.s32.totalorder %v3257_v23, 119 }
  0x19   : > { %448 = vperm.xlu0 %2834, %v407_v6   ;;  %453 = vperm.xlu1 %2832, %v408_v4  }
  0x1d   : > { %2835 = vset.pattern.permute.xlu1 %v2993_v1  ;;  %411 = vrot.lane.b32.xlu0 %v3105_v15, %s2996_s11 }
  0x1e   : > { %530 = vperm.xlu1 %2835, %v407_v6  }
  0x21   : > { %419 = vrot.lane.b32.xlu0 %v3113_v18, %s2996_s11 }
  0x22   : > { %409 = vrot.lane.b32.xlu1 %v3116_v19, %s2996_s11 }
  0x25   : > { %559 = vperm.xlu0 %2834, %v553_v21  }
  0x26   : > { %417 = vrot.lane.b32.xlu1 %v3127_v22, %s2996_s11 }
  0x29   : > { %421 = vrot.lane.b32.xlu0 %v3131_v24, %s2996_s11 }
  0x2a   : > { %534 = vperm.xlu1 %2835, %v408_v4  }
  0x2d   : > { %498 = vrot.lane.b32.xlu0 %v3105_v15, %s2997_s18 }
  0x2e   : > { %2836 = vset.pattern.permute.xlu1 %v2995_v8 }
  0x2f   : > { %564 = vperm.xlu1 %2836, %v554_v25   ;;  %v2998_v25 = vmov 0.0  }
  0x30   : > { %895 = vmatprep.mubr.f32.mxu0 %v2998_v25  ;;  %907 = vmatprep.mubr.f32.mxu1 %v2998_v25 }
  0x31   : > { %506 = vrot.lane.b32.xlu0 %v3113_v18, %s2997_s18 }
  0x33   : > { %413 = vrot.lane.b32.xlu1 %v3145_v28, %s2996_s11 }
  0x35   : > { %415 = vrot.lane.b32.xlu0 %v3149_v29, %s2996_s11 }
  0x37   : > { %496 = vrot.lane.b32.xlu1 %v3116_v19, %s2997_s18 }
  0x39   : > { %500 = vrot.lane.b32.xlu0 %v3145_v28, %s2997_s18 }
  0x3b   : > { %504 = vrot.lane.b32.xlu1 %v3127_v22, %s2997_s18 }
  0x3d   : > { %574 = vperm.xlu0 %2834, %v556_v30   ;;  %v3265_v30 = vld [vmem:[%s4252_s2 + $0x30] sm:$0xff] }
  0x3f   : > { %569 = vperm.xlu1 %2836, %v555_v32  }
  0x41   : > { %510 = vrot.lane.b32.xlu0 %v3166_v33, %s2997_s18 }
  0x43   : > { %423 = vrot.lane.b32.xlu1 %v3166_v33, %s2996_s11 }
  0x45   : > { %669 = vperm.xlu0 %2834, %v586_v34  }
  0x47   : > { %508 = vrot.lane.b32.xlu1 %v3131_v24, %s2997_s18 }
  0x49   : > { %697 = vperm.xlu0 %2834, %v590_v35   ;;  %v3279_v35 = vld [vmem:[%s4252_s2 + $0x38] sm:$0xff] }
  0x4b   : > { %502 = vrot.lane.b32.xlu1 %v3149_v29, %s2997_s18  ;;  %s3001_s18 = smov 9  }
  0x4d   : > { %679 = vperm.xlu0 %2834, %v588_v36  }
  0x4f   : > { %664 = vperm.xlu1 %2836, %v585_v37  }
  0x51   : > { %707 = vperm.xlu0 %2834, %v592_v38  }
  0x53   : > { %692 = vperm.xlu1 %2836, %v589_v39  }
  0x55   : > { %805 = vperm.xlu0 %2834, %v795_v40  }
  0x57   : > { %674 = vperm.xlu1 %2836, %v587_v41  }
  0x59   : > { %815 = vperm.xlu0 %2834, %v797_v42  }
  0x5b   : > { %702 = vperm.xlu1 %2836, %v591_v43  }
  0x5d   : > { %1003 = vperm.xlu0 %2834, %v921_v44  }
  0x5f   : > { %800 = vperm.xlu1 %2836, %v794_v45  }
  0x61   : > { %1026 = vperm.xlu0 %2834, %v924_v46  }
  0x63   : > { %810 = vperm.xlu1 %2836, %v796_v47  }
  0x65   : > { %1013 = vperm.xlu0 %2834, %v923_v48  }
  0x67   : > { %998 = vperm.xlu1 %2836, %v920_v49  }
  0x69   : > { %1041 = vperm.xlu0 %2834, %v927_v50  }
  0x6b   : > { %1008 = vperm.xlu1 %2836, %v922_v51  }
  0x6d   : > { %2840 = vset.pattern.permute.xlu0 %v2993_v1 }
  0x6e   : > { %1256 = vperm.xlu0 %2840, %v2707_v53  }
  0x6f   : > { %1031 = vperm.xlu1 %2836, %v925_v52  }
  0x72   : > { %2841 = vset.pattern.permute.xlu0 %v2994_v2 }
  0x73   : > { %1036 = vperm.xlu1 %2836, %v926_v54   ;;  %1203 = vperm.xlu0 %2841, %v2708_v31  }
  0x77   : > { %1172 = vperm.xlu1 %2836, %v2707_v53   ;;  %1211 = vperm.xlu0 %2841, %v3279_v35  }
  0x7b   : > { %2837 = vset.pattern.permute.xlu1 %v2994_v2  ;;  %2844 = vset.pattern.permute.xlu0 %v2995_v8 }
  0x7c   : > { %1199 = vperm.xlu1 %2837, %v2707_v53   ;;  %1177 = vperm.xlu0 %2844, %v2708_v31  }
  0x80   : > { %2838 = vset.pattern.permute.xlu1 %v2995_v8 }
  0x81   : > { %1182 = vperm.xlu1 %2838, %v3265_v30  }
  0x85   : > { %2839 = vset.pattern.permute.xlu1 %v2994_v2 }
  0x86   : > { %v466_v55 = vpop.permute.xlu1 %465  ;;  %v523_v56 = vpop.permute.xlu0 %522  ;;  %1207 = vperm.xlu1 %2839, %v3265_v30  }
  0x87   : > { %v480_v48 = vmul.f32 %v466_v55, %v3116_v19  ;;  %v481_v49 = vmul.f32 %v466_v55, %v3127_v22 }
  0x8a   : > { %v470_v57 = vpop.permute.xlu1 %469  ;;  %2842 = vset.pattern.permute.xlu1 %v2993_v1 }
  0x8b   : > { %v3240_v58 = vpop.permute.xlu0 %477  ;;  %v482_v50 = vmul.f32 %v470_v57, %v3105_v15  ;;  %v483_v51 = vmul.f32 %v470_v57, %v3113_v18  ;;  %1260 = vperm.xlu1 %2842, %v2708_v31  }
  0x8e   : > { %v3242_v59 = vpop.permute.xlu1 %473 }
  0x8f   : > { %2843 = vset.pattern.permute.xlu1 %v2995_v8 }
  0x90   : > { %v439_v60 = vpop.permute.xlu0 %438  ;;  %1187 = vperm.xlu1 %2843, %v3279_v35  }
  0x93   : > { %v527_v61 = vpop.permute.xlu1 %526 }
  0x94   : > { %v444_v62 = vpop.permute.xlu0 %443  ;;  %2845 = vset.pattern.permute.xlu1 %v2993_v1 }
  0x95   : > { %1264 = vperm.xlu1 %2845, %v3265_v30  }
  0x98   : > { %v3244_v63 = vpop.permute.xlu0 %448  ;;  %v3246_v0 = vpop.permute.xlu1 %453 }
  0x99   : > { %1268 = vperm.xlu1 %2845, %v3279_v35  }
  0x9c   : > { %v412_v3 = vpop.permute.xlu0 %411 }
  0x9d   : > { %v3248_v4 = vpop.permute.xlu1 %530  ;;  %2846 = vset.pattern.permute.xlu1 %v2995_v8 }
  0xa0   : > { %v420_v6 = vpop.permute.xlu0 %419 }
  0xa1   : > { %v410_v7 = vpop.permute.xlu1 %409  ;;  %v433_v5 = vsel %vm427_vm0, %v420_v6, %v412_v3  ;;  %v429_v34 = vsel %vm427_vm0, %v412_v3, %v420_v6 }
  0xa2   : > { %v458_v38 = vmul.f32 %v444_v62, %v433_v5  ;;  %v459_v39 = vmul.f32 %v444_v62, %v429_v34 }
  0xa4   : > { %v3250_v9 = vpop.permute.xlu0 %559  ;;  %v490_v62 = vadd.f32 %v482_v50, %v458_v38  ;;  %v491_v19 = vadd.f32 %v483_v51, %v459_v39 }
  0xa5   : > { %v418_v10 = vpop.permute.xlu1 %417 }
  0xa6   : > { %v428_v36 = vsel %vm427_vm0, %v410_v7, %v418_v10  ;;  %v432_v37 = vsel %vm427_vm0, %v418_v10, %v410_v7 }
  0xa7   : > { %v456_v44 = vmul.f32 %v439_v60, %v432_v37  ;;  %v457_v45 = vmul.f32 %v439_v60, %v428_v36 }
  0xa8   : > { %v422_v12 = vpop.permute.xlu0 %421 }
  0xa9   : > { %v3252_v13 = vpop.permute.xlu1 %534  ;;  %v488_v22 = vadd.f32 %v480_v48, %v456_v44  ;;  %v489_v55 = vadd.f32 %v481_v49, %v457_v45 }
  0xac   : > { %v499_v16 = vpop.permute.xlu0 %498 }
  0xae   : > { %v3254_v17 = vpop.permute.xlu1 %564 }
  0xb0   : > { %v507_v20 = vpop.permute.xlu0 %506 }
  0xb1   : > { %v514_v40 = vsel %vm512_vm1, %v499_v16, %v507_v20  ;;  %v518_v41 = vsel %vm512_vm1, %v507_v20, %v499_v16  ;;  %v484_v16 = vmul.f32 %v3242_v59, %v3145_v28  ;;  %v485_v20 = vmul.f32 %v3242_v59, %v3131_v24 }
  0xb2   : > { %v414_v21 = vpop.permute.xlu1 %413  ;;  %v539_v52 = vmul.f32 %v527_v61, %v514_v40  ;;  %v540_v53 = vmul.f32 %v527_v61, %v518_v41  ;;  %v486_v24 = vmul.f32 %v3240_v58, %v3149_v29  ;;  %v487_v59 = vmul.f32 %v3240_v58, %v3166_v33 }
  0xb3   : > { %v430_v54 = vsel %vm427_vm0, %v414_v21, %v422_v12  ;;  %v434_v60 = vsel %vm427_vm0, %v422_v12, %v414_v21 }
  0xb4   : > { %v416_v27 = vpop.permute.xlu0 %415  ;;  %v460_v15 = vmul.f32 %v3244_v63, %v434_v60  ;;  %v461_v18 = vmul.f32 %v3244_v63, %v430_v54  ;;  %v547_v10 = vadd.f32 %v539_v52, %v490_v62  ;;  %v548_v12 = vadd.f32 %v540_v53, %v491_v19 }
  0xb6   : > { %v497_v26 = vpop.permute.xlu1 %496  ;;  %v492_v31 = vadd.f32 %v484_v16, %v460_v15  ;;  %v493_v36 = vadd.f32 %v485_v20, %v461_v18  ;;  %v580_v38 = vadd.f32 %v3254_v17, %v548_v12 }
  0xb8   : > { %v501_v42 = vpop.permute.xlu0 %500 }
  0xba   : > { %v505_v32 = vpop.permute.xlu1 %504 }
  0xbb   : > { %v513_v46 = vsel %vm512_vm1, %v497_v26, %v505_v32  ;;  %v517_v47 = vsel %vm512_vm1, %v505_v32, %v497_v26 }
  0xbc   : > { %v537_v3 = vmul.f32 %v523_v56, %v513_v46  ;;  %v538_v6 = vmul.f32 %v523_v56, %v517_v47  ;;  %v575_v57 = vpop.permute.xlu0 %574 }
  0xbe   : > { %v3289_v43 = vpop.permute.xlu1 %569  ;;  %v545_v21 = vadd.f32 %v537_v3, %v488_v22  ;;  %v546_v26 = vadd.f32 %v538_v6, %v489_v55 }
  0xc0   : > { %v577_v39 = vadd.f32 %v3250_v9, %v545_v21  ;;  %v578_v40 = vadd.f32 %v3250_v9, %v546_v26  ;;  %v511_v41 = vpop.permute.xlu0 %510 }
  0xc2   : > { %v424_v7 = vpop.permute.xlu1 %423  ;;  %v602_v49 = vadd.f32 %v580_v38, %v578_v40 }
  0xc3   : > { %v431_v61 = vsel %vm427_vm0, %v416_v27, %v424_v7  ;;  %v435_v56 = vsel %vm427_vm0, %v424_v7, %v416_v27 }
  0xc4   : > { %v462_v63 = vmul.f32 %v3246_v0, %v435_v56  ;;  %v463_v32 = vmul.f32 %v3246_v0, %v431_v61  ;;  %v579_v0 = vadd.f32 %v3254_v17, %v547_v10 }
  0xc6   : > { %v509_v5 = vpop.permute.xlu1 %508  ;;  %v494_v45 = vadd.f32 %v486_v24, %v462_v63  ;;  %v495_v46 = vadd.f32 %v487_v59, %v463_v32  ;;  %v593_v48 = vadd.f32 %v579_v0, %v577_v39 }
  0xc7   : > { %v515_v34 = vsel %vm512_vm1, %v501_v42, %v509_v5  ;;  %v519_v27 = vsel %vm512_vm1, %v509_v5, %v501_v42 }
  0xc8   : > { %v541_v28 = vmul.f32 %v3248_v4, %v515_v34  ;;  %v542_v37 = vmul.f32 %v3248_v4, %v519_v27 }
  0xca   : > { %v549_v4 = vadd.f32 %v541_v28, %v492_v31  ;;  %v550_v42 = vadd.f32 %v542_v37, %v493_v36  ;;  %v503_v44 = vpop.permute.xlu1 %502 }
  0xcb   : > { %v516_v29 = vsel %vm512_vm1, %v503_v44, %v511_v41  ;;  %v520_v33 = vsel %vm512_vm1, %v511_v41, %v503_v44 }
  0xcc   : > { %v581_v58 = vadd.f32 %v3289_v43, %v549_v4  ;;  %v582_v17 = vadd.f32 %v3289_v43, %v550_v42  ;;  %v543_v47 = vmul.f32 %v3252_v13, %v516_v29  ;;  %v544_v9 = vmul.f32 %v3252_v13, %v520_v33 }
  0xce   : > { %v551_v50 = vadd.f32 %v543_v47, %v494_v45  ;;  %v552_v51 = vadd.f32 %v544_v9, %v495_v46  ;;  %v594_v52 = vadd.f32 %v593_v48, %v581_v58  ;;  %v603_v53 = vadd.f32 %v602_v49, %v582_v17  ;;  %v670_v49 = vpop.permute.xlu0 %669 }
  0xd0   : > { %v583_v54 = vadd.f32 %v575_v57, %v551_v50  ;;  %v584_v60 = vadd.f32 %v575_v57, %v552_v51 }
  0xd2   : > { %v595_v62 = vadd.f32 %v594_v52, %v583_v54  ;;  %v604_v3 = vadd.f32 %v603_v53, %v584_v60  ;;  %v665_v52 = vpop.permute.xlu1 %664 }
  0xd4   : > { %v596_v43 = vrot.slane %v595_v62, 4  ;;  %v605_v6 = vrot.slane %v604_v3, 4 }
  0xd6   : > { %v597_v7 = vadd.f32 %v596_v43, %v595_v62  ;;  %v606_v13 = vadd.f32 %v605_v6, %v604_v3  ;;  %v693_v62 = vpop.permute.xlu1 %692 }
  0xd8   : > { %v598_v19 = vrot.slane %v597_v7, 2  ;;  %v607_v22 = vrot.slane %v606_v13, 2 }
  0xda   : > { %v599_v55 = vadd.f32 %v598_v19, %v597_v7  ;;  %v608_v15 = vadd.f32 %v607_v22, %v606_v13  ;;  %v675_v43 = vpop.permute.xlu1 %674 }
  0xdc   : > { %v600_v18 = vrot.slane %v599_v55, 1  ;;  %v609_v30 = vrot.slane %v608_v15, 1 }
  0xde   : > { %v601_v61 = vadd.f32 %v600_v18, %v599_v55  ;;  %v610_v56 = vadd.f32 %v609_v30, %v608_v15 }
  0xe0   : > { %v612_v10 = vmul.f32 0.03125, %v601_v61  ;;  %v613_v57 = vmul.f32 0.03125, %v610_v56 }
  0xe2   : > { %v614_v12 = vsub.f32 %v577_v39, %v612_v10  ;;  %v615_v16 = vsub.f32 %v578_v40, %v613_v57  ;;  %v616_v20 = vsub.f32 %v579_v0, %v612_v10  ;;  %v617_v35 = vsub.f32 %v580_v38, %v613_v57 }
  0xe3   : > { %v618_v21 = vsub.f32 %v581_v58, %v612_v10  ;;  %v619_v26 = vsub.f32 %v582_v17, %v613_v57  ;;  %v620_v5 = vsub.f32 %v583_v54, %v612_v10  ;;  %v621_v63 = vsub.f32 %v584_v60, %v613_v57  ;;  %v698_v60 = vpop.permute.xlu0 %697 }
  0xe4   : > { %v622_v32 = vmul.f32 %v614_v12, %v614_v12  ;;  %v623_v34 = vmul.f32 %v615_v16, %v615_v16  ;;  %v624_v27 = vmul.f32 %v616_v20, %v616_v20  ;;  %v625_v31 = vmul.f32 %v617_v35, %v617_v35 }
  0xe5   : > { %v626_v36 = vmul.f32 %v618_v21, %v618_v21  ;;  %v627_v28 = vmul.f32 %v619_v26, %v619_v26  ;;  %v628_v59 = vmul.f32 %v620_v5, %v620_v5  ;;  %v629_v41 = vmul.f32 %v621_v63, %v621_v63 }
  0xe6   : > { %v630_v37 = vadd.f32 %v624_v27, %v622_v32  ;;  %v639_v24 = vadd.f32 %v625_v31, %v623_v34 }
  0xe7   : > { %v680_v3 = vpop.permute.xlu0 %679 }
  0xe8   : > { %v631_v4 = vadd.f32 %v630_v37, %v626_v36  ;;  %v640_v42 = vadd.f32 %v639_v24, %v627_v28  ;;  %v703_v28 = vpop.permute.xlu1 %702 }
  0xea   : > { %v632_v39 = vadd.f32 %v631_v4, %v628_v59  ;;  %v641_v40 = vadd.f32 %v640_v42, %v629_v41 }
  0xeb   : > { %v708_v31 = vpop.permute.xlu0 %707 }
  0xec   : > { %v633_v0 = vrot.slane %v632_v39, 4  ;;  %v642_v38 = vrot.slane %v641_v40, 4 }
  0xee   : > { %v634_v44 = vadd.f32 %v633_v0, %v632_v39  ;;  %v643_v45 = vadd.f32 %v642_v38, %v641_v40 }
  0xf0   : > { %v635_v46 = vrot.slane %v634_v44, 2  ;;  %v644_v29 = vrot.slane %v643_v45, 2 }
  0xf2   : > { %v636_v33 = vadd.f32 %v635_v46, %v634_v44  ;;  %v645_v58 = vadd.f32 %v644_v29, %v643_v45 }
  0xf4   : > { %v637_v17 = vrot.slane %v636_v33, 1  ;;  %v646_v47 = vrot.slane %v645_v58, 1 }
  0xf6   : > { %v638_v9 = vadd.f32 %v637_v17, %v636_v33  ;;  %v647_v48 = vadd.f32 %v646_v47, %v645_v58 }
  0xf8   : > { %v648_v50 = vmul.f32 0.03125, %v638_v9  ;;  %v649_v51 = vmul.f32 0.03125, %v647_v48 }
  0xfa   : > { %v650_v53 = vadd.f32 1e-05, %v648_v50  ;;  %v651_v54 = vadd.f32 1e-05, %v649_v51 }
  0xfc   : > { %2857 = vrsqrt.f32 %v650_v53 }
  0xfd   : > { %2859 = vrsqrt.f32 %v651_v54 }
 0x106   : > { %v2858_v6 = vpop.eup %2857 }
 0x107   : > { %v2860_v7 = vpop.eup %2859  ;;  %v660_v13 = vmul.f32 %v2858_v6, %v620_v5  ;;  %v654_v19 = vmul.f32 %v2858_v6, %v614_v12  ;;  %v658_v22 = vmul.f32 %v2858_v6, %v618_v21  ;;  %v656_v55 = vmul.f32 %v2858_v6, %v616_v20 }
 0x108   : > { %v661_v15 = vmul.f32 %v2860_v7, %v621_v63  ;;  %v655_v18 = vmul.f32 %v2860_v7, %v615_v16  ;;  %v659_v30 = vmul.f32 %v2860_v7, %v619_v26  ;;  %v657_v61 = vmul.f32 %v2860_v7, %v617_v35 }
 0x109   : > { %v688_v56 = vmul.f32 %v680_v3, %v660_v13  ;;  %v682_v10 = vmul.f32 %v665_v52, %v654_v19  ;;  %v686_v57 = vmul.f32 %v675_v43, %v658_v22  ;;  %v684_v32 = vmul.f32 %v670_v49, %v656_v55 }
 0x10a   : > { %v689_v34 = vmul.f32 %v680_v3, %v661_v15  ;;  %v683_v27 = vmul.f32 %v665_v52, %v655_v18  ;;  %v687_v36 = vmul.f32 %v675_v43, %v659_v30  ;;  %v685_v37 = vmul.f32 %v670_v49, %v657_v61 }
 0x10b   : > { %v3348_v24 = vadd.f32 %v708_v31, %v688_v56  ;;  %v3350_v5 = vadd.f32 %v693_v62, %v682_v10  ;;  %v3352_v12 = vadd.f32 %v703_v28, %v686_v57  ;;  %v3354_v20 = vadd.f32 %v698_v60, %v684_v32 }
 0x10c   : > { %v3356_v16 = vadd.f32 %v708_v31, %v689_v34  ;;  %v3358_v35 = vadd.f32 %v693_v62, %v683_v27  ;;  %v3360_v21 = vadd.f32 %v703_v28, %v687_v36  ;;  %v3362_v26 = vadd.f32 %v698_v60, %v685_v37 }
 0x10d   : > { %v724_v63 = vmul.f32 %v3348_v24, %v3348_v24  ;;  %v718_v59 = vmul.f32 %v3350_v5, %v3350_v5  ;;  %v722_v41 = vmul.f32 %v3352_v12, %v3352_v12  ;;  %v720_v4 = vmul.f32 %v3354_v20, %v3354_v20 }
 0x10e   : > { %v725_v42 = vmul.f32 %v3356_v16, %v3356_v16  ;;  %v719_v39 = vmul.f32 %v3358_v35, %v3358_v35  ;;  %v723_v40 = vmul.f32 %v3360_v21, %v3360_v21  ;;  %v721_v0 = vmul.f32 %v3362_v26, %v3362_v26 }
 0x10f   : > { %v732_v38 = vmul.f32 %v724_v63, %v3348_v24  ;;  %v726_v44 = vmul.f32 %v718_v59, %v3350_v5  ;;  %v730_v45 = vmul.f32 %v722_v41, %v3352_v12  ;;  %v728_v46 = vmul.f32 %v720_v4, %v3354_v20 }
 0x110   : > { %v733_v29 = vmul.f32 %v725_v42, %v3356_v16  ;;  %v727_v33 = vmul.f32 %v719_v39, %v3358_v35  ;;  %v731_v58 = vmul.f32 %v723_v40, %v3360_v21  ;;  %v729_v17 = vmul.f32 %v721_v0, %v3362_v26 }
 0x111   : > { %v740_v47 = vmul.f32 0.044715, %v732_v38  ;;  %v738_v9 = vmul.f32 0.044715, %v730_v45  ;;  %v734_v48 = vmul.f32 0.044715, %v726_v44 }
 0x112   : > { %v741_v49 = vmul.f32 0.044715, %v733_v29  ;;  %v739_v50 = vmul.f32 0.044715, %v731_v58  ;;  %v735_v51 = vmul.f32 0.044715, %v727_v33 }
 0x113   : > { %v746_v52 = vadd.f32 %v738_v9, %v3352_v12  ;;  %v737_v53 = vmul.f32 0.044715, %v729_v17  ;;  %v736_v54 = vmul.f32 0.044715, %v728_v46  ;;  %v742_v3 = vadd.f32 %v734_v48, %v3350_v5 }
 0x114   : > { %v747_v60 = vadd.f32 %v739_v50, %v3360_v21  ;;  %v743_v62 = vadd.f32 %v735_v51, %v3358_v35  ;;  %v749_v43 = vadd.f32 %v741_v49, %v3356_v16  ;;  %v748_v19 = vadd.f32 %v740_v47, %v3348_v24 }
 0x115   : > { %v745_v6 = vadd.f32 %v737_v53, %v3362_v26  ;;  %v744_v7 = vadd.f32 %v736_v54, %v3354_v20  ;;  %v754_v13 = vmul.f32 0.7978846, %v746_v52  ;;  %v750_v55 = vmul.f32 0.7978846, %v742_v3  ;;  %v2712_v54 = vld [vmem:[%s4253_s3 + $0x28] sm:$0xff]  ;;  %v801_v3 = vpop.permute.xlu1 %800 }
 0x116   : > { %v751_v22 = vmul.f32 0.7978846, %v743_v62  ;;  %v755_v30 = vmul.f32 0.7978846, %v747_v60  ;;  %v757_v61 = vmul.f32 0.7978846, %v749_v43  ;;  %1299 = vperm.xlu1 %2846, %v2712_v54  }
 0x117   : > { %v753_v15 = vmul.f32 0.7978846, %v745_v6  ;;  %v752_v18 = vmul.f32 0.7978846, %v744_v7  ;;  %2861 = vtanh.f32 %v754_v13  ;;  %v756_v56 = vmul.f32 0.7978846, %v748_v19  ;;  %v806_v19 = vpop.permute.xlu0 %805 }
 0x118   : > { %2863 = vtanh.f32 %v751_v22  ;;  %v2714_v60 = vld [vmem:[%s4253_s3 + $0x38] sm:$0xff]  ;;  %v2713_v62 = vld [vmem:[%s4253_s3 + $0x30] sm:$0xff] }
 0x119   : > { %2865 = vtanh.f32 %v753_v15 }
 0x11a   : > { %2867 = vtanh.f32 %v750_v55  ;;  %1304 = vperm.xlu1 %2846, %v2713_v62  }
 0x11b   : > { %2869 = vtanh.f32 %v752_v18 }
 0x11c   : > { %2871 = vtanh.f32 %v755_v30 }
 0x11d   : > { %2873 = vtanh.f32 %v757_v61 }
 0x11e   : > { %2875 = vtanh.f32 %v756_v56  ;;  %v811_v56 = vpop.permute.xlu1 %810 }
 0x121   : > { %v2862_v10 = vpop.eup %2861 }
 0x122   : > { %v2864_v57 = vpop.eup %2863  ;;  %v770_v36 = vadd.f32 1.0, %v2862_v10 }
 0x123   : > { %v2866_v32 = vpop.eup %2865  ;;  %v767_v34 = vadd.f32 1.0, %v2864_v57 }
 0x124   : > { %v2868_v27 = vpop.eup %2867  ;;  %v769_v31 = vadd.f32 1.0, %v2866_v32  ;;  %v778_v29 = vmul.f32 0.5, %v770_v36 }
 0x125   : > { %v2870_v28 = vpop.eup %2869  ;;  %v775_v37 = vmul.f32 0.5, %v767_v34  ;;  %v766_v63 = vadd.f32 1.0, %v2868_v27  ;;  %v816_v27 = vpop.permute.xlu0 %815 }
 0x126   : > { %v2872_v59 = vpop.eup %2871  ;;  %v777_v41 = vmul.f32 0.5, %v769_v31  ;;  %v768_v4 = vadd.f32 1.0, %v2870_v28 }
 0x127   : > { %v2874_v42 = vpop.eup %2873  ;;  %v783_v39 = vmul.f32 %v775_v37, %v3358_v35  ;;  %v774_v40 = vmul.f32 0.5, %v766_v63  ;;  %v771_v0 = vadd.f32 1.0, %v2872_v59 }
 0x128   : > { %v2876_v38 = vpop.eup %2875  ;;  %v785_v44 = vmul.f32 %v777_v41, %v3362_v26  ;;  %v776_v45 = vmul.f32 0.5, %v768_v4  ;;  %v773_v46 = vadd.f32 1.0, %v2874_v42  ;;  %v786_v26 = vmul.f32 %v778_v29, %v3352_v12  ;;  %v793_v12 = vld [vmem:[%s4254_s4 + $0x18] sm:$0xff] }
 0x129   : > { %v782_v33 = vmul.f32 %v774_v40, %v3350_v5  ;;  %v779_v58 = vmul.f32 0.5, %v771_v0  ;;  %v772_v17 = vadd.f32 1.0, %v2876_v38 }
 0x12a   : > { %v2783_v47 = vpack.c.bf16 %v785_v44, %v783_v39  ;;  %v784_v9 = vmul.f32 %v776_v45, %v3354_v20  ;;  %v781_v48 = vmul.f32 0.5, %v773_v46  ;;  %v790_v20 = vld [vmem:[%s4254_s4] sm:$0xff] }
 0x12b   : > { %v787_v49 = vmul.f32 %v779_v58, %v3360_v21  ;;  %v780_v50 = vmul.f32 0.5, %v772_v17  ;;  %v2711_v21 = vld [vmem:[%s4253_s3 + $0x20] sm:$0xff] }
 0x12c   : > { %2784 = vmatprep.subr.bf16.mxu0 %v2783_v47  ;;  %2807 = vmatprep.subr.bf16.mxu1 %v2783_v47  ;;  %v2785_v35 = vpack.c.bf16 %v784_v9, %v782_v33  ;;  %v789_v51 = vmul.f32 %v781_v48, %v3356_v16  ;;  %v792_v16 = vld [vmem:[%s4254_s4 + $0x10] sm:$0xff] }
 0x12d   : > { %v788_v52 = vmul.f32 %v780_v50, %v3348_v24  ;;  %v791_v24 = vld [vmem:[%s4254_s4 + $0x8] sm:$0xff]  ;;  %1294 = vperm.xlu0 %2844, %v2711_v21  }
 0x12e   : > { %2786 = vmatpush1.bf16.msra.mxu0 %v2785_v35  ;;  %2809 = vmatpush1.bf16.msra.mxu1 %v2785_v35  ;;  %v2787_v5 = vpack.c.bf16 %v789_v51, %v787_v49 }
 0x12f   : > { %v2789_v53 = vpack.c.bf16 %v788_v52, %v786_v26 }
 0x130   : > { %2788 = vmatprep.subr.bf16.mxu0 %v2787_v5  ;;  %2808 = vmatprep.subr.bf16.mxu1 %v2787_v5 }
 0x131   : > { %1309 = vperm.xlu0 %2844, %v2714_v60  }
 0x132   : > { %2790 = vmatpush1.bf16.msra.mxu0 %v2789_v53  ;;  %2810 = vmatpush1.bf16.msra.mxu1 %v2789_v53 }
 0x135   : > { %2703 = vmatmul.mubr.msk.f32.vlgmr.msra.gmra.mrb[0].mxu0 %vm818_vm2, %v790_v20  ;;  %2705 = vmatmul.mubr.msk.f32.vlgmr.msra.gmra.mrb[0].mxu1 %vm818_vm2, %v792_v16 }
 0x136   : > { %901 = vmatprep.mubr.f32.mxu0 %v2998_v25  ;;  %913 = vmatprep.mubr.f32.mxu1 %v2998_v25 }
 0x139   : > { %2704 = vmatmul.mubr.msk.f32.gmra.mrb[2].mxu0 %vm818_vm2, %v791_v24  ;;  %2706 = vmatmul.mubr.msk.f32.gmra.mrb[2].mxu1 %vm818_vm2, %v793_v12 }
 0x13a   : > { %1632 = vmatprep.mubr.f32.mxu1 %v2998_v25  ;;  %2371 = vmatprep.mubr.f32.mxu0 %v2998_v25 }
 0x208   : > { %v897_v43 = vpop.f32.mrb[0].mxu0  ;;  %v909_v6 = vpop.f32.mrb[0].mxu1 }
 0x209   : > { %v899_v7 = vpop.f32.mrb[1].mxu0  ;;  %v911_v13 = vpop.f32.mrb[1].mxu1  ;;  %v898_v15 = vadd.f32 %v897_v43, %v801_v3  ;;  %v910_v32 = vadd.f32 %v909_v6, %v811_v56 }
 0x20a   : > { %v900_v10 = vadd.f32 %v899_v7, %v801_v3  ;;  %v912_v31 = vadd.f32 %v911_v13, %v811_v56 }
 0x20c   : > { %v903_v22 = vpop.f32.mrb[2].mxu0  ;;  %v915_v55 = vpop.f32.mrb[2].mxu1 }
 0x20d   : > { %v904_v18 = vadd.f32 %v903_v22, %v806_v19  ;;  %v905_v30 = vpop.f32.mrb[3].mxu0  ;;  %v917_v61 = vpop.f32.mrb[3].mxu1  ;;  %v916_v28 = vadd.f32 %v915_v55, %v816_v27 }
 0x20e   : > { %v906_v57 = vadd.f32 %v905_v30, %v806_v19  ;;  %v918_v63 = vadd.f32 %v917_v61, %v816_v27  ;;  %v1004_v27 = vpop.permute.xlu0 %1003 }
 0x20f   : > { %v928_v34 = vadd.f32 %v904_v18, %v898_v15 }
 0x210   : > { %v937_v36 = vadd.f32 %v906_v57, %v900_v10 }
 0x211   : > { %v929_v37 = vadd.f32 %v928_v34, %v910_v32 }
 0x212   : > { %v938_v59 = vadd.f32 %v937_v36, %v912_v31 }
 0x213   : > { %v930_v41 = vadd.f32 %v929_v37, %v916_v28 }
 0x214   : > { %v939_v4 = vadd.f32 %v938_v59, %v918_v63  ;;  %v1027_v59 = vpop.permute.xlu0 %1026 }
 0x215   : > { %v931_v42 = vrot.slane %v930_v41, 4 }
 0x216   : > { %v940_v39 = vrot.slane %v939_v4, 4 }
 0x217   : > { %v932_v40 = vadd.f32 %v931_v42, %v930_v41 }
 0x218   : > { %v941_v0 = vadd.f32 %v940_v39, %v939_v4  ;;  %v1014_v4 = vpop.permute.xlu0 %1013 }
 0x219   : > { %v933_v38 = vrot.slane %v932_v40, 2 }
 0x21a   : > { %v942_v44 = vrot.slane %v941_v0, 2 }
 0x21b   : > { %v934_v45 = vadd.f32 %v933_v38, %v932_v40 }
 0x21c   : > { %v943_v46 = vadd.f32 %v942_v44, %v941_v0 }
 0x21d   : > { %v935_v29 = vrot.slane %v934_v45, 1 }
 0x21e   : > { %v944_v33 = vrot.slane %v943_v46, 1 }
 0x21f   : > { %v936_v58 = vadd.f32 %v935_v29, %v934_v45 }
 0x220   : > { %v945_v17 = vadd.f32 %v944_v33, %v943_v46 }
 0x221   : > { %v946_v47 = vmul.f32 0.03125, %v936_v58 }
 0x222   : > { %v947_v9 = vmul.f32 0.03125, %v945_v17 }
 0x223   : > { %v948_v48 = vsub.f32 %v898_v15, %v946_v47  ;;  %v950_v49 = vsub.f32 %v904_v18, %v946_v47  ;;  %v952_v50 = vsub.f32 %v910_v32, %v946_v47  ;;  %v954_v35 = vsub.f32 %v916_v28, %v946_v47 }
 0x224   : > { %v949_v51 = vsub.f32 %v900_v10, %v947_v9  ;;  %v951_v26 = vsub.f32 %v906_v57, %v947_v9  ;;  %v953_v52 = vsub.f32 %v912_v31, %v947_v9  ;;  %v955_v5 = vsub.f32 %v918_v63, %v947_v9  ;;  %v999_v31 = vpop.permute.xlu1 %998 }
 0x225   : > { %v956_v53 = vmul.f32 %v948_v48, %v948_v48  ;;  %v958_v20 = vmul.f32 %v950_v49, %v950_v49  ;;  %v960_v12 = vmul.f32 %v952_v50, %v952_v50  ;;  %v962_v62 = vmul.f32 %v954_v35, %v954_v35 }
 0x226   : > { %v957_v16 = vmul.f32 %v949_v51, %v949_v51  ;;  %v959_v24 = vmul.f32 %v951_v26, %v951_v26  ;;  %v961_v54 = vmul.f32 %v953_v52, %v953_v52  ;;  %v963_v43 = vmul.f32 %v955_v5, %v955_v5 }
 0x227   : > { %v964_v21 = vadd.f32 %v958_v20, %v956_v53  ;;  %v1042_v20 = vpop.permute.xlu0 %1041 }
 0x228   : > { %v973_v60 = vadd.f32 %v959_v24, %v957_v16  ;;  %v1009_v41 = vpop.permute.xlu1 %1008 }
 0x229   : > { %v965_v3 = vadd.f32 %v964_v21, %v960_v12 }
 0x22a   : > { %v974_v6 = vadd.f32 %v973_v60, %v961_v54 }
 0x22b   : > { %v966_v7 = vadd.f32 %v965_v3, %v962_v62 }
 0x22c   : > { %v975_v13 = vadd.f32 %v974_v6, %v963_v43  ;;  %v1032_v42 = vpop.permute.xlu1 %1031 }
 0x22d   : > { %v967_v19 = vrot.slane %v966_v7, 4 }
 0x22e   : > { %v976_v22 = vrot.slane %v975_v13, 4 }
 0x22f   : > { %v968_v55 = vadd.f32 %v967_v19, %v966_v7 }
 0x230   : > { %v977_v15 = vadd.f32 %v976_v22, %v975_v13  ;;  %v1037_v16 = vpop.permute.xlu1 %1036 }
 0x231   : > { %v969_v18 = vrot.slane %v968_v55, 2 }
 0x232   : > { %v978_v30 = vrot.slane %v977_v15, 2 }
 0x233   : > { %v970_v61 = vadd.f32 %v969_v18, %v968_v55 }
 0x234   : > { %v979_v56 = vadd.f32 %v978_v30, %v977_v15 }
 0x235   : > { %v971_v10 = vrot.slane %v970_v61, 1 }
 0x236   : > { %v980_v57 = vrot.slane %v979_v56, 1 }
 0x237   : > { %v972_v32 = vadd.f32 %v971_v10, %v970_v61 }
 0x238   : > { %v981_v34 = vadd.f32 %v980_v57, %v979_v56 }
 0x239   : > { %v982_v36 = vmul.f32 0.03125, %v972_v32 }
 0x23a   : > { %v983_v28 = vmul.f32 0.03125, %v981_v34 }
 0x23b   : > { %v984_v37 = vadd.f32 1e-05, %v982_v36 }
 0x23c   : > { %v985_v63 = vadd.f32 1e-05, %v983_v28 }
 0x23d   : > { %2877 = vrsqrt.f32 %v984_v37 }
 0x23e   : > { %2879 = vrsqrt.f32 %v985_v63 }
 0x247   : > { %v2878_v39 = vpop.eup %2877 }
 0x248   : > { %v2880_v40 = vpop.eup %2879  ;;  %v988_v0 = vmul.f32 %v2878_v39, %v948_v48  ;;  %v990_v38 = vmul.f32 %v2878_v39, %v950_v49  ;;  %v992_v44 = vmul.f32 %v2878_v39, %v952_v50  ;;  %v994_v45 = vmul.f32 %v2878_v39, %v954_v35 }
 0x249   : > { %v989_v46 = vmul.f32 %v2880_v40, %v949_v51  ;;  %v991_v29 = vmul.f32 %v2880_v40, %v951_v26  ;;  %v993_v33 = vmul.f32 %v2880_v40, %v953_v52  ;;  %v995_v58 = vmul.f32 %v2880_v40, %v955_v5 }
 0x24a   : > { %v1016_v17 = vmul.f32 %v999_v31, %v988_v0  ;;  %v1018_v47 = vmul.f32 %v1004_v27, %v990_v38  ;;  %v1020_v9 = vmul.f32 %v1009_v41, %v992_v44  ;;  %v1022_v53 = vmul.f32 %v1014_v4, %v994_v45 }
 0x24b   : > { %v1017_v24 = vmul.f32 %v999_v31, %v989_v46  ;;  %v1019_v12 = vmul.f32 %v1004_v27, %v991_v29  ;;  %v1021_v21 = vmul.f32 %v1009_v41, %v993_v33  ;;  %v1023_v54 = vmul.f32 %v1014_v4, %v995_v58 }
 0x24c   : > { %v3436_v60 = vadd.f32 %v1037_v16, %v1020_v9  ;;  %v3438_v48 = vadd.f32 %v1042_v20, %v1022_v53  ;;  %v1044_v49 = vadd.f32 %v1027_v59, %v1016_v17  ;;  %v3440_v50 = vadd.f32 %v1032_v42, %v1018_v47 }
 0x24d   : > { %v3442_v35 = vadd.f32 %v1037_v16, %v1021_v21  ;;  %v3444_v51 = vadd.f32 %v1042_v20, %v1023_v54  ;;  %v3446_v26 = vadd.f32 %v1027_v59, %v1017_v24  ;;  %v3448_v52 = vadd.f32 %v1032_v42, %v1019_v12 }
 0x24e   : > { %v1058_v5 = vmul.f32 %v3438_v48, %v3438_v48  ;;  %v1052_v62 = vmul.f32 %v1044_v49, %v1044_v49  ;;  %v1054_v3 = vmul.f32 %v3440_v50, %v3440_v50  ;;  %v1056_v43 = vmul.f32 %v3436_v60, %v3436_v60 }
 0x24f   : > { %v1059_v6 = vmul.f32 %v3444_v51, %v3444_v51  ;;  %v1053_v7 = vmul.f32 %v3446_v26, %v3446_v26  ;;  %v1055_v13 = vmul.f32 %v3448_v52, %v3448_v52  ;;  %v1057_v19 = vmul.f32 %v3442_v35, %v3442_v35 }
 0x250   : > { %v1066_v22 = vmul.f32 %v1058_v5, %v3438_v48  ;;  %v1060_v55 = vmul.f32 %v1052_v62, %v1044_v49  ;;  %v1062_v15 = vmul.f32 %v1054_v3, %v3440_v50  ;;  %v1064_v18 = vmul.f32 %v1056_v43, %v3436_v60 }
 0x251   : > { %v1061_v30 = vmul.f32 %v1053_v7, %v3446_v26  ;;  %v1063_v61 = vmul.f32 %v1055_v13, %v3448_v52  ;;  %v1067_v32 = vmul.f32 %v1059_v6, %v3444_v51  ;;  %v1065_v31 = vmul.f32 %v1057_v19, %v3442_v35  ;;  %v2977_v6 = vld [vmem:[%s3096_s30] sm:$0xff] }
 0x252   : > { %v1074_v56 = vmul.f32 0.044715, %v1066_v22  ;;  %v1068_v10 = vmul.f32 0.044715, %v1060_v55  ;;  %v1070_v57 = vmul.f32 0.044715, %v1062_v15 }
 0x253   : > { %v1069_v34 = vmul.f32 0.044715, %v1061_v30  ;;  %v1071_v27 = vmul.f32 0.044715, %v1063_v61  ;;  %v1072_v63 = vmul.f32 0.044715, %v1064_v18 }
 0x254   : > { %v1076_v36 = vadd.f32 %v1068_v10, %v1044_v49  ;;  %v1078_v28 = vadd.f32 %v1070_v57, %v3440_v50  ;;  %v1082_v37 = vadd.f32 %v1074_v56, %v3438_v48  ;;  %v1075_v39 = vmul.f32 0.044715, %v1067_v32  ;;  %v2978_v15 = vld [vmem:[%s3096_s30 + $0x10] sm:$0xff] }
 0x255   : > { %v1077_v59 = vadd.f32 %v1069_v34, %v3446_v26  ;;  %v1080_v42 = vadd.f32 %v1072_v63, %v3436_v60  ;;  %v1079_v0 = vadd.f32 %v1071_v27, %v3448_v52  ;;  %v1073_v44 = vmul.f32 0.044715, %v1065_v31  ;;  %v2979_v34 = vld [vmem:[%s3096_s30 + $0x20] sm:$0xff] }
 0x256   : > { %v1084_v41 = vmul.f32 0.7978846, %v1076_v36  ;;  %v1086_v4 = vmul.f32 0.7978846, %v1078_v28  ;;  %v1090_v38 = vmul.f32 0.7978846, %v1082_v37  ;;  %v1083_v29 = vadd.f32 %v1075_v39, %v3444_v51 }
 0x257   : > { %v1085_v40 = vmul.f32 0.7978846, %v1077_v59  ;;  %v1088_v45 = vmul.f32 0.7978846, %v1080_v42  ;;  %v1087_v46 = vmul.f32 0.7978846, %v1079_v0  ;;  %v1081_v33 = vadd.f32 %v1073_v44, %v3442_v35 }
 0x258   : > { %2881 = vtanh.f32 %v1084_v41  ;;  %v1091_v58 = vmul.f32 0.7978846, %v1083_v29  ;;  %v2980_v37 = vld [vmem:[%s3096_s30 + $0x30] sm:$0xff]  ;;  %v2981_v59 = vld [vmem:[%s3096_s30 + $0x8] sm:$0xff]  ;;  %v2982_v0 = vld [vmem:[%s3096_s30 + $0x18] sm:$0xff] }
 0x259   : > { %2883 = vtanh.f32 %v1086_v4  ;;  %v1089_v17 = vmul.f32 0.7978846, %v1081_v33  ;;  %v2984_v33 = vld [vmem:[%s3096_s30 + $0x28] sm:$0xff] }
 0x25a   : > { %2885 = vtanh.f32 %v1085_v40 }
 0x25b   : > { %2887 = vtanh.f32 %v1090_v38 }
 0x25c   : > { %2889 = vtanh.f32 %v1088_v45 }
 0x25d   : > { %2891 = vtanh.f32 %v1087_v46  ;;  %v2983_v46 = vld [vmem:[%s3096_s30 + $0x38] sm:$0xff] }
 0x25e   : > { %2893 = vtanh.f32 %v1091_v58 }
 0x25f   : > { %2895 = vtanh.f32 %v1089_v17  ;;  %v2716_v17 = vld [vmem:[%s4256_s6 + $0x28] sm:$0xff] }
 0x262   : > { %v2882_v47 = vpop.eup %2881 }
 0x263   : > { %v1100_v9 = vadd.f32 1.0, %v2882_v47  ;;  %v2884_v53 = vpop.eup %2883  ;;  %v2715_v47 = vld [vmem:[%s4256_s6 + $0x20] sm:$0xff] }
 0x264   : > { %v2886_v20 = vpop.eup %2885  ;;  %v1102_v24 = vadd.f32 1.0, %v2884_v53  ;;  %v2719_v53 = vld [vmem:[%s4257_s7 + $0x20] sm:$0xff] }
 0x265   : > { %v1108_v16 = vmul.f32 0.5, %v1100_v9  ;;  %v2888_v12 = vpop.eup %2887  ;;  %v1101_v3 = vadd.f32 1.0, %v2886_v20  ;;  %v2720_v9 = vld [vmem:[%s4257_s7 + $0x28] sm:$0xff]  ;;  %v2718_v20 = vld [vmem:[%s4256_s6 + $0x38] sm:$0xff] }
 0x266   : > { %v1110_v54 = vmul.f32 0.5, %v1102_v24  ;;  %v1106_v5 = vadd.f32 1.0, %v2888_v12  ;;  %v2890_v62 = vpop.eup %2889  ;;  %v2722_v24 = vld [vmem:[%s4257_s7 + $0x38] sm:$0xff]  ;;  %v2721_v12 = vld [vmem:[%s4257_s7 + $0x30] sm:$0xff] }
 0x267   : > { %v1116_v21 = vmul.f32 %v1108_v16, %v1044_v49  ;;  %v2892_v43 = vpop.eup %2891  ;;  %v1104_v22 = vadd.f32 1.0, %v2890_v62  ;;  %v1109_v30 = vmul.f32 0.5, %v1101_v3  ;;  %v2717_v16 = vld [vmem:[%s4256_s6 + $0x30] sm:$0xff]  ;;  %v2736_v3 = vld [vmem:[%s4258_s8 + $0x28] sm:$0xff] }
 0x268   : > { %v1118_v13 = vmul.f32 %v1110_v54, %v3440_v50  ;;  %v1114_v19 = vmul.f32 0.5, %v1106_v5  ;;  %v1103_v61 = vadd.f32 1.0, %v2892_v43  ;;  %v2894_v56 = vpop.eup %2893  ;;  %v2727_v54 = vld [vmem:[%s4255_s5 + $0x20] sm:$0xff]  ;;  %v2730_v5 = vld [vmem:[%s4255_s5 + $0x38] sm:$0xff]  ;;  %v2729_v62 = vld [vmem:[%s4255_s5 + $0x30] sm:$0xff] }
 0x269   : > { %v3479_v7 = vadd.f32 %v2977_v6, %v1116_v21  ;;  %v1112_v49 = vmul.f32 0.5, %v1104_v22  ;;  %v2896_v32 = vpop.eup %2895  ;;  %v1117_v31 = vmul.f32 %v1109_v30, %v3446_v26  ;;  %v1107_v28 = vadd.f32 1.0, %v2894_v56  ;;  %v2728_v21 = vld [vmem:[%s4255_s5 + $0x28] sm:$0xff]  ;;  %v2735_v43 = vld [vmem:[%s4258_s8 + $0x20] sm:$0xff]  ;;  %v2738_v22 = vld [vmem:[%s4258_s8 + $0x38] sm:$0xff] }
 0x26a   : > { %v3487_v18 = vadd.f32 %v2978_v15, %v1118_v13  ;;  %v1122_v50 = vmul.f32 %v1114_v19, %v3438_v48  ;;  %v1111_v36 = vmul.f32 0.5, %v1103_v61  ;;  %v2739_v6 = vld [vmem:[%s4259_s9 + $0x20] sm:$0xff]  ;;  %v2737_v13 = vld [vmem:[%s4258_s8 + $0x30] sm:$0xff]  ;;  %v1173_v19 = vpop.permute.xlu1 %1172  ;;  %v2740_v15 = vld [vmem:[%s4259_s9 + $0x28] sm:$0xff] }
 0x26b   : > { %v3484_v55 = vmul.f32 %v3479_v7, %v3098_v11  ;;  %v1120_v57 = vmul.f32 %v1112_v49, %v3436_v60  ;;  %v1105_v60 = vadd.f32 1.0, %v2896_v32  ;;  %v3515_v26 = vadd.f32 %v2981_v59, %v1117_v31  ;;  %v2742_v30 = vld [vmem:[%s4259_s9 + $0x38] sm:$0xff]  ;;  %v2741_v61 = vld [vmem:[%s4259_s9 + $0x30] sm:$0xff] }
 0x26c   : > { %v3491_v10 = vmul.f32 %v3487_v18, %v3098_v11  ;;  %v3504_v48 = vadd.f32 %v2980_v37, %v1122_v50  ;;  %v1119_v41 = vmul.f32 %v1111_v36, %v3448_v52  ;;  %v1115_v4 = vmul.f32 0.5, %v1107_v28  ;;  %v2743_v50 = vld [vmem:[%s4252_s2 + $0x40] sm:$0xff] }
 0x26d   : > { %1145 = vrot.lane.b32.xlu1 %v3484_v55, %s2999_s23  ;;  %v3498_v27 = vadd.f32 %v2979_v34, %v1120_v57  ;;  %v1113_v39 = vmul.f32 0.5, %v1105_v60  ;;  %v3528_v40 = vmul.f32 %v3515_v26, %v3102_v14  ;;  %v1257_v34 = vpop.permute.xlu0 %1256 }
 0x26e   : > { %1147 = vrot.lane.b32.xlu0 %v3491_v10, %s2999_s23  ;;  %v3520_v42 = vmul.f32 %v3504_v48, %v3098_v11  ;;  %v3531_v38 = vadd.f32 %v2982_v0, %v1119_v41  ;;  %v1123_v52 = vmul.f32 %v1115_v4, %v3444_v51  ;;  %v1200_v49 = vpop.permute.xlu1 %1199 }
 0x26f   : > { %v3508_v63 = vmul.f32 %v3498_v27, %v3098_v11  ;;  %v1121_v44 = vmul.f32 %v1113_v39, %v3442_v35 }
 0x270   : > { %v3541_v45 = vmul.f32 %v3531_v38, %v3102_v14  ;;  %v3544_v29 = vadd.f32 %v2983_v46, %v1123_v52 }
 0x271   : > { %1149 = vrot.lane.b32.xlu1 %v3508_v63, %s2999_s23  ;;  %v3547_v58 = vadd.f32 %v2984_v33, %v1121_v44  ;;  %v1204_v36 = vpop.permute.xlu0 %1203 }
 0x272   : > { %1232 = vrot.lane.b32.xlu0 %v3491_v10, %s3000_s24  ;;  %v3555_v35 = vmul.f32 %v3544_v29, %v3102_v14  ;;  %v3633_v56 = vpop.permute.xlu1 %1182 }
 0x273   : > { %v3559_v51 = vmul.f32 %v3547_v58, %v3102_v14 }
 0x275   : > { %1230 = vrot.lane.b32.xlu1 %v3484_v55, %s3000_s24  ;;  %v1212_v37 = vpop.permute.xlu0 %1211 }
 0x276   : > { %1151 = vrot.lane.b32.xlu0 %v3520_v42, %s2999_s23  ;;  %v1208_v57 = vpop.permute.xlu1 %1207 }
 0x279   : > { %1153 = vrot.lane.b32.xlu1 %v3528_v40, %s2999_s23  ;;  %v1178_v59 = vpop.permute.xlu0 %1177 }
 0x27a   : > { %1234 = vrot.lane.b32.xlu0 %v3508_v63, %s3000_s24  ;;  %v3641_v32 = vpop.permute.xlu1 %1260 }
 0x27d   : > { %1238 = vrot.lane.b32.xlu1 %v3528_v40, %s3000_s24  ;;  %v1295_v4 = vpop.permute.xlu0 %1294 }
 0x27e   : > { %1155 = vrot.lane.b32.xlu0 %v3541_v45, %s2999_s23  ;;  %v1188_v31 = vpop.permute.xlu1 %1187 }
 0x281   : > { %1159 = vrot.lane.b32.xlu1 %v3555_v35, %s2999_s23  ;;  %v3652_v0 = vpop.permute.xlu0 %1309 }
 0x282   : > { %1157 = vrot.lane.b32.xlu0 %v3559_v51, %s2999_s23  ;;  %v3644_v28 = vpop.permute.xlu1 %1264 }
 0x285   : > { %1242 = vrot.lane.b32.xlu1 %v3559_v51, %s3000_s24 }
 0x286   : > { %1240 = vrot.lane.b32.xlu0 %v3541_v45, %s3000_s24  ;;  %v3646_v60 = vpop.permute.xlu1 %1268 }
 0x289   : > { %1236 = vrot.lane.b32.xlu1 %v3520_v42, %s3000_s24 }
 0x28a   : > { %1244 = vrot.lane.b32.xlu0 %v3555_v35, %s3000_s24  ;;  %v3648_v41 = vpop.permute.xlu1 %1299 }
 0x28d   : > { %1400 = vperm.xlu1 %2846, %v2715_v47  }
 0x28e   : > { %1405 = vperm.xlu0 %2844, %v2716_v17   ;;  %v3650_v39 = vpop.permute.xlu1 %1304 }
 0x291   : > { %1428 = vperm.xlu1 %2846, %v2719_v53  }
 0x292   : > { %1433 = vperm.xlu0 %2844, %v2720_v9  }
 0x295   : > { %1410 = vperm.xlu1 %2846, %v2717_v16  }
 0x296   : > { %1415 = vperm.xlu0 %2844, %v2718_v20  }
 0x299   : > { %1438 = vperm.xlu1 %2846, %v2721_v12  }
 0x29a   : > { %1443 = vperm.xlu0 %2844, %v2722_v24  }
 0x29d   : > { %1538 = vperm.xlu1 %2846, %v2727_v54   ;;  %v1215_v54 = vmul.f32 %v1200_v49, %v3528_v40 }
 0x29e   : > { %1543 = vperm.xlu0 %2844, %v2728_v21   ;;  %v1214_v21 = vmul.f32 %v1200_v49, %v3484_v55 }
 0x2a1   : > { %1548 = vperm.xlu1 %2846, %v2729_v62  }
 0x2a2   : > { %1553 = vperm.xlu0 %2844, %v2730_v5  }
 0x2a5   : > { %1737 = vperm.xlu1 %2846, %v2735_v43  }
 0x2a6   : > { %1742 = vperm.xlu0 %2844, %v2736_v3  }
 0x2a9   : > { %1747 = vperm.xlu1 %2846, %v2737_v13  }
 0x2aa   : > { %1765 = vperm.xlu0 %2844, %v2739_v6  }
 0x2ad   : > { %1770 = vperm.xlu1 %2846, %v2740_v15  }
 0x2ae   : > { %1752 = vperm.xlu0 %2844, %v2738_v22  }
 0x2b1   : > { %1775 = vperm.xlu1 %2846, %v2741_v61  }
 0x2b2   : > { %1780 = vperm.xlu0 %2844, %v2742_v30  }
 0x2b5   : > { %1911 = vperm.xlu1 %2846, %v2743_v50  }
 0x2b6   : > { %2850 = vset.pattern.permute.xlu0 %v2993_v1 }
 0x2b7   : > { %1995 = vperm.xlu0 %2850, %v2743_v50  }
 0x2b9   : > { %2847 = vset.pattern.permute.xlu1 %v2994_v2 }
 0x2ba   : > { %1938 = vperm.xlu1 %2847, %v2743_v50  }
 0x2bb   : > { %2851 = vset.pattern.permute.xlu0 %v2994_v2 }
 0x2be   : > { %2848 = vset.pattern.permute.xlu1 %v2995_v8 }
 0x2df   : > { %v1146_v52 = vpop.permute.xlu1 %1145 }
 0x2e0   : > { %v1148_v44 = vpop.permute.xlu0 %1147 }
 0x2e3   : > { %v1150_v33 = vpop.permute.xlu1 %1149 }
 0x2e4   : > { %v1233_v46 = vpop.permute.xlu0 %1232 }
 0x2e7   : > { %v1231_v47 = vpop.permute.xlu1 %1230 }
 0x2e8   : > { %v1152_v17 = vpop.permute.xlu0 %1151 }
 0x2eb   : > { %v1154_v53 = vpop.permute.xlu1 %1153 }
 0x2ec   : > { %v1235_v9 = vpop.permute.xlu0 %1234  ;;  %v1162_v20 = vsel %vm1161_vm3, %v1146_v52, %v1154_v53  ;;  %v1166_v16 = vsel %vm1161_vm3, %v1154_v53, %v1146_v52  ;;  %v2744_v53 = vld [vmem:[%s4252_s2 + $0x48] sm:$0xff] }
 0x2ed   : > { %v1190_v24 = vmul.f32 %v1173_v19, %v1166_v16  ;;  %v1191_v12 = vmul.f32 %v1173_v19, %v1162_v20  ;;  %v1216_v16 = vmul.f32 %v1204_v36, %v3491_v10  ;;  %1942 = vperm.xlu0 %2851, %v2744_v53  }
 0x2ef   : > { %v1239_v62 = vpop.permute.xlu1 %1238  ;;  %v1222_v19 = vadd.f32 %v1214_v21, %v1190_v24  ;;  %v1223_v22 = vadd.f32 %v1215_v54, %v1191_v12  ;;  %v1217_v24 = vmul.f32 %v1204_v36, %v3541_v45  ;;  %v1220_v12 = vmul.f32 %v1212_v37, %v3520_v42 }
 0x2f0   : > { %v1156_v5 = vpop.permute.xlu0 %1155  ;;  %v1247_v6 = vsel %vm1246_vm4, %v1231_v47, %v1239_v62  ;;  %v1251_v13 = vsel %vm1246_vm4, %v1239_v62, %v1231_v47  ;;  %v1221_v21 = vmul.f32 %v1212_v37, %v3555_v35  ;;  %v1218_v54 = vmul.f32 %v1208_v57, %v3508_v63 }
 0x2f1   : > { %v1163_v3 = vsel %vm1161_vm3, %v1148_v44, %v1156_v5  ;;  %v1167_v43 = vsel %vm1161_vm3, %v1156_v5, %v1148_v44  ;;  %v1271_v15 = vmul.f32 %v1257_v34, %v1247_v6  ;;  %v1272_v55 = vmul.f32 %v1257_v34, %v1251_v13  ;;  %v3673_v44 = vld [vmem:[%s4252_s2 + $0x50] sm:$0xff] }
 0x2f2   : > { %v1192_v30 = vmul.f32 %v1178_v59, %v1167_v43  ;;  %v1193_v40 = vmul.f32 %v1178_v59, %v1163_v3  ;;  %1921 = vperm.xlu1 %2848, %v3673_v44  }
 0x2f3   : > { %v1279_v49 = vadd.f32 %v1271_v15, %v1222_v19  ;;  %v1280_v61 = vadd.f32 %v1272_v55, %v1223_v22  ;;  %v1160_v52 = vpop.permute.xlu1 %1159 }
 0x2f4   : > { %v1158_v50 = vpop.permute.xlu0 %1157  ;;  %v1165_v59 = vsel %vm1161_vm3, %v1152_v17, %v1160_v52  ;;  %v1169_v20 = vsel %vm1161_vm3, %v1160_v52, %v1152_v17  ;;  %v3698_v17 = vld [vmem:[%s4252_s2 + $0x58] sm:$0xff]  ;;  %v1224_v10 = vadd.f32 %v1216_v16, %v1192_v30  ;;  %v1225_v45 = vadd.f32 %v1217_v24, %v1193_v40 }
 0x2f5   : > { %v1164_v47 = vsel %vm1161_vm3, %v1150_v33, %v1158_v50  ;;  %v1168_v34 = vsel %vm1161_vm3, %v1158_v50, %v1150_v33  ;;  %v1219_v33 = vmul.f32 %v1208_v57, %v3559_v51  ;;  %v1196_v36 = vmul.f32 %v1188_v31, %v1169_v20  ;;  %1950 = vperm.xlu0 %2851, %v3698_v17  }
 0x2f6   : > { %v1194_v5 = vmul.f32 %v3633_v56, %v1168_v34  ;;  %v1195_v62 = vmul.f32 %v3633_v56, %v1164_v47  ;;  %v1197_v42 = vmul.f32 %v1188_v31, %v1165_v59  ;;  %v3700_v37 = vadd.f32 %v1295_v4, %v1279_v49  ;;  %2849 = vset.pattern.permute.xlu1 %v2994_v2 }
 0x2f7   : > { %v1243_v35 = vpop.permute.xlu1 %1242  ;;  %v3702_v63 = vadd.f32 %v1295_v4, %v1280_v61  ;;  %1946 = vperm.xlu1 %2849, %v3673_v44   ;;  %v1228_v2 = vadd.f32 %v1220_v12, %v1196_v36 }
 0x2f8   : > { %v1241_v3 = vpop.permute.xlu0 %1240  ;;  %v1249_v31 = vsel %vm1246_vm4, %v1235_v9, %v1243_v35  ;;  %v1253_v6 = vsel %vm1246_vm4, %v1243_v35, %v1235_v9  ;;  %v1226_v4 = vadd.f32 %v1218_v54, %v1194_v5  ;;  %v1227_v13 = vadd.f32 %v1219_v33, %v1195_v62 }
 0x2f9   : > { %v1248_v51 = vsel %vm1246_vm4, %v1233_v46, %v1241_v3  ;;  %v1252_v56 = vsel %vm1246_vm4, %v1241_v3, %v1233_v46  ;;  %v1275_v19 = vmul.f32 %v3644_v28, %v1249_v31  ;;  %v1276_v46 = vmul.f32 %v3644_v28, %v1253_v6  ;;  %2854 = vset.pattern.permute.xlu0 %v2995_v8 }
 0x2fa   : > { %v1273_v57 = vmul.f32 %v3641_v32, %v1248_v51  ;;  %v1274_v43 = vmul.f32 %v3641_v32, %v1252_v56  ;;  %v1229_v22 = vadd.f32 %v1221_v21, %v1197_v42  ;;  %1916 = vperm.xlu0 %2854, %v2744_v53  }
 0x2fb   : > { %v1237_v30 = vpop.permute.xlu1 %1236  ;;  %v1283_v40 = vadd.f32 %v1275_v19, %v1226_v4  ;;  %v1284_v49 = vadd.f32 %v1276_v46, %v1227_v13  ;;  %2852 = vset.pattern.permute.xlu1 %v2993_v1 }
 0x2fc   : > { %v1281_v15 = vadd.f32 %v1273_v57, %v1224_v10  ;;  %v1282_v32 = vadd.f32 %v1274_v43, %v1225_v45  ;;  %v1245_v55 = vpop.permute.xlu0 %1244  ;;  %1999 = vperm.xlu1 %2852, %v2744_v53  }
 0x2fd   : > { %v1250_v9 = vsel %vm1246_vm4, %v1237_v30, %v1245_v55  ;;  %v1254_v61 = vsel %vm1246_vm4, %v1245_v55, %v1237_v30  ;;  %v1316_v34 = vadd.f32 %v3650_v39, %v1283_v40  ;;  %v1317_v59 = vadd.f32 %v3650_v39, %v1284_v49 }
 0x2fe   : > { %v1314_v50 = vadd.f32 %v3648_v41, %v1281_v15  ;;  %v1315_v28 = vadd.f32 %v3648_v41, %v1282_v32  ;;  %v1277_v52 = vmul.f32 %v3646_v60, %v1250_v9  ;;  %v1278_v47 = vmul.f32 %v3646_v60, %v1254_v61 }
 0x300   : > { %v1330_v20 = vadd.f32 %v1314_v50, %v3700_v37  ;;  %v1339_v16 = vadd.f32 %v1315_v28, %v3702_v63  ;;  %v1285_v24 = vadd.f32 %v1277_v52, %v1228_v2  ;;  %v1286_v12 = vadd.f32 %v1278_v47, %v1229_v22  ;;  %2853 = vset.pattern.permute.xlu1 %v2995_v8 }
 0x301   : > { %1926 = vperm.xlu1 %2853, %v3698_v17  }
 0x302   : > { %v1331_v41 = vadd.f32 %v1330_v20, %v1316_v34  ;;  %v1340_v21 = vadd.f32 %v1339_v16, %v1317_v59  ;;  %v1318_v60 = vadd.f32 %v3652_v0, %v1285_v24  ;;  %v1319_v54 = vadd.f32 %v3652_v0, %v1286_v12 }
 0x304   : > { %v1332_v33 = vadd.f32 %v1331_v41, %v1318_v60  ;;  %v1341_v5 = vadd.f32 %v1340_v21, %v1319_v54 }
 0x305   : > { %2855 = vset.pattern.permute.xlu1 %v2993_v1 }
 0x306   : > { %v1333_v39 = vrot.slane %v1332_v33, 4  ;;  %v1342_v62 = vrot.slane %v1341_v5, 4  ;;  %2003 = vperm.xlu1 %2855, %v3673_v44  }
 0x308   : > { %v1334_v10 = vadd.f32 %v1333_v39, %v1332_v33  ;;  %v1343_v45 = vadd.f32 %v1342_v62, %v1341_v5 }
 0x30a   : > { %v1335_v36 = vrot.slane %v1334_v10, 2  ;;  %v1344_v53 = vrot.slane %v1343_v45, 2  ;;  %2007 = vperm.xlu1 %2855, %v3698_v17  }
 0x30c   : > { %v1336_v42 = vadd.f32 %v1335_v36, %v1334_v10  ;;  %v1345_v3 = vadd.f32 %v1344_v53, %v1343_v45  ;;  %v1401_v5 = vpop.permute.xlu1 %1400 }
 0x30e   : > { %v1337_v35 = vrot.slane %v1336_v42, 1  ;;  %v1346_v0 = vrot.slane %v1345_v3, 1  ;;  %2856 = vset.pattern.permute.xlu1 %v2995_v8 }
 0x310   : > { %v1338_v51 = vadd.f32 %v1337_v35, %v1336_v42  ;;  %v1347_v56 = vadd.f32 %v1346_v0, %v1345_v3  ;;  %v1429_v45 = vpop.permute.xlu1 %1428 }
 0x312   : > { %v1348_v57 = vmul.f32 0.03125, %v1338_v51  ;;  %v1349_v43 = vmul.f32 0.03125, %v1347_v56 }
 0x314   : > { %v1356_v31 = vsub.f32 %v1318_v60, %v1348_v57  ;;  %v1357_v6 = vsub.f32 %v1319_v54, %v1349_v43  ;;  %v1350_v1 = vsub.f32 %v3700_v37, %v1348_v57  ;;  %v1351_v4 = vsub.f32 %v3702_v63, %v1349_v43  ;;  %v1406_v60 = vpop.permute.xlu0 %1405  ;;  %v1411_v53 = vpop.permute.xlu1 %1410 }
 0x315   : > { %v1352_v13 = vsub.f32 %v1314_v50, %v1348_v57  ;;  %v1353_v44 = vsub.f32 %v1315_v28, %v1349_v43  ;;  %v1354_v19 = vsub.f32 %v1316_v34, %v1348_v57  ;;  %v1355_v46 = vsub.f32 %v1317_v59, %v1349_v43 }
 0x316   : > { %v1358_v2 = vmul.f32 %v1350_v1, %v1350_v1  ;;  %v1359_v22 = vmul.f32 %v1351_v4, %v1351_v4  ;;  %v1364_v49 = vmul.f32 %v1356_v31, %v1356_v31  ;;  %v1365_v8 = vmul.f32 %v1357_v6, %v1357_v6 }
 0x317   : > { %v1360_v15 = vmul.f32 %v1352_v13, %v1352_v13  ;;  %v1361_v17 = vmul.f32 %v1353_v44, %v1353_v44  ;;  %v1362_v32 = vmul.f32 %v1354_v19, %v1354_v19  ;;  %v1363_v55 = vmul.f32 %v1355_v46, %v1355_v46 }
 0x318   : > { %v1434_v10 = vpop.permute.xlu0 %1433 }
 0x319   : > { %v1366_v30 = vadd.f32 %v1360_v15, %v1358_v2  ;;  %v1375_v40 = vadd.f32 %v1361_v17, %v1359_v22 }
 0x31b   : > { %v1367_v9 = vadd.f32 %v1366_v30, %v1362_v32  ;;  %v1376_v61 = vadd.f32 %v1375_v40, %v1363_v55 }
 0x31c   : > { %v1416_v36 = vpop.permute.xlu0 %1415 }
 0x31d   : > { %v1368_v52 = vadd.f32 %v1367_v9, %v1364_v49  ;;  %v1377_v37 = vadd.f32 %v1376_v61, %v1365_v8  ;;  %v1439_v61 = vpop.permute.xlu1 %1438 }
 0x31f   : > { %v1369_v47 = vrot.slane %v1368_v52, 4  ;;  %v1378_v63 = vrot.slane %v1377_v37, 4 }
 0x320   : > { %v1444_v9 = vpop.permute.xlu0 %1443 }
 0x321   : > { %v1370_v50 = vadd.f32 %v1369_v47, %v1368_v52  ;;  %v1379_v28 = vadd.f32 %v1378_v63, %v1377_v37 }
 0x323   : > { %v1371_v34 = vrot.slane %v1370_v50, 2  ;;  %v1380_v59 = vrot.slane %v1379_v28, 2 }
 0x325   : > { %v1372_v20 = vadd.f32 %v1371_v34, %v1370_v50  ;;  %v1381_v16 = vadd.f32 %v1380_v59, %v1379_v28 }
 0x327   : > { %v1373_v24 = vrot.slane %v1372_v20, 1  ;;  %v1382_v12 = vrot.slane %v1381_v16, 1 }
 0x329   : > { %v1374_v41 = vadd.f32 %v1373_v24, %v1372_v20  ;;  %v1383_v21 = vadd.f32 %v1382_v12, %v1381_v16 }
 0x32b   : > { %v1384_v54 = vmul.f32 0.03125, %v1374_v41  ;;  %v1385_v33 = vmul.f32 0.03125, %v1383_v21 }
 0x32d   : > { %v1386_v39 = vadd.f32 1e-05, %v1384_v54  ;;  %v1387_v62 = vadd.f32 1e-05, %v1385_v33 }
 0x32f   : > { %2897 = vrsqrt.f32 %v1386_v39 }
 0x330   : > { %2899 = vrsqrt.f32 %v1387_v62 }
 0x339   : > { %v2898_v42 = vpop.eup %2897 }
 0x33a   : > { %v2900_v3 = vpop.eup %2899  ;;  %v1392_v35 = vmul.f32 %v2898_v42, %v1352_v13  ;;  %v1390_v0 = vmul.f32 %v2898_v42, %v1350_v1  ;;  %v1396_v51 = vmul.f32 %v2898_v42, %v1356_v31  ;;  %v1394_v56 = vmul.f32 %v2898_v42, %v1354_v19 }
 0x33b   : > { %v1393_v57 = vmul.f32 %v2900_v3, %v1353_v44  ;;  %v1391_v43 = vmul.f32 %v2900_v3, %v1351_v4  ;;  %v1397_v2 = vmul.f32 %v2900_v3, %v1357_v6  ;;  %v1395_v22 = vmul.f32 %v2900_v3, %v1355_v46 }
 0x33c   : > { %v1420_v15 = vmul.f32 %v1406_v60, %v1392_v35  ;;  %v1418_v17 = vmul.f32 %v1401_v5, %v1390_v0  ;;  %v1424_v32 = vmul.f32 %v1416_v36, %v1396_v51  ;;  %v1422_v55 = vmul.f32 %v1411_v53, %v1394_v56 }
 0x33d   : > { %v1421_v30 = vmul.f32 %v1406_v60, %v1393_v57  ;;  %v1419_v40 = vmul.f32 %v1401_v5, %v1391_v43  ;;  %v1425_v49 = vmul.f32 %v1416_v36, %v1397_v2  ;;  %v1423_v8 = vmul.f32 %v1411_v53, %v1395_v22 }
 0x33e   : > { %v3743_v52 = vadd.f32 %v1434_v10, %v1420_v15  ;;  %v3745_v13 = vadd.f32 %v1429_v45, %v1418_v17  ;;  %v3747_v31 = vadd.f32 %v1444_v9, %v1424_v32  ;;  %v3749_v1 = vadd.f32 %v1439_v61, %v1422_v55 }
 0x33f   : > { %v3751_v6 = vadd.f32 %v1434_v10, %v1421_v30  ;;  %v3753_v4 = vadd.f32 %v1429_v45, %v1419_v40  ;;  %v3755_v44 = vadd.f32 %v1444_v9, %v1425_v49  ;;  %v3757_v19 = vadd.f32 %v1439_v61, %v1423_v8 }
 0x340   : > { %v1456_v46 = vmul.f32 %v3743_v52, %v3743_v52  ;;  %v1454_v37 = vmul.f32 %v3745_v13, %v3745_v13  ;;  %v1460_v47 = vmul.f32 %v3747_v31, %v3747_v31  ;;  %v1458_v63 = vmul.f32 %v3749_v1, %v3749_v1 }
 0x341   : > { %v1457_v50 = vmul.f32 %v3751_v6, %v3751_v6  ;;  %v1455_v28 = vmul.f32 %v3753_v4, %v3753_v4  ;;  %v1461_v34 = vmul.f32 %v3755_v44, %v3755_v44  ;;  %v1459_v59 = vmul.f32 %v3757_v19, %v3757_v19 }
 0x342   : > { %v1464_v20 = vmul.f32 %v1456_v46, %v3743_v52  ;;  %v1462_v16 = vmul.f32 %v1454_v37, %v3745_v13  ;;  %v1468_v24 = vmul.f32 %v1460_v47, %v3747_v31  ;;  %v1466_v12 = vmul.f32 %v1458_v63, %v3749_v1 }
 0x343   : > { %v1465_v41 = vmul.f32 %v1457_v50, %v3751_v6  ;;  %v1463_v21 = vmul.f32 %v1455_v28, %v3753_v4  ;;  %v1469_v60 = vmul.f32 %v1461_v34, %v3755_v44  ;;  %v1467_v54 = vmul.f32 %v1459_v59, %v3757_v19 }
 0x344   : > { %v1472_v33 = vmul.f32 0.044715, %v1464_v20  ;;  %v1470_v5 = vmul.f32 0.044715, %v1462_v16  ;;  %v1476_v39 = vmul.f32 0.044715, %v1468_v24 }
 0x345   : > { %v1473_v62 = vmul.f32 0.044715, %v1465_v41  ;;  %v1471_v10 = vmul.f32 0.044715, %v1463_v21  ;;  %v1477_v45 = vmul.f32 0.044715, %v1469_v60 }
 0x346   : > { %v1480_v36 = vadd.f32 %v1472_v33, %v3743_v52  ;;  %v1478_v53 = vadd.f32 %v1470_v5, %v3745_v13  ;;  %v1484_v42 = vadd.f32 %v1476_v39, %v3747_v31  ;;  %v1474_v3 = vmul.f32 0.044715, %v1466_v12 }
 0x347   : > { %v1481_v35 = vadd.f32 %v1473_v62, %v3751_v6  ;;  %v1479_v0 = vadd.f32 %v1471_v10, %v3753_v4  ;;  %v1485_v51 = vadd.f32 %v1477_v45, %v3755_v44  ;;  %v1475_v56 = vmul.f32 0.044715, %v1467_v54 }
 0x348   : > { %v1488_v57 = vmul.f32 0.7978846, %v1480_v36  ;;  %v1486_v43 = vmul.f32 0.7978846, %v1478_v53  ;;  %v1482_v2 = vadd.f32 %v1474_v3, %v3749_v1  ;;  %v1492_v32 = vmul.f32 0.7978846, %v1484_v42 }
 0x349   : > { %v1489_v22 = vmul.f32 0.7978846, %v1481_v35  ;;  %v1487_v15 = vmul.f32 0.7978846, %v1479_v0  ;;  %v1483_v17 = vadd.f32 %v1475_v56, %v3757_v19  ;;  %v1493_v55 = vmul.f32 0.7978846, %v1485_v51 }
 0x34a   : > { %2901 = vtanh.f32 %v1488_v57  ;;  %v1490_v30 = vmul.f32 0.7978846, %v1482_v2  ;;  %v2748_v56 = vld [vmem:[%s4253_s3 + $0x48] sm:$0xff]  ;;  %v2750_v57 = vld [vmem:[%s4253_s3 + $0x58] sm:$0xff] }
 0x34b   : > { %2903 = vtanh.f32 %v1489_v22  ;;  %v1491_v40 = vmul.f32 0.7978846, %v1483_v17  ;;  %2038 = vperm.xlu1 %2856, %v2748_v56   ;;  %v1544_v17 = vpop.permute.xlu0 %1543 }
 0x34c   : > { %2905 = vtanh.f32 %v1486_v43  ;;  %v2749_v43 = vld [vmem:[%s4253_s3 + $0x50] sm:$0xff] }
 0x34d   : > { %2907 = vtanh.f32 %v1487_v15  ;;  %v1539_v15 = vpop.permute.xlu1 %1538 }
 0x34e   : > { %2909 = vtanh.f32 %v1492_v32 }
 0x34f   : > { %2911 = vtanh.f32 %v1493_v55  ;;  %2043 = vperm.xlu1 %2856, %v2749_v43  }
 0x350   : > { %2913 = vtanh.f32 %v1490_v30 }
 0x351   : > { %2915 = vtanh.f32 %v1491_v40 }
 0x354   : > { %v2902_v49 = vpop.eup %2901 }
 0x355   : > { %v2904_v8 = vpop.eup %2903  ;;  %v1504_v9 = vadd.f32 1.0, %v2902_v49 }
 0x356   : > { %v2906_v61 = vpop.eup %2905  ;;  %v1505_v46 = vadd.f32 1.0, %v2904_v8 }
 0x357   : > { %v2908_v37 = vpop.eup %2907  ;;  %v1502_v47 = vadd.f32 1.0, %v2906_v61  ;;  %v1512_v63 = vmul.f32 0.5, %v1504_v9  ;;  %v1549_v61 = vpop.permute.xlu1 %1548 }
 0x358   : > { %v2910_v50 = vpop.eup %2909  ;;  %v1503_v28 = vadd.f32 1.0, %v2908_v37  ;;  %v1513_v34 = vmul.f32 0.5, %v1505_v46 }
 0x359   : > { %v2912_v59 = vpop.eup %2911  ;;  %v1510_v20 = vmul.f32 0.5, %v1502_v47  ;;  %v1520_v16 = vmul.f32 %v1512_v63, %v3743_v52  ;;  %v1508_v24 = vadd.f32 1.0, %v2910_v50 }
 0x35a   : > { %v2914_v12 = vpop.eup %2913  ;;  %v1511_v41 = vmul.f32 0.5, %v1503_v28  ;;  %v1521_v21 = vmul.f32 %v1513_v34, %v3751_v6  ;;  %v1509_v60 = vadd.f32 1.0, %v2912_v59  ;;  %v1554_v34 = vpop.permute.xlu0 %1553 }
 0x35b   : > { %v2916_v54 = vpop.eup %2915  ;;  %v1518_v33 = vmul.f32 %v1510_v20, %v3745_v13  ;;  %v1506_v5 = vadd.f32 1.0, %v2914_v12  ;;  %v1516_v39 = vmul.f32 0.5, %v1508_v24 }
 0x35c   : > { %v1519_v62 = vmul.f32 %v1511_v41, %v3753_v4  ;;  %v1507_v10 = vadd.f32 1.0, %v2916_v54  ;;  %v1517_v45 = vmul.f32 0.5, %v1509_v60  ;;  %v2723_v4 = vld [vmem:[%s4254_s4 + $0x20] sm:$0xff] }
 0x35d   : > { %v2793_v36 = vpack.c.bf16 %v1520_v16, %v1518_v33  ;;  %v1514_v53 = vmul.f32 0.5, %v1506_v5  ;;  %v1524_v42 = vmul.f32 %v1516_v39, %v3747_v31  ;;  %v2724_v31 = vld [vmem:[%s4254_s4 + $0x28] sm:$0xff] }
 0x35e   : > { %v2791_v52 = vpack.c.bf16 %v1521_v21, %v1519_v62  ;;  %v1515_v3 = vmul.f32 0.5, %v1507_v10  ;;  %v1525_v35 = vmul.f32 %v1517_v45, %v3755_v44  ;;  %v2726_v44 = vld [vmem:[%s4254_s4 + $0x38] sm:$0xff] }
 0x35f   : > { %v1522_v6 = vmul.f32 %v1514_v53, %v3749_v1  ;;  %v2725_v1 = vld [vmem:[%s4254_s4 + $0x30] sm:$0xff] }
 0x360   : > { %2792 = vmatprep.subr.bf16.mxu1 %v2791_v52  ;;  %v1523_v0 = vmul.f32 %v1515_v3, %v3757_v19  ;;  %v2747_v19 = vld [vmem:[%s4253_s3 + $0x40] sm:$0xff] }
 0x361   : > { %2794 = vmatpush1.bf16.msra.mxu1 %v2793_v36  ;;  %v2797_v13 = vpack.c.bf16 %v1524_v42, %v1522_v6  ;;  %2033 = vperm.xlu0 %2854, %v2747_v19  }
 0x362   : > { %v2795_v51 = vpack.c.bf16 %v1525_v35, %v1523_v0 }
 0x364   : > { %2796 = vmatprep.subr.bf16.mxu1 %v2795_v51 }
 0x365   : > { %2798 = vmatpush1.bf16.msra.mxu1 %v2797_v13  ;;  %2048 = vperm.xlu0 %2854, %v2750_v57  }
 0x368   : > { %2731 = vmatmul.mubr.msk.f32.vlgmr.msra.gmra.mrb[4].mxu1 %vm818_vm2, %v2723_v4 }
 0x369   : > { %1638 = vmatprep.mubr.f32.mxu1 %v2998_v25 }
 0x36c   : > { %2732 = vmatmul.mubr.msk.f32.gmra.mrb[6].mxu1 %vm818_vm2, %v2724_v31 }
 0x36d   : > { %1644 = vmatprep.mubr.f32.mxu1 %v2998_v25 }
 0x370   : > { %2733 = vmatmul.mubr.msk.f32.gmra.mrb[8].mxu1 %vm818_vm2, %v2725_v1 }
 0x371   : > { %1650 = vmatprep.mubr.f32.mxu1 %v2998_v25 }
 0x374   : > { %2734 = vmatmul.mubr.msk.f32.gmra.mrb[10].mxu1 %vm818_vm2, %v2726_v44 }
 0x43b   : > { %v1634_v2 = vpop.f32.mrb[4].mxu1 }
 0x43c   : > { %v1636_v22 = vpop.f32.mrb[5].mxu1  ;;  %v1635_v55 = vadd.f32 %v1634_v2, %v1539_v15 }
 0x43d   : > { %v1637_v49 = vadd.f32 %v1636_v22, %v1539_v15 }
 0x43f   : > { %v1640_v32 = vpop.f32.mrb[6].mxu1 }
 0x440   : > { %v1641_v30 = vadd.f32 %v1640_v32, %v1544_v17  ;;  %v1642_v40 = vpop.f32.mrb[7].mxu1 }
 0x441   : > { %v1643_v8 = vadd.f32 %v1642_v40, %v1544_v17 }
 0x442   : > { %v1667_v9 = vadd.f32 %v1641_v30, %v1635_v55 }
 0x443   : > { %v1676_v46 = vadd.f32 %v1643_v8, %v1637_v49  ;;  %v1646_v37 = vpop.f32.mrb[8].mxu1 }
 0x444   : > { %v1647_v47 = vadd.f32 %v1646_v37, %v1549_v61  ;;  %v1648_v63 = vpop.f32.mrb[9].mxu1 }
 0x445   : > { %v1649_v50 = vadd.f32 %v1648_v63, %v1549_v61 }
 0x446   : > { %v1668_v28 = vadd.f32 %v1667_v9, %v1647_v47 }
 0x447   : > { %v1677_v59 = vadd.f32 %v1676_v46, %v1649_v50  ;;  %v1652_v20 = vpop.f32.mrb[10].mxu1 }
 0x448   : > { %v1653_v16 = vadd.f32 %v1652_v20, %v1554_v34  ;;  %v1654_v24 = vpop.f32.mrb[11].mxu1 }
 0x449   : > { %v1655_v12 = vadd.f32 %v1654_v24, %v1554_v34  ;;  %v1743_v24 = vpop.permute.xlu0 %1742 }
 0x44a   : > { %v1669_v41 = vadd.f32 %v1668_v28, %v1653_v16 }
 0x44b   : > { %v1678_v21 = vadd.f32 %v1677_v59, %v1655_v12 }
 0x44c   : > { %v1670_v60 = vrot.slane %v1669_v41, 4 }
 0x44d   : > { %v1679_v54 = vrot.slane %v1678_v21, 4 }
 0x44e   : > { %v1671_v33 = vadd.f32 %v1670_v60, %v1669_v41 }
 0x44f   : > { %v1680_v5 = vadd.f32 %v1679_v54, %v1678_v21 }
 0x450   : > { %v1672_v39 = vrot.slane %v1671_v33, 2 }
 0x451   : > { %v1681_v62 = vrot.slane %v1680_v5, 2 }
 0x452   : > { %v1673_v10 = vadd.f32 %v1672_v39, %v1671_v33  ;;  %v1766_v33 = vpop.permute.xlu0 %1765 }
 0x453   : > { %v1682_v45 = vadd.f32 %v1681_v62, %v1680_v5 }
 0x454   : > { %v1674_v36 = vrot.slane %v1673_v10, 1 }
 0x455   : > { %v1683_v53 = vrot.slane %v1682_v45, 1 }
 0x456   : > { %v1675_v42 = vadd.f32 %v1674_v36, %v1673_v10  ;;  %v1753_v39 = vpop.permute.xlu0 %1752 }
 0x457   : > { %v1684_v52 = vadd.f32 %v1683_v53, %v1682_v45 }
 0x458   : > { %v1685_v3 = vmul.f32 0.03125, %v1675_v42 }
 0x459   : > { %v1686_v35 = vmul.f32 0.03125, %v1684_v52 }
 0x45a   : > { %v1687_v6 = vsub.f32 %v1635_v55, %v1685_v3  ;;  %v1689_v0 = vsub.f32 %v1641_v30, %v1685_v3  ;;  %v1691_v13 = vsub.f32 %v1647_v47, %v1685_v3  ;;  %v1693_v51 = vsub.f32 %v1653_v16, %v1685_v3 }
 0x45b   : > { %v1688_v4 = vsub.f32 %v1637_v49, %v1686_v35  ;;  %v1690_v31 = vsub.f32 %v1643_v8, %v1686_v35  ;;  %v1692_v1 = vsub.f32 %v1649_v50, %v1686_v35  ;;  %v1694_v44 = vsub.f32 %v1655_v12, %v1686_v35  ;;  %v1738_v12 = vpop.permute.xlu1 %1737 }
 0x45c   : > { %v1695_v19 = vmul.f32 %v1687_v6, %v1687_v6  ;;  %v1697_v56 = vmul.f32 %v1689_v0, %v1689_v0  ;;  %v1699_v2 = vmul.f32 %v1691_v13, %v1691_v13  ;;  %v1701_v32 = vmul.f32 %v1693_v51, %v1693_v51 }
 0x45d   : > { %v1696_v57 = vmul.f32 %v1688_v4, %v1688_v4  ;;  %v1698_v43 = vmul.f32 %v1690_v31, %v1690_v31  ;;  %v1700_v15 = vmul.f32 %v1692_v1, %v1692_v1  ;;  %v1702_v9 = vmul.f32 %v1694_v44, %v1694_v44 }
 0x45e   : > { %v1703_v22 = vadd.f32 %v1697_v56, %v1695_v19 }
 0x45f   : > { %v1712_v17 = vadd.f32 %v1698_v43, %v1696_v57  ;;  %v1748_v5 = vpop.permute.xlu1 %1747 }
 0x460   : > { %v1704_v40 = vadd.f32 %v1703_v22, %v1699_v2 }
 0x461   : > { %v1713_v61 = vadd.f32 %v1712_v17, %v1700_v15  ;;  %v1781_v15 = vpop.permute.xlu0 %1780 }
 0x462   : > { %v1705_v55 = vadd.f32 %v1704_v40, %v1701_v32 }
 0x463   : > { %v1714_v30 = vadd.f32 %v1713_v61, %v1702_v9  ;;  %v1771_v62 = vpop.permute.xlu1 %1770 }
 0x464   : > { %v1706_v46 = vrot.slane %v1705_v55, 4 }
 0x465   : > { %v1715_v37 = vrot.slane %v1714_v30, 4 }
 0x466   : > { %v1707_v49 = vadd.f32 %v1706_v46, %v1705_v55 }
 0x467   : > { %v1716_v8 = vadd.f32 %v1715_v37, %v1714_v30  ;;  %v1776_v17 = vpop.permute.xlu1 %1775 }
 0x468   : > { %v1708_v47 = vrot.slane %v1707_v49, 2 }
 0x469   : > { %v1717_v63 = vrot.slane %v1716_v8, 2 }
 0x46a   : > { %v1709_v50 = vadd.f32 %v1708_v47, %v1707_v49 }
 0x46b   : > { %v1718_v28 = vadd.f32 %v1717_v63, %v1716_v8 }
 0x46c   : > { %v1710_v34 = vrot.slane %v1709_v50, 1 }
 0x46d   : > { %v1719_v59 = vrot.slane %v1718_v28, 1 }
 0x46e   : > { %v1711_v20 = vadd.f32 %v1710_v34, %v1709_v50 }
 0x46f   : > { %v1720_v16 = vadd.f32 %v1719_v59, %v1718_v28 }
 0x470   : > { %v1721_v41 = vmul.f32 0.03125, %v1711_v20 }
 0x471   : > { %v1722_v21 = vmul.f32 0.03125, %v1720_v16 }
 0x472   : > { %v1723_v60 = vadd.f32 1e-05, %v1721_v41 }
 0x473   : > { %v1724_v54 = vadd.f32 1e-05, %v1722_v21 }
 0x474   : > { %2917 = vrsqrt.f32 %v1723_v60 }
 0x475   : > { %2919 = vrsqrt.f32 %v1724_v54 }
 0x47e   : > { %v2918_v10 = vpop.eup %2917 }
 0x47f   : > { %v2920_v45 = vpop.eup %2919  ;;  %v1727_v36 = vmul.f32 %v2918_v10, %v1687_v6  ;;  %v1729_v53 = vmul.f32 %v2918_v10, %v1689_v0  ;;  %v1731_v42 = vmul.f32 %v2918_v10, %v1691_v13  ;;  %v1733_v52 = vmul.f32 %v2918_v10, %v1693_v51 }
 0x480   : > { %v1728_v3 = vmul.f32 %v2920_v45, %v1688_v4  ;;  %v1730_v35 = vmul.f32 %v2920_v45, %v1690_v31  ;;  %v1732_v19 = vmul.f32 %v2920_v45, %v1692_v1  ;;  %v1734_v56 = vmul.f32 %v2920_v45, %v1694_v44 }
 0x481   : > { %v1755_v57 = vmul.f32 %v1738_v12, %v1727_v36  ;;  %v1757_v43 = vmul.f32 %v1743_v24, %v1729_v53  ;;  %v1759_v2 = vmul.f32 %v1748_v5, %v1731_v42  ;;  %v1761_v22 = vmul.f32 %v1753_v39, %v1733_v52 }
 0x482   : > { %v1756_v32 = vmul.f32 %v1738_v12, %v1728_v3  ;;  %v1758_v40 = vmul.f32 %v1743_v24, %v1730_v35  ;;  %v1760_v9 = vmul.f32 %v1748_v5, %v1732_v19  ;;  %v1762_v61 = vmul.f32 %v1753_v39, %v1734_v56 }
 0x483   : > { %v3830_v55 = vadd.f32 %v1781_v15, %v1761_v22  ;;  %v1783_v6 = vadd.f32 %v1766_v33, %v1755_v57  ;;  %v3832_v0 = vadd.f32 %v1771_v62, %v1757_v43  ;;  %v3834_v13 = vadd.f32 %v1776_v17, %v1759_v2 }
 0x484   : > { %v3836_v51 = vadd.f32 %v1781_v15, %v1762_v61  ;;  %v3838_v4 = vadd.f32 %v1766_v33, %v1756_v32  ;;  %v3840_v31 = vadd.f32 %v1771_v62, %v1758_v40  ;;  %v3842_v1 = vadd.f32 %v1776_v17, %v1760_v9 }
 0x485   : > { %v1797_v44 = vmul.f32 %v3830_v55, %v3830_v55  ;;  %v1791_v30 = vmul.f32 %v1783_v6, %v1783_v6  ;;  %v1793_v46 = vmul.f32 %v3832_v0, %v3832_v0  ;;  %v1795_v37 = vmul.f32 %v3834_v13, %v3834_v13 }
 0x486   : > { %v1798_v49 = vmul.f32 %v3836_v51, %v3836_v51  ;;  %v1792_v8 = vmul.f32 %v3838_v4, %v3838_v4  ;;  %v1794_v47 = vmul.f32 %v3840_v31, %v3840_v31  ;;  %v1796_v63 = vmul.f32 %v3842_v1, %v3842_v1 }
 0x487   : > { %v1805_v50 = vmul.f32 %v1797_v44, %v3830_v55  ;;  %v1799_v28 = vmul.f32 %v1791_v30, %v1783_v6  ;;  %v1801_v34 = vmul.f32 %v1793_v46, %v3832_v0  ;;  %v1803_v59 = vmul.f32 %v1795_v37, %v3834_v13 }
 0x488   : > { %v1800_v20 = vmul.f32 %v1792_v8, %v3838_v4  ;;  %v1802_v16 = vmul.f32 %v1794_v47, %v3840_v31  ;;  %v1806_v21 = vmul.f32 %v1798_v49, %v3836_v51  ;;  %v1804_v33 = vmul.f32 %v1796_v63, %v3842_v1 }
 0x489   : > { %v1813_v24 = vmul.f32 0.044715, %v1805_v50  ;;  %v1807_v12 = vmul.f32 0.044715, %v1799_v28  ;;  %v1809_v41 = vmul.f32 0.044715, %v1801_v34 }
 0x48a   : > { %v1808_v60 = vmul.f32 0.044715, %v1800_v20  ;;  %v1810_v54 = vmul.f32 0.044715, %v1802_v16  ;;  %v1811_v10 = vmul.f32 0.044715, %v1803_v59 }
 0x48b   : > { %v1815_v5 = vadd.f32 %v1807_v12, %v1783_v6  ;;  %v1817_v39 = vadd.f32 %v1809_v41, %v3832_v0  ;;  %v1821_v62 = vadd.f32 %v1813_v24, %v3830_v55  ;;  %v1814_v52 = vmul.f32 0.044715, %v1806_v21 }
 0x48c   : > { %v1816_v45 = vadd.f32 %v1808_v60, %v3838_v4  ;;  %v1819_v42 = vadd.f32 %v1811_v10, %v3834_v13  ;;  %v1818_v35 = vadd.f32 %v1810_v54, %v3840_v31  ;;  %v1812_v56 = vmul.f32 0.044715, %v1804_v33 }
 0x48d   : > { %v1823_v36 = vmul.f32 0.7978846, %v1815_v5  ;;  %v1825_v53 = vmul.f32 0.7978846, %v1817_v39  ;;  %v1829_v19 = vmul.f32 0.7978846, %v1821_v62  ;;  %v1822_v2 = vadd.f32 %v1814_v52, %v3836_v51 }
 0x48e   : > { %v1824_v3 = vmul.f32 0.7978846, %v1816_v45  ;;  %v1827_v57 = vmul.f32 0.7978846, %v1819_v42  ;;  %v1826_v43 = vmul.f32 0.7978846, %v1818_v35  ;;  %v1820_v22 = vadd.f32 %v1812_v56, %v3842_v1 }
 0x48f   : > { %2921 = vtanh.f32 %v1823_v36  ;;  %v1830_v15 = vmul.f32 0.7978846, %v1822_v2  ;;  %v2755_v35 = vld [vmem:[%s4257_s7 + $0x40] sm:$0xff]  ;;  %v2753_v56 = vld [vmem:[%s4256_s6 + $0x50] sm:$0xff]  ;;  %v2764_v2 = vld [vmem:[%s4255_s5 + $0x48] sm:$0xff] }
 0x490   : > { %2923 = vtanh.f32 %v1825_v53  ;;  %v1828_v17 = vmul.f32 0.7978846, %v1820_v22  ;;  %v2763_v22 = vld [vmem:[%s4255_s5 + $0x40] sm:$0xff] }
 0x491   : > { %2925 = vtanh.f32 %v1824_v3 }
 0x492   : > { %2927 = vtanh.f32 %v1829_v19  ;;  %v2754_v19 = vld [vmem:[%s4256_s6 + $0x58] sm:$0xff] }
 0x493   : > { %2929 = vtanh.f32 %v1827_v57  ;;  %v2758_v57 = vld [vmem:[%s4257_s7 + $0x58] sm:$0xff] }
 0x494   : > { %2931 = vtanh.f32 %v1826_v43  ;;  %v2757_v43 = vld [vmem:[%s4257_s7 + $0x50] sm:$0xff] }
 0x495   : > { %2933 = vtanh.f32 %v1830_v15  ;;  %v2766_v15 = vld [vmem:[%s4255_s5 + $0x58] sm:$0xff] }
 0x496   : > { %2935 = vtanh.f32 %v1828_v17  ;;  %v2765_v17 = vld [vmem:[%s4255_s5 + $0x50] sm:$0xff] }
 0x499   : > { %v2922_v32 = vpop.eup %2921 }
 0x49a   : > { %v1839_v40 = vadd.f32 1.0, %v2922_v32  ;;  %v2924_v9 = vpop.eup %2923  ;;  %v2772_v32 = vld [vmem:[%s4258_s8 + $0x48] sm:$0xff] }
 0x49b   : > { %v2926_v61 = vpop.eup %2925  ;;  %v1841_v30 = vadd.f32 1.0, %v2924_v9  ;;  %v2774_v9 = vld [vmem:[%s4258_s8 + $0x58] sm:$0xff] }
 0x49c   : > { %v1847_v44 = vmul.f32 0.5, %v1839_v40  ;;  %v2928_v46 = vpop.eup %2927  ;;  %v1840_v63 = vadd.f32 1.0, %v2926_v61  ;;  %v2771_v40 = vld [vmem:[%s4258_s8 + $0x40] sm:$0xff]  ;;  %v2773_v61 = vld [vmem:[%s4258_s8 + $0x50] sm:$0xff] }
 0x49d   : > { %v1849_v49 = vmul.f32 0.5, %v1841_v30  ;;  %v1845_v8 = vadd.f32 1.0, %v2928_v46  ;;  %v2930_v47 = vpop.eup %2929  ;;  %v2776_v30 = vld [vmem:[%s4259_s9 + $0x48] sm:$0xff]  ;;  %v2775_v46 = vld [vmem:[%s4259_s9 + $0x40] sm:$0xff] }
 0x49e   : > { %v1855_v37 = vmul.f32 %v1847_v44, %v1783_v6  ;;  %v2932_v50 = vpop.eup %2931  ;;  %v1843_v20 = vadd.f32 1.0, %v2930_v47  ;;  %v1848_v12 = vmul.f32 0.5, %v1840_v63  ;;  %v1912_v44 = vpop.permute.xlu1 %1911 }
 0x49f   : > { %v1857_v34 = vmul.f32 %v1849_v49, %v3832_v0  ;;  %v1853_v59 = vmul.f32 0.5, %v1845_v8  ;;  %v1842_v41 = vadd.f32 1.0, %v2932_v50  ;;  %v2934_v21 = vpop.eup %2933  ;;  %v2778_v49 = vld [vmem:[%s4259_s9 + $0x58] sm:$0xff]  ;;  %v2777_v8 = vld [vmem:[%s4259_s9 + $0x50] sm:$0xff] }
 0x4a0   : > { %v3873_v28 = vadd.f32 %v1855_v37, %v3479_v7  ;;  %v1851_v6 = vmul.f32 0.5, %v1843_v20  ;;  %v2936_v54 = vpop.eup %2935  ;;  %v1856_v33 = vmul.f32 %v1848_v12, %v3838_v4  ;;  %v1846_v39 = vadd.f32 1.0, %v2934_v21 }
 0x4a1   : > { %v3881_v24 = vadd.f32 %v1857_v34, %v3487_v18  ;;  %v1861_v7 = vmul.f32 %v1853_v59, %v3830_v55  ;;  %v1850_v5 = vmul.f32 0.5, %v1842_v41  ;;  %v1844_v55 = vadd.f32 1.0, %v2936_v54  ;;  %v1996_v34 = vpop.permute.xlu0 %1995 }
 0x4a2   : > { %v3878_v16 = vmul.f32 %v3873_v28, %v3098_v11  ;;  %v1859_v0 = vmul.f32 %v1851_v6, %v3834_v13  ;;  %v1854_v10 = vmul.f32 0.5, %v1846_v39  ;;  %v1939_v37 = vpop.permute.xlu1 %1938 }
 0x4a3   : > { %v3885_v60 = vmul.f32 %v3881_v24, %v3098_v11  ;;  %v3898_v62 = vadd.f32 %v1861_v7, %v3504_v48  ;;  %v1858_v4 = vmul.f32 %v1850_v5, %v3840_v31  ;;  %v1852_v45 = vmul.f32 0.5, %v1844_v55 }
 0x4a4   : > { %1884 = vrot.lane.b32.xlu1 %v3878_v16, %s3001_s18  ;;  %v3892_v18 = vadd.f32 %v1859_v0, %v3498_v27  ;;  %v3908_v27 = vadd.f32 %v1856_v33, %v3515_v26  ;;  %v1862_v31 = vmul.f32 %v1854_v10, %v3836_v51 }
 0x4a5   : > { %1886 = vrot.lane.b32.xlu0 %v3885_v60, %s3001_s18  ;;  %v3913_v48 = vmul.f32 %v3898_v62, %v3098_v11  ;;  %v3923_v26 = vadd.f32 %v1858_v4, %v3531_v38  ;;  %v1860_v53 = vmul.f32 %v1852_v45, %v3842_v1  ;;  %v2756_v1 = vld [vmem:[%s4257_s7 + $0x48] sm:$0xff]  ;;  %v1943_v20 = vpop.permute.xlu0 %1942 }
 0x4a6   : > { %v3902_v13 = vmul.f32 %v3892_v18, %v3098_v11  ;;  %v3920_v36 = vmul.f32 %v3908_v27, %v3102_v14  ;;  %v3935_v52 = vadd.f32 %v1862_v31, %v3544_v29  ;;  %v2752_v29 = vld [vmem:[%s4256_s6 + $0x48] sm:$0xff]  ;;  %v1922_v47 = vpop.permute.xlu1 %1921 }
 0x4a7   : > { %v3932_v42 = vmul.f32 %v3923_v26, %v3102_v14  ;;  %v3938_v3 = vadd.f32 %v1860_v53, %v3547_v58  ;;  %v2751_v58 = vld [vmem:[%s4256_s6 + $0x40] sm:$0xff] }
 0x4a8   : > { %1888 = vrot.lane.b32.xlu1 %v3902_v13, %s3001_s18  ;;  %v3945_v38 = vmul.f32 %v3935_v52, %v3102_v14 }
 0x4a9   : > { %1971 = vrot.lane.b32.xlu0 %v3885_v60, %s3002_s22  ;;  %v3949_v51 = vmul.f32 %v3938_v3, %v3102_v14  ;;  %v1951_v12 = vpop.permute.xlu0 %1950 }
 0x4aa   : > { %v1947_v63 = vpop.permute.xlu1 %1946 }
 0x4ac   : > { %1969 = vrot.lane.b32.xlu1 %v3878_v16, %s3002_s22 }
 0x4ad   : > { %1890 = vrot.lane.b32.xlu0 %v3913_v48, %s3001_s18  ;;  %v1917_v21 = vpop.permute.xlu0 %1916 }
 0x4ae   : > { %v4019_v50 = vpop.permute.xlu1 %1999 }
 0x4b0   : > { %1892 = vrot.lane.b32.xlu1 %v3920_v36, %s3001_s18 }
 0x4b1   : > { %1973 = vrot.lane.b32.xlu0 %v3902_v13, %s3002_s22  ;;  %v2034_v0 = vpop.permute.xlu0 %2033 }
 0x4b2   : > { %v1927_v59 = vpop.permute.xlu1 %1926 }
 0x4b4   : > { %1977 = vrot.lane.b32.xlu1 %v3920_v36, %s3002_s22 }
 0x4b5   : > { %1894 = vrot.lane.b32.xlu0 %v3932_v42, %s3001_s18  ;;  %v4029_v33 = vpop.permute.xlu0 %2048 }
 0x4b6   : > { %v4021_v6 = vpop.permute.xlu1 %2003 }
 0x4b8   : > { %1898 = vrot.lane.b32.xlu1 %v3945_v38, %s3001_s18 }
 0x4b9   : > { %1896 = vrot.lane.b32.xlu0 %v3949_v51, %s3001_s18 }
 0x4ba   : > { %v4023_v41 = vpop.permute.xlu1 %2007 }
 0x4bc   : > { %1981 = vrot.lane.b32.xlu1 %v3949_v51, %s3002_s22 }
 0x4bd   : > { %1979 = vrot.lane.b32.xlu0 %v3932_v42, %s3002_s22 }
 0x4be   : > { %v4025_v7 = vpop.permute.xlu1 %2038 }
 0x4c0   : > { %1975 = vrot.lane.b32.xlu1 %v3913_v48, %s3002_s22 }
 0x4c1   : > { %1983 = vrot.lane.b32.xlu0 %v3945_v38, %s3002_s22  ;;  %s4217_s22 = scalar_lea.vmem %s4260_s10, %s2781_s27 }
 0x4c2   : > { %v4027_v54 = vpop.permute.xlu1 %2043 }
 0x4c4   : > { %2139 = vperm.xlu1 %2856, %v2751_v58  }
 0x4c5   : > { %2144 = vperm.xlu0 %2854, %v2752_v29  }
 0x4c8   : > { %2167 = vperm.xlu1 %2856, %v2755_v35  }
 0x4c9   : > { %2172 = vperm.xlu0 %2854, %v2756_v1   ;;  %v1953_v1 = vmul.f32 %v1939_v37, %v3878_v16 }
 0x4cc   : > { %2149 = vperm.xlu1 %2856, %v2753_v56   ;;  %v1954_v56 = vmul.f32 %v1939_v37, %v3920_v36 }
 0x4cd   : > { %2154 = vperm.xlu0 %2854, %v2754_v19  }
 0x4d0   : > { %2177 = vperm.xlu1 %2856, %v2757_v43  }
 0x4d1   : > { %2182 = vperm.xlu0 %2854, %v2758_v57  }
 0x4d4   : > { %2277 = vperm.xlu1 %2856, %v2763_v22  }
 0x4d5   : > { %2282 = vperm.xlu0 %2854, %v2764_v2  }
 0x4d8   : > { %2287 = vperm.xlu1 %2856, %v2765_v17  }
 0x4d9   : > { %2292 = vperm.xlu0 %2854, %v2766_v15  }
 0x4dc   : > { %2476 = vperm.xlu1 %2856, %v2771_v40  }
 0x4dd   : > { %2481 = vperm.xlu0 %2854, %v2772_v32  }
 0x4e0   : > { %2486 = vperm.xlu1 %2856, %v2773_v61  }
 0x4e1   : > { %2491 = vperm.xlu0 %2854, %v2774_v9  }
 0x4e4   : > { %2504 = vperm.xlu1 %2856, %v2775_v46  }
 0x4e5   : > { %2509 = vperm.xlu0 %2854, %v2776_v30  }
 0x4e8   : > { %2514 = vperm.xlu1 %2856, %v2777_v8  }
 0x4e9   : > { %2519 = vperm.xlu0 %2854, %v2778_v49  }
 0x516   : > { %v1885_v5 = vpop.permute.xlu1 %1884 }
 0x517   : > { %v1887_v39 = vpop.permute.xlu0 %1886 }
 0x51a   : > { %v1889_v4 = vpop.permute.xlu1 %1888 }
 0x51b   : > { %v1972_v55 = vpop.permute.xlu0 %1971 }
 0x51e   : > { %v1970_v45 = vpop.permute.xlu1 %1969 }
 0x51f   : > { %v1891_v10 = vpop.permute.xlu0 %1890 }
 0x522   : > { %v1893_v53 = vpop.permute.xlu1 %1892 }
 0x523   : > { %v1974_v31 = vpop.permute.xlu0 %1973  ;;  %v1901_v29 = vsel %vm1900_vm5, %v1885_v5, %v1893_v53  ;;  %v1905_v58 = vsel %vm1900_vm5, %v1893_v53, %v1885_v5  ;;  %v1960_v53 = vmul.f32 %v1951_v12, %v3945_v38 }
 0x524   : > { %v1929_v35 = vmul.f32 %v1912_v44, %v1905_v58  ;;  %v1930_v19 = vmul.f32 %v1912_v44, %v1901_v29  ;;  %v1957_v29 = vmul.f32 %v1947_v63, %v3902_v13  ;;  %v1958_v58 = vmul.f32 %v1947_v63, %v3949_v51 }
 0x526   : > { %v1961_v57 = vadd.f32 %v1953_v1, %v1929_v35  ;;  %v1978_v2 = vpop.permute.xlu1 %1977  ;;  %v1962_v32 = vadd.f32 %v1954_v56, %v1930_v19 }
 0x527   : > { %v1895_v43 = vpop.permute.xlu0 %1894  ;;  %v1986_v17 = vsel %vm1985_vm6, %v1970_v45, %v1978_v2  ;;  %v1990_v16 = vsel %vm1985_vm6, %v1978_v2, %v1970_v45  ;;  %v1959_v45 = vmul.f32 %v1951_v12, %v3913_v48 }
 0x528   : > { %v1902_v22 = vsel %vm1900_vm5, %v1887_v39, %v1895_v43  ;;  %v1906_v15 = vsel %vm1900_vm5, %v1895_v43, %v1887_v39  ;;  %v2010_v40 = vmul.f32 %v1996_v34, %v1986_v17  ;;  %v2011_v9 = vmul.f32 %v1996_v34, %v1990_v16 }
 0x529   : > { %v1931_v61 = vmul.f32 %v1917_v21, %v1906_v15  ;;  %v1932_v36 = vmul.f32 %v1917_v21, %v1902_v22  ;;  %v1955_v34 = vmul.f32 %v1943_v20, %v3885_v60  ;;  %v1956_v21 = vmul.f32 %v1943_v20, %v3932_v42 }
 0x52a   : > { %v2018_v44 = vadd.f32 %v2010_v40, %v1961_v57  ;;  %v2019_v30 = vadd.f32 %v2011_v9, %v1962_v32  ;;  %v1899_v37 = vpop.permute.xlu1 %1898 }
 0x52b   : > { %v1897_v46 = vpop.permute.xlu0 %1896  ;;  %v1904_v5 = vsel %vm1900_vm5, %v1891_v10, %v1899_v37  ;;  %v1908_v39 = vsel %vm1900_vm5, %v1899_v37, %v1891_v10  ;;  %v1963_v35 = vadd.f32 %v1955_v34, %v1931_v61  ;;  %v1964_v19 = vadd.f32 %v1956_v21, %v1932_v36 }
 0x52c   : > { %v1903_v49 = vsel %vm1900_vm5, %v1889_v4, %v1897_v46  ;;  %v1907_v8 = vsel %vm1900_vm5, %v1897_v46, %v1889_v4  ;;  %v1935_v56 = vmul.f32 %v1927_v59, %v1908_v39  ;;  %v1936_v57 = vmul.f32 %v1927_v59, %v1904_v5 }
 0x52d   : > { %v1933_v1 = vmul.f32 %v1922_v47, %v1907_v8  ;;  %v1934_v4 = vmul.f32 %v1922_v47, %v1903_v49  ;;  %v2051_v2 = vadd.f32 %v2034_v0, %v2018_v44  ;;  %v2052_v60 = vadd.f32 %v2034_v0, %v2019_v30 }
 0x52e   : > { %v1982_v10 = vpop.permute.xlu1 %1981  ;;  %v1967_v0 = vadd.f32 %v1959_v45, %v1935_v56  ;;  %v1968_v22 = vadd.f32 %v1960_v53, %v1936_v57 }
 0x52f   : > { %v1980_v43 = vpop.permute.xlu0 %1979  ;;  %v1988_v51 = vsel %vm1985_vm6, %v1974_v31, %v1982_v10  ;;  %v1992_v47 = vsel %vm1985_vm6, %v1982_v10, %v1974_v31  ;;  %v1965_v63 = vadd.f32 %v1957_v29, %v1933_v1  ;;  %v1966_v59 = vadd.f32 %v1958_v58, %v1934_v4 }
 0x530   : > { %v1987_v42 = vsel %vm1985_vm6, %v1972_v55, %v1980_v43  ;;  %v1991_v48 = vsel %vm1985_vm6, %v1980_v43, %v1972_v55  ;;  %v2014_v20 = vmul.f32 %v4021_v6, %v1988_v51  ;;  %v2015_v12 = vmul.f32 %v4021_v6, %v1992_v47 }
 0x531   : > { %v2012_v13 = vmul.f32 %v4019_v50, %v1987_v42  ;;  %v2013_v38 = vmul.f32 %v4019_v50, %v1991_v48 }
 0x532   : > { %v1976_v16 = vpop.permute.xlu1 %1975  ;;  %v2022_v32 = vadd.f32 %v2014_v20, %v1965_v63  ;;  %v2023_v50 = vadd.f32 %v2015_v12, %v1966_v59 }
 0x533   : > { %v2020_v15 = vadd.f32 %v2012_v13, %v1963_v35  ;;  %v2021_v55 = vadd.f32 %v2013_v38, %v1964_v19  ;;  %v1984_v17 = vpop.permute.xlu0 %1983 }
 0x534   : > { %v1989_v40 = vsel %vm1985_vm6, %v1976_v16, %v1984_v17  ;;  %v1993_v31 = vsel %vm1985_vm6, %v1984_v17, %v1976_v16  ;;  %v2055_v44 = vadd.f32 %v4027_v54, %v2022_v32  ;;  %v2056_v30 = vadd.f32 %v4027_v54, %v2023_v50 }
 0x535   : > { %v2053_v9 = vadd.f32 %v4025_v7, %v2020_v15  ;;  %v2054_v61 = vadd.f32 %v4025_v7, %v2021_v55  ;;  %v2016_v6 = vmul.f32 %v4023_v41, %v1989_v40  ;;  %v2017_v36 = vmul.f32 %v4023_v41, %v1993_v31 }
 0x537   : > { %v2069_v46 = vadd.f32 %v2053_v9, %v2051_v2  ;;  %v2078_v37 = vadd.f32 %v2054_v61, %v2052_v60  ;;  %v2024_v49 = vadd.f32 %v2016_v6, %v1967_v0  ;;  %v2025_v8 = vadd.f32 %v2017_v36, %v1968_v22 }
 0x539   : > { %v2070_v5 = vadd.f32 %v2069_v46, %v2055_v44  ;;  %v2079_v39 = vadd.f32 %v2078_v37, %v2056_v30  ;;  %v2057_v23 = vadd.f32 %v4029_v33, %v2024_v49  ;;  %v2058_v34 = vadd.f32 %v4029_v33, %v2025_v8 }
 0x53b   : > { %v2071_v21 = vadd.f32 %v2070_v5, %v2057_v23  ;;  %v2080_v7 = vadd.f32 %v2079_v39, %v2058_v34 }
 0x53d   : > { %v2072_v45 = vrot.slane %v2071_v21, 4  ;;  %v2081_v53 = vrot.slane %v2080_v7, 4 }
 0x53f   : > { %v2073_v29 = vadd.f32 %v2072_v45, %v2071_v21  ;;  %v2082_v41 = vadd.f32 %v2081_v53, %v2080_v7 }
 0x541   : > { %v2074_v58 = vrot.slane %v2073_v29, 2  ;;  %v2083_v1 = vrot.slane %v2082_v41, 2 }
 0x543   : > { %v2075_v4 = vadd.f32 %v2074_v58, %v2073_v29  ;;  %v2084_v54 = vadd.f32 %v2083_v1, %v2082_v41  ;;  %v2140_v21 = vpop.permute.xlu1 %2139 }
 0x544   : > { %v2145_v39 = vpop.permute.xlu0 %2144 }
 0x545   : > { %v2076_v35 = vrot.slane %v2075_v4, 1  ;;  %v2085_v19 = vrot.slane %v2084_v54, 1 }
 0x547   : > { %v2077_v56 = vadd.f32 %v2076_v35, %v2075_v4  ;;  %v2086_v57 = vadd.f32 %v2085_v19, %v2084_v54  ;;  %v2168_v29 = vpop.permute.xlu1 %2167 }
 0x548   : > { %v2173_v53 = vpop.permute.xlu0 %2172 }
 0x549   : > { %v2087_v43 = vmul.f32 0.03125, %v2077_v56  ;;  %v2088_v10 = vmul.f32 0.03125, %v2086_v57 }
 0x54b   : > { %v2095_v42 = vsub.f32 %v2057_v23, %v2087_v43  ;;  %v2096_v48 = vsub.f32 %v2058_v34, %v2088_v10  ;;  %v2089_v13 = vsub.f32 %v2051_v2, %v2087_v43  ;;  %v2090_v33 = vsub.f32 %v2052_v60, %v2088_v10  ;;  %v2150_v58 = vpop.permute.xlu1 %2149 }
 0x54c   : > { %v2091_v38 = vsub.f32 %v2053_v9, %v2087_v43  ;;  %v2092_v51 = vsub.f32 %v2054_v61, %v2088_v10  ;;  %v2093_v47 = vsub.f32 %v2055_v44, %v2087_v43  ;;  %v2094_v63 = vsub.f32 %v2056_v30, %v2088_v10  ;;  %v2155_v41 = vpop.permute.xlu0 %2154 }
 0x54d   : > { %v2097_v59 = vmul.f32 %v2089_v13, %v2089_v13  ;;  %v2098_v20 = vmul.f32 %v2090_v33, %v2090_v33  ;;  %v2103_v16 = vmul.f32 %v2095_v42, %v2095_v42  ;;  %v2104_v32 = vmul.f32 %v2096_v48, %v2096_v48 }
 0x54e   : > { %v2099_v12 = vmul.f32 %v2091_v38, %v2091_v38  ;;  %v2100_v0 = vmul.f32 %v2092_v51, %v2092_v51  ;;  %v2101_v22 = vmul.f32 %v2093_v47, %v2093_v47  ;;  %v2102_v15 = vmul.f32 %v2094_v63, %v2094_v63 }
 0x550   : > { %v2105_v55 = vadd.f32 %v2099_v12, %v2097_v59  ;;  %v2114_v17 = vadd.f32 %v2100_v0, %v2098_v20 }
 0x552   : > { %v2106_v50 = vadd.f32 %v2105_v55, %v2101_v22  ;;  %v2115_v40 = vadd.f32 %v2114_v17, %v2102_v15 }
 0x554   : > { %v2107_v31 = vadd.f32 %v2106_v50, %v2103_v16  ;;  %v2116_v6 = vadd.f32 %v2115_v40, %v2104_v32  ;;  %v2183_v32 = vpop.permute.xlu0 %2182  ;;  %v2178_v50 = vpop.permute.xlu1 %2177 }
 0x556   : > { %v2108_v2 = vrot.slane %v2107_v31, 4  ;;  %v2117_v60 = vrot.slane %v2116_v6, 4 }
 0x558   : > { %v2109_v9 = vadd.f32 %v2108_v2, %v2107_v31  ;;  %v2118_v61 = vadd.f32 %v2117_v60, %v2116_v6 }
 0x55a   : > { %v2110_v36 = vrot.slane %v2109_v9, 2  ;;  %v2119_v44 = vrot.slane %v2118_v61, 2 }
 0x55c   : > { %v2111_v30 = vadd.f32 %v2110_v36, %v2109_v9  ;;  %v2120_v46 = vadd.f32 %v2119_v44, %v2118_v61 }
 0x55e   : > { %v2112_v37 = vrot.slane %v2111_v30, 1  ;;  %v2121_v49 = vrot.slane %v2120_v46, 1 }
 0x560   : > { %v2113_v8 = vadd.f32 %v2112_v37, %v2111_v30  ;;  %v2122_v5 = vadd.f32 %v2121_v49, %v2120_v46 }
 0x562   : > { %v2123_v23 = vmul.f32 0.03125, %v2113_v8  ;;  %v2124_v34 = vmul.f32 0.03125, %v2122_v5 }
 0x564   : > { %v2125_v7 = vadd.f32 1e-05, %v2123_v23  ;;  %v2126_v45 = vadd.f32 1e-05, %v2124_v34 }
 0x566   : > { %2937 = vrsqrt.f32 %v2125_v7 }
 0x567   : > { %2939 = vrsqrt.f32 %v2126_v45 }
 0x570   : > { %v2938_v1 = vpop.eup %2937 }
 0x571   : > { %v2940_v4 = vpop.eup %2939  ;;  %v2131_v54 = vmul.f32 %v2938_v1, %v2091_v38  ;;  %v2129_v35 = vmul.f32 %v2938_v1, %v2089_v13  ;;  %v2135_v19 = vmul.f32 %v2938_v1, %v2095_v42  ;;  %v2133_v56 = vmul.f32 %v2938_v1, %v2093_v47 }
 0x572   : > { %v2132_v57 = vmul.f32 %v2940_v4, %v2092_v51  ;;  %v2130_v43 = vmul.f32 %v2940_v4, %v2090_v33  ;;  %v2136_v10 = vmul.f32 %v2940_v4, %v2096_v48  ;;  %v2134_v59 = vmul.f32 %v2940_v4, %v2094_v63 }
 0x573   : > { %v2159_v20 = vmul.f32 %v2145_v39, %v2131_v54  ;;  %v2157_v12 = vmul.f32 %v2140_v21, %v2129_v35  ;;  %v2163_v0 = vmul.f32 %v2155_v41, %v2135_v19  ;;  %v2161_v22 = vmul.f32 %v2150_v58, %v2133_v56 }
 0x574   : > { %v2160_v15 = vmul.f32 %v2145_v39, %v2132_v57  ;;  %v2158_v55 = vmul.f32 %v2140_v21, %v2130_v43  ;;  %v2164_v17 = vmul.f32 %v2155_v41, %v2136_v10  ;;  %v2162_v16 = vmul.f32 %v2150_v58, %v2134_v59 }
 0x575   : > { %v4085_v40 = vadd.f32 %v2173_v53, %v2159_v20  ;;  %v4087_v38 = vadd.f32 %v2168_v29, %v2157_v12  ;;  %v4089_v42 = vadd.f32 %v2183_v32, %v2163_v0  ;;  %v4091_v13 = vadd.f32 %v2178_v50, %v2161_v22 }
 0x576   : > { %v4093_v48 = vadd.f32 %v2173_v53, %v2160_v15  ;;  %v4095_v33 = vadd.f32 %v2168_v29, %v2158_v55  ;;  %v4097_v51 = vadd.f32 %v2183_v32, %v2164_v17  ;;  %v4099_v47 = vadd.f32 %v2178_v50, %v2162_v16 }
 0x577   : > { %v2195_v63 = vmul.f32 %v4085_v40, %v4085_v40  ;;  %v2193_v31 = vmul.f32 %v4087_v38, %v4087_v38  ;;  %v2199_v6 = vmul.f32 %v4089_v42, %v4089_v42  ;;  %v2197_v2 = vmul.f32 %v4091_v13, %v4091_v13 }
 0x578   : > { %v2196_v60 = vmul.f32 %v4093_v48, %v4093_v48  ;;  %v2194_v9 = vmul.f32 %v4095_v33, %v4095_v33  ;;  %v2200_v61 = vmul.f32 %v4097_v51, %v4097_v51  ;;  %v2198_v36 = vmul.f32 %v4099_v47, %v4099_v47 }
 0x579   : > { %v2203_v44 = vmul.f32 %v2195_v63, %v4085_v40  ;;  %v2201_v30 = vmul.f32 %v2193_v31, %v4087_v38  ;;  %v2207_v46 = vmul.f32 %v2199_v6, %v4089_v42  ;;  %v2205_v37 = vmul.f32 %v2197_v2, %v4091_v13 }
 0x57a   : > { %v2204_v49 = vmul.f32 %v2196_v60, %v4093_v48  ;;  %v2202_v8 = vmul.f32 %v2194_v9, %v4095_v33  ;;  %v2208_v5 = vmul.f32 %v2200_v61, %v4097_v51  ;;  %v2206_v39 = vmul.f32 %v2198_v36, %v4099_v47 }
 0x57b   : > { %v2211_v23 = vmul.f32 0.044715, %v2203_v44  ;;  %v2209_v34 = vmul.f32 0.044715, %v2201_v30  ;;  %v2215_v21 = vmul.f32 0.044715, %v2207_v46 }
 0x57c   : > { %v2212_v7 = vmul.f32 0.044715, %v2204_v49  ;;  %v2210_v45 = vmul.f32 0.044715, %v2202_v8  ;;  %v2216_v53 = vmul.f32 0.044715, %v2208_v5 }
 0x57d   : > { %v2219_v29 = vadd.f32 %v2211_v23, %v4085_v40  ;;  %v2217_v41 = vadd.f32 %v2209_v34, %v4087_v38  ;;  %v2223_v58 = vadd.f32 %v2215_v21, %v4089_v42  ;;  %v2213_v1 = vmul.f32 0.044715, %v2205_v37 }
 0x57e   : > { %v2220_v4 = vadd.f32 %v2212_v7, %v4093_v48  ;;  %v2218_v54 = vadd.f32 %v2210_v45, %v4095_v33  ;;  %v2224_v35 = vadd.f32 %v2216_v53, %v4097_v51  ;;  %v2214_v19 = vmul.f32 0.044715, %v2206_v39 }
 0x57f   : > { %v2227_v56 = vmul.f32 0.7978846, %v2219_v29  ;;  %v2225_v57 = vmul.f32 0.7978846, %v2217_v41  ;;  %v2221_v43 = vadd.f32 %v2213_v1, %v4091_v13  ;;  %v2231_v12 = vmul.f32 0.7978846, %v2223_v58 }
 0x580   : > { %v2228_v10 = vmul.f32 0.7978846, %v2220_v4  ;;  %v2226_v59 = vmul.f32 0.7978846, %v2218_v54  ;;  %v2222_v20 = vadd.f32 %v2214_v19, %v4099_v47  ;;  %v2232_v0 = vmul.f32 0.7978846, %v2224_v35  ;;  %v2278_v19 = vpop.permute.xlu1 %2277 }
 0x581   : > { %2941 = vtanh.f32 %v2227_v56  ;;  %v2229_v22 = vmul.f32 0.7978846, %v2221_v43  ;;  %v2283_v56 = vpop.permute.xlu0 %2282 }
 0x582   : > { %2943 = vtanh.f32 %v2228_v10  ;;  %v2230_v15 = vmul.f32 0.7978846, %v2222_v20 }
 0x583   : > { %2945 = vtanh.f32 %v2225_v57 }
 0x584   : > { %2947 = vtanh.f32 %v2226_v59 }
 0x585   : > { %2949 = vtanh.f32 %v2231_v12 }
 0x586   : > { %2951 = vtanh.f32 %v2232_v0 }
 0x587   : > { %2953 = vtanh.f32 %v2229_v22  ;;  %v2288_v22 = vpop.permute.xlu1 %2287 }
 0x588   : > { %2955 = vtanh.f32 %v2230_v15 }
 0x58b   : > { %v2942_v55 = vpop.eup %2941 }
 0x58c   : > { %v2944_v17 = vpop.eup %2943  ;;  %v2243_v16 = vadd.f32 1.0, %v2942_v55 }
 0x58d   : > { %v2946_v32 = vpop.eup %2945  ;;  %v2244_v50 = vadd.f32 1.0, %v2944_v17 }
 0x58e   : > { %v2948_v63 = vpop.eup %2947  ;;  %v2241_v31 = vadd.f32 1.0, %v2946_v32  ;;  %v2251_v6 = vmul.f32 0.5, %v2243_v16 }
 0x58f   : > { %v2950_v2 = vpop.eup %2949  ;;  %v2242_v60 = vadd.f32 1.0, %v2948_v63  ;;  %v2252_v9 = vmul.f32 0.5, %v2244_v50  ;;  %v2293_v50 = vpop.permute.xlu0 %2292 }
 0x590   : > { %v2952_v61 = vpop.eup %2951  ;;  %v2249_v36 = vmul.f32 0.5, %v2241_v31  ;;  %v2259_v44 = vmul.f32 %v2251_v6, %v4085_v40  ;;  %v2247_v30 = vadd.f32 1.0, %v2950_v2 }
 0x591   : > { %v2954_v46 = vpop.eup %2953  ;;  %v2250_v37 = vmul.f32 0.5, %v2242_v60  ;;  %v2260_v49 = vmul.f32 %v2252_v9, %v4093_v48  ;;  %v2248_v8 = vadd.f32 1.0, %v2952_v61 }
 0x592   : > { %v2956_v5 = vpop.eup %2955  ;;  %v2257_v39 = vmul.f32 %v2249_v36, %v4087_v38  ;;  %v2245_v23 = vadd.f32 1.0, %v2954_v46  ;;  %v2255_v34 = vmul.f32 0.5, %v2247_v30 }
 0x593   : > { %v2258_v21 = vmul.f32 %v2250_v37, %v4095_v33  ;;  %v2246_v7 = vadd.f32 1.0, %v2956_v5  ;;  %v2256_v45 = vmul.f32 0.5, %v2248_v8  ;;  %v2759_v33 = vld [vmem:[%s4254_s4 + $0x40] sm:$0xff] }
 0x594   : > { %v2801_v53 = vpack.c.bf16 %v2259_v44, %v2257_v39  ;;  %v2253_v29 = vmul.f32 0.5, %v2245_v23  ;;  %v2263_v41 = vmul.f32 %v2255_v34, %v4089_v42  ;;  %v2760_v42 = vld [vmem:[%s4254_s4 + $0x48] sm:$0xff] }
 0x595   : > { %v2799_v40 = vpack.c.bf16 %v2260_v49, %v2258_v21  ;;  %v2254_v58 = vmul.f32 0.5, %v2246_v7  ;;  %v2264_v1 = vmul.f32 %v2256_v45, %v4097_v51  ;;  %v2762_v51 = vld [vmem:[%s4254_s4 + $0x58] sm:$0xff] }
 0x596   : > { %v2261_v48 = vmul.f32 %v2253_v29, %v4091_v13  ;;  %v2761_v13 = vld [vmem:[%s4254_s4 + $0x50] sm:$0xff] }
 0x597   : > { %2800 = vmatprep.subr.bf16.mxu0 %v2799_v40  ;;  %v2262_v4 = vmul.f32 %v2254_v58, %v4099_v47 }
 0x598   : > { %2802 = vmatpush1.bf16.msra.mxu0 %v2801_v53  ;;  %v2805_v38 = vpack.c.bf16 %v2263_v41, %v2261_v48 }
 0x599   : > { %v2803_v54 = vpack.c.bf16 %v2264_v1, %v2262_v4 }
 0x59b   : > { %2804 = vmatprep.subr.bf16.mxu0 %v2803_v54 }
 0x59c   : > { %2806 = vmatpush1.bf16.msra.mxu0 %v2805_v38 }
 0x59f   : > { %2767 = vmatmul.mubr.msk.f32.vlgmr.msra.gmra.mrb[4].mxu0 %vm818_vm2, %v2759_v33 }
 0x5a0   : > { %2377 = vmatprep.mubr.f32.mxu0 %v2998_v25 }
 0x5a3   : > { %2768 = vmatmul.mubr.msk.f32.gmra.mrb[6].mxu0 %vm818_vm2, %v2760_v42 }
 0x5a4   : > { %2383 = vmatprep.mubr.f32.mxu0 %v2998_v25 }
 0x5a7   : > { %2769 = vmatmul.mubr.msk.f32.gmra.mrb[8].mxu0 %vm818_vm2, %v2761_v13 }
 0x5a8   : > { %2389 = vmatprep.mubr.f32.mxu0 %v2998_v25 }
 0x5ab   : > { %2770 = vmatmul.mubr.msk.f32.gmra.mrb[10].mxu0 %vm818_vm2, %v2762_v51 }
 0x672   : > { %v2373_v47 = vpop.f32.mrb[4].mxu0 }
 0x673   : > { %v2375_v35 = vpop.f32.mrb[5].mxu0  ;;  %v2374_v43 = vadd.f32 %v2373_v47, %v2278_v19 }
 0x674   : > { %v2376_v20 = vadd.f32 %v2375_v35, %v2278_v19 }
 0x676   : > { %v2379_v57 = vpop.f32.mrb[6].mxu0 }
 0x677   : > { %v2380_v10 = vadd.f32 %v2379_v57, %v2283_v56  ;;  %v2381_v59 = vpop.f32.mrb[7].mxu0 }
 0x678   : > { %v2382_v12 = vadd.f32 %v2381_v59, %v2283_v56 }
 0x679   : > { %v2406_v0 = vadd.f32 %v2380_v10, %v2374_v43 }
 0x67a   : > { %v2415_v15 = vadd.f32 %v2382_v12, %v2376_v20  ;;  %v2385_v25 = vpop.f32.mrb[8].mxu0 }
 0x67b   : > { %v2386_v55 = vadd.f32 %v2385_v25, %v2288_v22  ;;  %v2387_v17 = vpop.f32.mrb[9].mxu0 }
 0x67c   : > { %v2388_v16 = vadd.f32 %v2387_v17, %v2288_v22 }
 0x67d   : > { %v2407_v32 = vadd.f32 %v2406_v0, %v2386_v55 }
 0x67e   : > { %v2416_v63 = vadd.f32 %v2415_v15, %v2388_v16  ;;  %v2391_v31 = vpop.f32.mrb[10].mxu0 }
 0x67f   : > { %v2392_v6 = vadd.f32 %v2391_v31, %v2293_v50  ;;  %v2393_v2 = vpop.f32.mrb[11].mxu0  ;;  %v2482_v31 = vpop.permute.xlu0 %2481 }
 0x680   : > { %v2394_v60 = vadd.f32 %v2393_v2, %v2293_v50 }
 0x681   : > { %v2408_v9 = vadd.f32 %v2407_v32, %v2392_v6 }
 0x682   : > { %v2417_v61 = vadd.f32 %v2416_v63, %v2394_v60 }
 0x683   : > { %v2409_v36 = vrot.slane %v2408_v9, 4 }
 0x684   : > { %v2418_v44 = vrot.slane %v2417_v61, 4 }
 0x685   : > { %v2410_v30 = vadd.f32 %v2409_v36, %v2408_v9  ;;  %v2492_v36 = vpop.permute.xlu0 %2491 }
 0x686   : > { %v2419_v46 = vadd.f32 %v2418_v44, %v2417_v61 }
 0x687   : > { %v2411_v37 = vrot.slane %v2410_v30, 2 }
 0x688   : > { %v2420_v49 = vrot.slane %v2419_v46, 2 }
 0x689   : > { %v2412_v8 = vadd.f32 %v2411_v37, %v2410_v30  ;;  %v2510_v30 = vpop.permute.xlu0 %2509 }
 0x68a   : > { %v2421_v5 = vadd.f32 %v2420_v49, %v2419_v46 }
 0x68b   : > { %v2413_v39 = vrot.slane %v2412_v8, 1 }
 0x68c   : > { %v2422_v23 = vrot.slane %v2421_v5, 1 }
 0x68d   : > { %v2414_v34 = vadd.f32 %v2413_v39, %v2412_v8 }
 0x68e   : > { %v2423_v21 = vadd.f32 %v2422_v23, %v2421_v5 }
 0x68f   : > { %v2424_v7 = vmul.f32 0.03125, %v2414_v34 }
 0x690   : > { %v2425_v45 = vmul.f32 0.03125, %v2423_v21 }
 0x691   : > { %v2426_v53 = vsub.f32 %v2374_v43, %v2424_v7  ;;  %v2428_v29 = vsub.f32 %v2380_v10, %v2424_v7  ;;  %v2430_v41 = vsub.f32 %v2386_v55, %v2424_v7  ;;  %v2432_v40 = vsub.f32 %v2392_v6, %v2424_v7  ;;  %v2477_v6 = vpop.permute.xlu1 %2476 }
 0x692   : > { %v2427_v58 = vsub.f32 %v2376_v20, %v2425_v45  ;;  %v2429_v1 = vsub.f32 %v2382_v12, %v2425_v45  ;;  %v2431_v48 = vsub.f32 %v2388_v16, %v2425_v45  ;;  %v2433_v4 = vsub.f32 %v2394_v60, %v2425_v45 }
 0x693   : > { %v2434_v38 = vmul.f32 %v2426_v53, %v2426_v53  ;;  %v2436_v54 = vmul.f32 %v2428_v29, %v2428_v29  ;;  %v2438_v13 = vmul.f32 %v2430_v41, %v2430_v41  ;;  %v2440_v19 = vmul.f32 %v2432_v40, %v2432_v40 }
 0x694   : > { %v2435_v33 = vmul.f32 %v2427_v58, %v2427_v58  ;;  %v2437_v42 = vmul.f32 %v2429_v1, %v2429_v1  ;;  %v2439_v47 = vmul.f32 %v2431_v48, %v2431_v48  ;;  %v2441_v57 = vmul.f32 %v2433_v4, %v2433_v4 }
 0x695   : > { %v2442_v51 = vadd.f32 %v2436_v54, %v2434_v38  ;;  %v2487_v44 = vpop.permute.xlu1 %2486 }
 0x696   : > { %v2451_v35 = vadd.f32 %v2437_v42, %v2435_v33 }
 0x697   : > { %v2443_v56 = vadd.f32 %v2442_v51, %v2438_v13  ;;  %v2520_v13 = vpop.permute.xlu0 %2519 }
 0x698   : > { %v2452_v59 = vadd.f32 %v2451_v35, %v2439_v47 }
 0x699   : > { %v2444_v43 = vadd.f32 %v2443_v56, %v2440_v19  ;;  %v2505_v46 = vpop.permute.xlu1 %2504 }
 0x69a   : > { %v2453_v10 = vadd.f32 %v2452_v59, %v2441_v57 }
 0x69b   : > { %v2445_v0 = vrot.slane %v2444_v43, 4 }
 0x69c   : > { %v2454_v22 = vrot.slane %v2453_v10, 4 }
 0x69d   : > { %v2446_v20 = vadd.f32 %v2445_v0, %v2444_v43  ;;  %v2515_v51 = vpop.permute.xlu1 %2514 }
 0x69e   : > { %v2455_v12 = vadd.f32 %v2454_v22, %v2453_v10 }
 0x69f   : > { %v2447_v15 = vrot.slane %v2446_v20, 2 }
 0x6a0   : > { %v2456_v25 = vrot.slane %v2455_v12, 2 }
 0x6a1   : > { %v2448_v55 = vadd.f32 %v2447_v15, %v2446_v20 }
 0x6a2   : > { %v2457_v17 = vadd.f32 %v2456_v25, %v2455_v12 }
 0x6a3   : > { %v2449_v16 = vrot.slane %v2448_v55, 1 }
 0x6a4   : > { %v2458_v32 = vrot.slane %v2457_v17, 1 }
 0x6a5   : > { %v2450_v50 = vadd.f32 %v2449_v16, %v2448_v55 }
 0x6a6   : > { %v2459_v63 = vadd.f32 %v2458_v32, %v2457_v17 }
 0x6a7   : > { %v2460_v2 = vmul.f32 0.03125, %v2450_v50 }
 0x6a8   : > { %v2461_v60 = vmul.f32 0.03125, %v2459_v63 }
 0x6a9   : > { %v2462_v9 = vadd.f32 1e-05, %v2460_v2 }
 0x6aa   : > { %v2463_v61 = vadd.f32 1e-05, %v2461_v60 }
 0x6ab   : > { %2957 = vrsqrt.f32 %v2462_v9 }
 0x6ac   : > { %2959 = vrsqrt.f32 %v2463_v61 }
 0x6b5   : > { %v2958_v37 = vpop.eup %2957 }
 0x6b6   : > { %v2960_v49 = vpop.eup %2959  ;;  %v2466_v8 = vmul.f32 %v2958_v37, %v2426_v53  ;;  %v2468_v5 = vmul.f32 %v2958_v37, %v2428_v29  ;;  %v2470_v39 = vmul.f32 %v2958_v37, %v2430_v41  ;;  %v2472_v23 = vmul.f32 %v2958_v37, %v2432_v40 }
 0x6b7   : > { %v2467_v34 = vmul.f32 %v2960_v49, %v2427_v58  ;;  %v2469_v21 = vmul.f32 %v2960_v49, %v2429_v1  ;;  %v2471_v7 = vmul.f32 %v2960_v49, %v2431_v48  ;;  %v2473_v45 = vmul.f32 %v2960_v49, %v2433_v4 }
 0x6b8   : > { %v2494_v38 = vmul.f32 %v2477_v6, %v2466_v8  ;;  %v2496_v54 = vmul.f32 %v2482_v31, %v2468_v5  ;;  %v2498_v33 = vmul.f32 %v2487_v44, %v2470_v39  ;;  %v2500_v42 = vmul.f32 %v2492_v36, %v2472_v23 }
 0x6b9   : > { %v2495_v47 = vmul.f32 %v2477_v6, %v2467_v34  ;;  %v2497_v35 = vmul.f32 %v2482_v31, %v2469_v21  ;;  %v2499_v19 = vmul.f32 %v2487_v44, %v2471_v7  ;;  %v2501_v56 = vmul.f32 %v2492_v36, %v2473_v45 }
 0x6ba   : > { %v4160_v57 = vadd.f32 %v2505_v46, %v2494_v38  ;;  %v4162_v53 = vadd.f32 %v2510_v30, %v2496_v54  ;;  %v4164_v29 = vadd.f32 %v2515_v51, %v2498_v33  ;;  %v4166_v41 = vadd.f32 %v2520_v13, %v2500_v42 }
 0x6bb   : > { %v4168_v40 = vadd.f32 %v2505_v46, %v2495_v47  ;;  %v4170_v58 = vadd.f32 %v2510_v30, %v2497_v35  ;;  %v4172_v1 = vadd.f32 %v2515_v51, %v2499_v19  ;;  %v4174_v48 = vadd.f32 %v2520_v13, %v2501_v56 }
 0x6bc   : > { %v2530_v4 = vmul.f32 %v4160_v57, %v4160_v57  ;;  %v2532_v59 = vmul.f32 %v4162_v53, %v4162_v53  ;;  %v2534_v43 = vmul.f32 %v4164_v29, %v4164_v29  ;;  %v2536_v10 = vmul.f32 %v4166_v41, %v4166_v41 }
 0x6bd   : > { %v2531_v0 = vmul.f32 %v4168_v40, %v4168_v40  ;;  %v2533_v22 = vmul.f32 %v4170_v58, %v4170_v58  ;;  %v2535_v20 = vmul.f32 %v4172_v1, %v4172_v1  ;;  %v2537_v12 = vmul.f32 %v4174_v48, %v4174_v48 }
 0x6be   : > { %v2538_v15 = vmul.f32 %v2530_v4, %v4160_v57  ;;  %v2540_v25 = vmul.f32 %v2532_v59, %v4162_v53  ;;  %v2542_v55 = vmul.f32 %v2534_v43, %v4164_v29  ;;  %v2544_v17 = vmul.f32 %v2536_v10, %v4166_v41 }
 0x6bf   : > { %v2539_v16 = vmul.f32 %v2531_v0, %v4168_v40  ;;  %v2541_v32 = vmul.f32 %v2533_v22, %v4170_v58  ;;  %v2543_v50 = vmul.f32 %v2535_v20, %v4172_v1  ;;  %v2545_v63 = vmul.f32 %v2537_v12, %v4174_v48 }
 0x6c0   : > { %v2546_v31 = vmul.f32 0.044715, %v2538_v15  ;;  %v2548_v6 = vmul.f32 0.044715, %v2540_v25  ;;  %v2550_v2 = vmul.f32 0.044715, %v2542_v55 }
 0x6c1   : > { %v2552_v60 = vmul.f32 0.044715, %v2544_v17  ;;  %v2547_v9 = vmul.f32 0.044715, %v2539_v16  ;;  %v2549_v61 = vmul.f32 0.044715, %v2541_v32 }
 0x6c2   : > { %v2554_v36 = vadd.f32 %v2546_v31, %v4160_v57  ;;  %v2556_v44 = vadd.f32 %v2548_v6, %v4162_v53  ;;  %v2558_v30 = vadd.f32 %v2550_v2, %v4164_v29  ;;  %v2551_v46 = vmul.f32 0.044715, %v2543_v50 }
 0x6c3   : > { %v2560_v37 = vadd.f32 %v2552_v60, %v4166_v41  ;;  %v2553_v49 = vmul.f32 0.044715, %v2545_v63  ;;  %v2555_v8 = vadd.f32 %v2547_v9, %v4168_v40  ;;  %v2557_v5 = vadd.f32 %v2549_v61, %v4170_v58 }
 0x6c4   : > { %v2562_v39 = vmul.f32 0.7978846, %v2554_v36  ;;  %v2564_v23 = vmul.f32 0.7978846, %v2556_v44  ;;  %v2566_v34 = vmul.f32 0.7978846, %v2558_v30  ;;  %v2559_v21 = vadd.f32 %v2551_v46, %v4172_v1 }
 0x6c5   : > { %v2568_v7 = vmul.f32 0.7978846, %v2560_v37  ;;  %v2561_v45 = vadd.f32 %v2553_v49, %v4174_v48  ;;  %v2563_v38 = vmul.f32 0.7978846, %v2555_v8  ;;  %v2565_v54 = vmul.f32 0.7978846, %v2557_v5 }
 0x6c6   : > { %2961 = vtanh.f32 %v2562_v39  ;;  %v2567_v33 = vmul.f32 0.7978846, %v2559_v21 }
 0x6c7   : > { %2963 = vtanh.f32 %v2564_v23  ;;  %v2569_v42 = vmul.f32 0.7978846, %v2561_v45 }
 0x6c8   : > { %2965 = vtanh.f32 %v2566_v34 }
 0x6c9   : > { %2967 = vtanh.f32 %v2568_v7 }
 0x6ca   : > { %2969 = vtanh.f32 %v2563_v38 }
 0x6cb   : > { %2971 = vtanh.f32 %v2565_v54 }
 0x6cc   : > { %2973 = vtanh.f32 %v2567_v33 }
 0x6cd   : > { %2975 = vtanh.f32 %v2569_v42 }
 0x6d0   : > { %v2962_v13 = vpop.eup %2961 }
 0x6d1   : > { %v2964_v51 = vpop.eup %2963  ;;  %v2578_v47 = vadd.f32 1.0, %v2962_v13 }
 0x6d2   : > { %v2966_v35 = vpop.eup %2965  ;;  %v2580_v19 = vadd.f32 1.0, %v2964_v51 }
 0x6d3   : > { %v2968_v56 = vpop.eup %2967  ;;  %v2582_v4 = vadd.f32 1.0, %v2966_v35  ;;  %v2586_v59 = vmul.f32 0.5, %v2578_v47 }
 0x6d4   : > { %v2970_v43 = vpop.eup %2969  ;;  %v2584_v10 = vadd.f32 1.0, %v2968_v56  ;;  %v2588_v0 = vmul.f32 0.5, %v2580_v19 }
 0x6d5   : > { %v2972_v22 = vpop.eup %2971  ;;  %v2590_v20 = vmul.f32 0.5, %v2582_v4  ;;  %v2594_v12 = vmul.f32 %v2586_v59, %v4160_v57  ;;  %v2579_v15 = vadd.f32 1.0, %v2970_v43 }
 0x6d6   : > { %v2974_v25 = vpop.eup %2973  ;;  %v2592_v55 = vmul.f32 0.5, %v2584_v10  ;;  %v2596_v17 = vmul.f32 %v2588_v0, %v4162_v53  ;;  %v2581_v16 = vadd.f32 1.0, %v2972_v22 }
 0x6d7   : > { %v2976_v32 = vpop.eup %2975  ;;  %v2598_v50 = vmul.f32 %v2590_v20, %v4164_v29  ;;  %v2602_v63 = vadd.f32 %v2594_v12, %v3873_v28  ;;  %v2583_v31 = vadd.f32 1.0, %v2974_v25  ;;  %v2587_v6 = vmul.f32 0.5, %v2579_v15 }
 0x6d8   : > { %v2600_v57 = vmul.f32 %v2592_v55, %v4166_v41  ;;  %v2604_v2 = vadd.f32 %v2596_v17, %v3881_v24  ;;  %v2585_v53 = vadd.f32 1.0, %v2976_v32  ;;  %v2589_v60 = vmul.f32 0.5, %v2581_v16 }
 0x6d9   : > { %v2606_v29 = vadd.f32 %v2598_v50, %v3892_v18  ;;  %v2610_v28 = vmul.f32 %v2602_v63, %v3098_v11  ;;  %v2591_v9 = vmul.f32 0.5, %v2583_v31  ;;  %v2595_v61 = vmul.f32 %v2587_v6, %v4168_v40 }
 0x6da   : > { %v2608_v36 = vadd.f32 %v2600_v57, %v3898_v62  ;;  %v2612_v44 = vmul.f32 %v2604_v2, %v3098_v11  ;;  %v2593_v30 = vmul.f32 0.5, %v2585_v53  ;;  %v2597_v41 = vmul.f32 %v2589_v60, %v4170_v58 }
 0x6db   : > { %v2614_v24 = vmul.f32 %v2606_v29, %v3098_v11  ;;  %2618 = vst [vmem:[%s4217_s22] sm:$0xff] %v2610_v28  ;;  %v2599_v18 = vmul.f32 %v2591_v9, %v4172_v1  ;;  %v2603_v46 = vadd.f32 %v2595_v61, %v3908_v27 }
 0x6dc   : > { %v2616_v40 = vmul.f32 %v2608_v36, %v3098_v11  ;;  %2620 = vst [vmem:[%s4217_s22 + $0x10] sm:$0xff] %v2612_v44  ;;  %v2601_v62 = vmul.f32 %v2593_v30, %v4174_v48  ;;  %v2605_v37 = vadd.f32 %v2597_v41, %v3923_v26 }
 0x6dd   : > { %2622 = vst [vmem:[%s4217_s22 + $0x20] sm:$0xff] %v2614_v24  ;;  %v2607_v58 = vadd.f32 %v2599_v18, %v3938_v3  ;;  %v2611_v49 = vmul.f32 %v2603_v46, %v3102_v14 }
 0x6de   : > { %2624 = vst [vmem:[%s4217_s22 + $0x30] sm:$0xff] %v2616_v40  ;;  %v2609_v8 = vadd.f32 %v2601_v62, %v3935_v52  ;;  %v2613_v1 = vmul.f32 %v2605_v37, %v3102_v14 }
 0x6df   : > { %v2615_v27 = vmul.f32 %v2607_v58, %v3102_v14  ;;  %2619 = vst [vmem:[%s4217_s22 + $0x8] sm:$0xff] %v2611_v49 }
 0x6e0   : > { %v2617_v11 = vmul.f32 %v2609_v8, %v3102_v14  ;;  %2621 = vst [vmem:[%s4217_s22 + $0x18] sm:$0xff] %v2613_v1 }
 0x6e1   : > { %2623 = vst [vmem:[%s4217_s22 + $0x28] sm:$0xff] %v2615_v27 }
 0x6e2   : > { %2625 = vst [vmem:[%s4217_s22 + $0x38] sm:$0xff] %v2617_v11 }
 0x6e3 PF: > { %s20_s13 = sadd.s32 1, %s2991_s13  }
 0x6e4   : > { %p17_p4 = scmp.ge.s32.totalorder %s20_s13, 4  }
 0x6e6   :  { %19 = sbr.rel (!%p17_p4) target bundleno = 1 (0x1), region = 109 }

</bundles_post_ra>
